<compile_context>
chip_gen: v5e
topology: v5e:2x2
jax: 0.10.0
libtpu: 0.0.40
codegen_flags: <defaults>
</compile_context>

<pallas_src>
import jax
import jax.numpy as jnp
from jax.experimental import pallas as pl
from jax.experimental.pallas import tpu as pltpu


def _round_up(x, m):
    return ((x + m - 1) // m) * m


def _device_defaults():
    """(row_tile, vmem_limit_bytes) tuned per TPU generation (conservative fallback)."""
    try:
        kind = jax.devices()[0].device_kind.lower()
    except Exception:
        kind = ""
    if ("v5" in kind) or ("v6" in kind):
        # 128 MiB physical VMEM: big tiles amortize per-step pipeline overhead.
        return 512, 96 * 1024 * 1024
    # v7x (64 MiB VMEM per TensorCore) and unknown chips: stay conservative.
    return 256, 48 * 1024 * 1024


def _first_max_onehot(x, axis):
    """One-hot of the FIRST maximal element along `axis` (torch argmax tie-breaking)."""
    m = jnp.max(x, axis=axis, keepdims=True)
    iota = jax.lax.broadcasted_iota(jnp.int32, x.shape, axis)
    sentinel = jnp.int32(x.shape[axis])
    idx = jnp.min(jnp.where(x == m, iota, sentinel), axis=axis, keepdims=True)
    return (iota == idx).astype(jnp.float32)


def quantization_kernel(v_ref, pq_ref, pqt_ref, pqsq_ref, b_ref, b2_ref, cbsq_ref,
                        simi_ref, centers_ref, assign_ref, qvec_ref):
    v = v_ref[...]                                   # (T, E)  f32
    T, E = v.shape
    _, C, K = assign_ref.shape

    # ---- pq_selection: simi = -(||v||^2 + ||pq||^2 - 2 v.pq^T) ---- (f32: exact argmax)
    ip = jnp.dot(v, pqt_ref[...], preferred_element_type=jnp.float32)        # (T, P)
    n1 = jnp.sum(v * v, axis=-1, keepdims=True)                              # (T, 1)
    simi = 2.0 * ip - n1 - pqsq_ref[...]                                     # (T, P)
    simi_ref[...] = simi

    # pq_centers = pq_assign_layer[argmax(simi, -1)]  (gather as one-hot @ pq on MXU)
    oh_p = _first_max_onehot(simi, axis=1)                                   # (T, P)
    centers = jnp.dot(oh_p, pq_ref[...], preferred_element_type=jnp.float32)  # (T, E)
    centers_ref[...] = centers

    # ---- code_selection on residual (lane-dense block-diagonal matmul, bf16 MXU) ----
    # cross[n, c*K+k] = sum_s r[n, c*S+s] * cb[c, k, s]
    r_b = (v - centers).astype(jnp.bfloat16)                                 # (T, E) bf16
    cross2 = 2.0 * jnp.dot(r_b, b_ref[...], preferred_element_type=jnp.float32)  # (T, C*K)
    # softmax over k is invariant to the per-(n,c) constant -||r||^2, so drop it.
    logits = (cross2 - cbsq_ref[...]) * 100.0                                # proba / 0.01
    l3 = logits.reshape(T, C, K)

    # Single per-codebook max, reused for softmax shift AND the hard one-hot.
    m = jnp.max(l3, axis=-1, keepdims=True)                                  # (T, C, 1)
    e = jnp.exp(l3 - m)
    inv_sum = pl.reciprocal(jnp.sum(e, axis=-1, keepdims=True), approx=True)
    assign_ref[...] = (e * inv_sum).astype(assign_ref.dtype)                 # (T, C, K)

    # ---- STEstimator forward value = hard one-hot (argmax over logits == over softmax) ----
    iota_k = jax.lax.broadcasted_iota(jnp.int32, l3.shape, 2)
    idx = jnp.min(jnp.where(l3 == m, iota_k, jnp.int32(K)), axis=2, keepdims=True)
    oh_k = (iota_k == idx).astype(jnp.bfloat16)                              # exact in bf16
    quant = jnp.dot(oh_k.reshape(T, C * K), b2_ref[...],
                    preferred_element_type=jnp.float32)                      # (T, E)

    # normalize(pq_centers + quantized, dim=-1)   (F.normalize, eps=1e-12)
    out = centers + quant
    inv = jax.lax.rsqrt(jnp.maximum(jnp.sum(out * out, axis=-1, keepdims=True), 1e-24))
    qvec_ref[...] = out * inv


def quantization_forward(vectors, pq_assign_layer, codebooks, *,
                         row_tile=None, vmem_limit_bytes=None,
                         assign_dtype=jnp.bfloat16):
    """Returns (pq_simi, pq_centers, codeword_assign, quantized_vecs)."""
    dev_tile, dev_vmem = _device_defaults()
    if row_tile is None:
        row_tile = dev_tile
    if vmem_limit_bytes is None:
        vmem_limit_bytes = dev_vmem

    vectors = jnp.asarray(vectors, jnp.float32)
    pq = jnp.asarray(pq_assign_layer, jnp.float32)
    cb = jnp.asarray(codebooks, jnp.float32)

    N, E = vectors.shape
    P = pq.shape[0]
    C, K, S = cb.shape
    assert E == C * S, "emb_size must equal num_codebook * subvec_size"

    # ---- batch-independent constants, hoisted out of the kernel ----
    pq_t = pq.T                                             # (E, P) for v @ pq^T
    pq_sq = jnp.sum(pq * pq, axis=-1)[None, :]              # (1, P)
    eye_c = jnp.eye(C, dtype=jnp.float32)
    # B[c*S+s, c*K+k] = cb[c, k, s]  (block-diagonal), B2 = B.T.  Stored in bf16 for
    # the MXU (f32 accumulation in-kernel) and to halve their VMEM/DMA footprint.
    B = jnp.einsum('cks,cd->csdk', cb, eye_c).reshape(E, C * K)
    B_bf = B.astype(jnp.bfloat16)
    B2_bf = B.T.astype(jnp.bfloat16)                        # (C*K, E)
    cb_sq = jnp.sum(cb * cb, axis=-1).reshape(1, C * K)     # (1, C*K)  f32

    # ---- tile the batch axis; pad to a multiple of the row tile ----
    T = min(_round_up(row_tile, 8), _round_up(N, 8))
    Np = _round_up(N, T)
    if Np != N:
        vectors = jnp.pad(vectors, ((0, Np - N), (0, 0)))
    grid = (Np // T,)

    const2 = lambda i: (0, 0)
    out_shapes = (
        jax.ShapeDtypeStruct((Np, P), jnp.float32),      # pq_simi
        jax.ShapeDtypeStruct((Np, E), jnp.float32),      # pq_centers
        jax.ShapeDtypeStruct((Np, C, K), assign_dtype),  # codeword_assign (soft, bf16)
        jax.ShapeDtypeStruct((Np, E), jnp.float32),      # quantized_vecs
    )
    grid_spec = pltpu.PrefetchScalarGridSpec(
        num_scalar_prefetch=0,
        grid=grid,
        in_specs=[
            pl.BlockSpec((T, E), lambda i: (i, 0)),      # vectors (tiled over N)
            pl.BlockSpec((P, E), const2),                # pq
            pl.BlockSpec((E, P), const2),                # pq^T
            pl.BlockSpec((1, P), const2),                # ||pq||^2
            pl.BlockSpec((E, C * K), const2),            # B  (block-diag codebooks, bf16)
            pl.BlockSpec((C * K, E), const2),            # B2 (scatter, bf16)
            pl.BlockSpec((1, C * K), const2),            # ||codeword||^2
        ],
        out_specs=[
            pl.BlockSpec((T, P), lambda i: (i, 0)),
            pl.BlockSpec((T, E), lambda i: (i, 0)),
            pl.BlockSpec((T, C, K), lambda i: (i, 0, 0)),
            pl.BlockSpec((T, E), lambda i: (i, 0)),
        ],
    )
    outs = pl.pallas_call(
        quantization_kernel,
        out_shape=out_shapes,
        grid_spec=grid_spec,
        compiler_params=pltpu.CompilerParams(
            dimension_semantics=("parallel",),            # megacore sharding on v7x
            vmem_limit_bytes=vmem_limit_bytes,
        ),
    )(vectors, pq, pq_t, pq_sq, B_bf, B2_bf, cb_sq)

    if Np != N:
        outs = tuple(o[:N] for o in outs)
    return outs


def _reference_forward(vectors, pq, cb):
    """Pure-JAX reference mirroring the PyTorch forward (rotate=None).

    Mirrors the kernel's mixed precision on the two hot matmuls (bf16 inputs,
    f32 accumulation); everything else stays f32 like the PyTorch module.
    """
    ip = vectors @ pq.T
    n1 = jnp.sum(vectors ** 2, axis=-1, keepdims=True)
    n2 = jnp.sum(pq ** 2, axis=-1, keepdims=True)
    simi = -(n1 + n2.T - 2.0 * ip)
    pq_index = jnp.argmax(simi, axis=-1)
    centers = pq[pq_index]
    N, E = vectors.shape
    C, K, S = cb.shape
    r = (vectors - centers).reshape(N, C, S)
    cb_b = cb.astype(jnp.bfloat16)
    cross = jnp.einsum('ncs,cks->nck', r.astype(jnp.bfloat16), cb_b,
                       preferred_element_type=jnp.float32)
    proba = -(jnp.sum(r * r, -1)[:, :, None] + jnp.sum(cb * cb, -1)[None] - 2.0 * cross)
    assign = jax.nn.softmax(proba / 0.01, axis=-1)
    hard = jax.nn.one_hot(jnp.argmax(assign, axis=-1), K, dtype=jnp.float32)
    quant = jnp.einsum('nck,cks->ncs', hard, cb_b.astype(jnp.float32)).reshape(N, E)
    out = centers + quant
    out = out / jnp.maximum(jnp.linalg.norm(out, axis=-1, keepdims=True), 1e-12)
    return simi, centers, assign, out


if __name__ == "__main__":
    # Small, module-consistent config:
    #   num_pq=256, num_codebook=16, num_codeword=128, subvec_size=8 -> emb=128
    # N=20 and row_tile=8 exercise both the padding path and a multi-step grid.
    N = 20
    num_pq, num_codebook, num_codeword, subvec_size = 256, 16, 128, 8
    emb = num_codebook * subvec_size

    key = jax.random.PRNGKey(0)
    k_vec, k_pq, k_cb = jax.random.split(key, 3)
    vectors = jax.random.normal(k_vec, (N, emb), dtype=jnp.float32) * 0.1
    pq_assign_layer = jax.random.uniform(k_pq, (num_pq, emb), jnp.float32, -0.1, 0.1)
    codebooks = jax.random.uniform(
        k_cb, (num_codebook, num_codeword, subvec_size), jnp.float32, -0.1, 0.1)
    # rotate is None for the default use_rotate=False, so rotate_vec is identity.

    pq_simi, pq_centers, codeword_assign, quantized_vecs = jax.block_until_ready(
        quantization_forward(vectors, pq_assign_layer, codebooks, row_tile=8))

    # Light correctness check against a pure-JAX reference (bf16-mirrored hot matmuls).
    r_simi, r_centers, r_assign, r_qvec = _reference_forward(
        vectors, pq_assign_layer, codebooks)
    assert pq_simi.shape == (N, num_pq)
    assert pq_centers.shape == (N, emb)
    assert codeword_assign.shape == (N, num_codebook, num_codeword)
    assert codeword_assign.dtype == jnp.bfloat16
    assert quantized_vecs.shape == (N, emb)
    assert jnp.allclose(pq_simi, r_simi, atol=1e-3, rtol=1e-3)
    assert jnp.allclose(pq_centers, r_centers, atol=1e-4, rtol=1e-4)
    # assign is stored in bf16 and uses an approx reciprocal -> relaxed tolerance.
    assert jnp.allclose(codeword_assign.astype(jnp.float32), r_assign,
                        atol=1e-2, rtol=1e-2)
    assert jnp.allclose(quantized_vecs, r_qvec, atol=1e-3, rtol=1e-3)

    print("KERNEL_OK")
</pallas_src>

<mosaic_0001>
module attributes {stable_mosaic.version = 11 : i64} {
  func.func @quantization_kernel(%arg0: i32, %arg1: memref<8x128xf32, #tpu.memory_space<vmem>>, %arg2: memref<256x128xf32, #tpu.memory_space<vmem>>, %arg3: memref<128x256xf32, #tpu.memory_space<vmem>>, %arg4: memref<1x256xf32, #tpu.memory_space<vmem>>, %arg5: memref<128x2048xbf16, #tpu.memory_space<vmem>>, %arg6: memref<2048x128xbf16, #tpu.memory_space<vmem>>, %arg7: memref<1x2048xf32, #tpu.memory_space<vmem>>, %arg8: memref<8x256xf32, #tpu.memory_space<vmem>>, %arg9: memref<8x128xf32, #tpu.memory_space<vmem>>, %arg10: memref<8x16x128xbf16, #tpu.memory_space<vmem>>, %arg11: memref<8x128xf32, #tpu.memory_space<vmem>>) attributes {dimension_semantics = [#tpu.dimension_semantics<parallel>], iteration_bounds = array<i64: 3>, scalar_prefetch = 0 : i64, scratch_operands = 0 : i64, tpu.core_type = #tpu.core_type<tc>, window_params = [{transform_indices = @transform_0, window_bounds = array<i64: 8, 128>}, {pipeline_mode = #tpu.pipeline_mode<synchronous>, transform_indices = @transform_1, window_bounds = array<i64: 256, 128>}, {pipeline_mode = #tpu.pipeline_mode<synchronous>, transform_indices = @transform_2, window_bounds = array<i64: 128, 256>}, {pipeline_mode = #tpu.pipeline_mode<synchronous>, transform_indices = @transform_3, window_bounds = array<i64: 1, 256>}, {pipeline_mode = #tpu.pipeline_mode<synchronous>, transform_indices = @transform_4, window_bounds = array<i64: 128, 2048>}, {pipeline_mode = #tpu.pipeline_mode<synchronous>, transform_indices = @transform_5, window_bounds = array<i64: 2048, 128>}, {pipeline_mode = #tpu.pipeline_mode<synchronous>, transform_indices = @transform_6, window_bounds = array<i64: 1, 2048>}, {transform_indices = @transform_7, window_bounds = array<i64: 8, 256>}, {transform_indices = @transform_8, window_bounds = array<i64: 8, 128>}, {transform_indices = @transform_9, window_bounds = array<i64: 8, 16, 128>}, {transform_indices = @transform_10, window_bounds = array<i64: 8, 128>}]} {
    %c0 = arith.constant 0 : index
    %c0_0 = arith.constant 0 : index
    %0 = vector.load %arg1[%c0, %c0_0] : memref<8x128xf32, #tpu.memory_space<vmem>>, vector<8x128xf32>
    %c0_1 = arith.constant 0 : index
    %c0_2 = arith.constant 0 : index
    %1 = vector.load %arg3[%c0_1, %c0_2] : memref<128x256xf32, #tpu.memory_space<vmem>>, vector<128x256xf32>
    %cst = arith.constant dense<0.000000e+00> : vector<8x256xf32>
    %2 = tpu.matmul %0, %1, %cst {dimension_numbers = #tpu.dot_dimension_numbers<[1], [0], [0], [1], [0, 0, 1, 1], [], []>} : vector<8x128xf32>, vector<128x256xf32>, vector<8x256xf32> -> vector<8x256xf32>
    %3 = arith.mulf %0, %0 : vector<8x128xf32>
    %cst_3 = arith.constant dense<0.000000e+00> : vector<8xf32>
    %4 = vector.multi_reduction <add>, %3, %cst_3 [1] : vector<8x128xf32> to vector<8xf32>
    %5 = vector.shape_cast %4 : vector<8xf32> to vector<8x1xf32>
    %cst_4 = arith.constant 2.000000e+00 : f32
    %6 = vector.broadcast %cst_4 : f32 to vector<8x256xf32>
    %7 = arith.mulf %6, %2 : vector<8x256xf32>
    %8 = vector.broadcast %5 : vector<8x1xf32> to vector<8x256xf32>
    %9 = arith.subf %7, %8 : vector<8x256xf32>
    %c0_5 = arith.constant 0 : index
    %c0_6 = arith.constant 0 : index
    %10 = vector.load %arg4[%c0_5, %c0_6] : memref<1x256xf32, #tpu.memory_space<vmem>>, vector<1x256xf32>
    %11 = vector.broadcast %10 : vector<1x256xf32> to vector<8x256xf32>
    %12 = arith.subf %9, %11 : vector<8x256xf32>
    %c0_7 = arith.constant 0 : index
    %c0_8 = arith.constant 0 : index
    %13 = vector.load %arg8[%c0_7, %c0_8] : memref<8x256xf32, #tpu.memory_space<vmem>>, vector<8x256xf32>
    tpu.vector_store %arg8[%c0_7, %c0_8], %12 {strides = array<i32>} : memref<8x256xf32, #tpu.memory_space<vmem>>, vector<8x256xf32>,
    %cst_9 = arith.constant dense<0xFF800000> : vector<8xf32>
    %14 = vector.multi_reduction <maximumf>, %12, %cst_9 [1] : vector<8x256xf32> to vector<8xf32>
    %15 = vector.shape_cast %14 : vector<8xf32> to vector<8x1xf32>
    %16 = tpu.iota {dimensions = array<i32: 1>} : vector<8x256xi32>
    %17 = vector.broadcast %15 : vector<8x1xf32> to vector<8x256xf32>
    %18 = arith.cmpf oeq, %12, %17 : vector<8x256xf32>
    %c256_i32 = arith.constant 256 : i32
    %19 = vector.broadcast %c256_i32 : i32 to vector<8x256xi32>
    %20 = arith.select %18, %16, %19 : vector<8x256xi1>, vector<8x256xi32>
    %cst_10 = arith.constant dense<2147483647> : vector<8xi32>
    %21 = vector.multi_reduction <minsi>, %20, %cst_10 [1] : vector<8x256xi32> to vector<8xi32>
    %22 = vector.shape_cast %21 : vector<8xi32> to vector<8x1xi32>
    %23 = vector.broadcast %22 : vector<8x1xi32> to vector<8x256xi32>
    %24 = arith.cmpi eq, %16, %23 : vector<8x256xi32>
    %25 = arith.extui %24 : vector<8x256xi1> to vector<8x256xi32>
    %26 = arith.sitofp %25 : vector<8x256xi32> to vector<8x256xf32>
    %c0_11 = arith.constant 0 : index
    %c0_12 = arith.constant 0 : index
    %27 = vector.load %arg2[%c0_11, %c0_12] : memref<256x128xf32, #tpu.memory_space<vmem>>, vector<256x128xf32>
    %cst_13 = arith.constant dense<0.000000e+00> : vector<8x128xf32>
    %28 = tpu.matmul %26, %27, %cst_13 {dimension_numbers = #tpu.dot_dimension_numbers<[1], [0], [0], [1], [0, 0, 1, 1], [], []>} : vector<8x256xf32>, vector<256x128xf32>, vector<8x128xf32> -> vector<8x128xf32>
    %c0_14 = arith.constant 0 : index
    %c0_15 = arith.constant 0 : index
    %29 = vector.load %arg9[%c0_14, %c0_15] : memref<8x128xf32, #tpu.memory_space<vmem>>, vector<8x128xf32>
    tpu.vector_store %arg9[%c0_14, %c0_15], %28 {strides = array<i32>} : memref<8x128xf32, #tpu.memory_space<vmem>>, vector<8x128xf32>,
    %30 = arith.subf %0, %28 : vector<8x128xf32>
    %31 = arith.truncf %30 : vector<8x128xf32> to vector<8x128xbf16>
    %c0_16 = arith.constant 0 : index
    %c0_17 = arith.constant 0 : index
    %32 = vector.load %arg5[%c0_16, %c0_17] : memref<128x2048xbf16, #tpu.memory_space<vmem>>, vector<128x2048xbf16>
    %cst_18 = arith.constant dense<0.000000e+00> : vector<8x2048xf32>
    %33 = tpu.matmul %31, %32, %cst_18 {dimension_numbers = #tpu.dot_dimension_numbers<[1], [0], [0], [1], [0, 0, 1, 1], [], []>} : vector<8x128xbf16>, vector<128x2048xbf16>, vector<8x2048xf32> -> vector<8x2048xf32>
    %cst_19 = arith.constant 2.000000e+00 : f32
    %34 = vector.broadcast %cst_19 : f32 to vector<8x2048xf32>
    %35 = arith.mulf %34, %33 : vector<8x2048xf32>
    %c0_20 = arith.constant 0 : index
    %c0_21 = arith.constant 0 : index
    %36 = vector.load %arg7[%c0_20, %c0_21] : memref<1x2048xf32, #tpu.memory_space<vmem>>, vector<1x2048xf32>
    %37 = vector.broadcast %36 : vector<1x2048xf32> to vector<8x2048xf32>
    %38 = arith.subf %35, %37 : vector<8x2048xf32>
    %cst_22 = arith.constant 1.000000e+02 : f32
    %39 = vector.broadcast %cst_22 : f32 to vector<8x2048xf32>
    %40 = arith.mulf %38, %39 : vector<8x2048xf32>
    %41 = vector.shape_cast %40 : vector<8x2048xf32> to vector<8x16x128xf32>
    %cst_23 = arith.constant dense<0xFF800000> : vector<8x16xf32>
    %42 = vector.multi_reduction <maximumf>, %41, %cst_23 [2] : vector<8x16x128xf32> to vector<8x16xf32>
    %43 = vector.shape_cast %42 : vector<8x16xf32> to vector<8x16x1xf32>
    %44 = vector.broadcast %43 : vector<8x16x1xf32> to vector<8x16x128xf32>
    %45 = arith.subf %41, %44 : vector<8x16x128xf32>
    %46 = math.exp %45 : vector<8x16x128xf32>
    %cst_24 = arith.constant dense<0.000000e+00> : vector<8x16xf32>
    %47 = vector.multi_reduction <add>, %46, %cst_24 [2] : vector<8x16x128xf32> to vector<8x16xf32>
    %48 = vector.shape_cast %47 : vector<8x16xf32> to vector<8x16x1xf32>
    %49 = tpu.reciprocal %48 {approx = true} : vector<8x16x1xf32> -> vector<8x16x1xf32>
    %50 = vector.broadcast %49 : vector<8x16x1xf32> to vector<8x16x128xf32>
    %51 = arith.mulf %46, %50 : vector<8x16x128xf32>
    %52 = arith.truncf %51 : vector<8x16x128xf32> to vector<8x16x128xbf16>
    %c0_25 = arith.constant 0 : index
    %c0_26 = arith.constant 0 : index
    %c0_27 = arith.constant 0 : index
    %53 = vector.load %arg10[%c0_25, %c0_26, %c0_27] : memref<8x16x128xbf16, #tpu.memory_space<vmem>>, vector<8x16x128xbf16>
    tpu.vector_store %arg10[%c0_25, %c0_26, %c0_27], %52 {strides = array<i32>} : memref<8x16x128xbf16, #tpu.memory_space<vmem>>, vector<8x16x128xbf16>,
    %54 = tpu.iota {dimensions = array<i32: 2>} : vector<8x16x128xi32>
    %55 = vector.broadcast %43 : vector<8x16x1xf32> to vector<8x16x128xf32>
    %56 = arith.cmpf oeq, %41, %55 : vector<8x16x128xf32>
    %c128_i32 = arith.constant 128 : i32
    %57 = vector.broadcast %c128_i32 : i32 to vector<8x16x128xi32>
    %58 = arith.select %56, %54, %57 : vector<8x16x128xi1>, vector<8x16x128xi32>
    %cst_28 = arith.constant dense<2147483647> : vector<8x16xi32>
    %59 = vector.multi_reduction <minsi>, %58, %cst_28 [2] : vector<8x16x128xi32> to vector<8x16xi32>
    %60 = vector.shape_cast %59 : vector<8x16xi32> to vector<8x16x1xi32>
    %61 = vector.broadcast %60 : vector<8x16x1xi32> to vector<8x16x128xi32>
    %62 = arith.cmpi eq, %54, %61 : vector<8x16x128xi32>
    %63 = arith.extui %62 : vector<8x16x128xi1> to vector<8x16x128xi32>
    %64 = arith.sitofp %63 : vector<8x16x128xi32> to vector<8x16x128xf32>
    %65 = arith.truncf %64 : vector<8x16x128xf32> to vector<8x16x128xbf16>
    %66 = vector.shape_cast %65 : vector<8x16x128xbf16> to vector<8x2048xbf16>
    %c0_29 = arith.constant 0 : index
    %c0_30 = arith.constant 0 : index
    %67 = vector.load %arg6[%c0_29, %c0_30] : memref<2048x128xbf16, #tpu.memory_space<vmem>>, vector<2048x128xbf16>
    %cst_31 = arith.constant dense<0.000000e+00> : vector<8x128xf32>
    %68 = tpu.matmul %66, %67, %cst_31 {dimension_numbers = #tpu.dot_dimension_numbers<[1], [0], [0], [1], [0, 0, 1, 1], [], []>} : vector<8x2048xbf16>, vector<2048x128xbf16>, vector<8x128xf32> -> vector<8x128xf32>
    %69 = arith.addf %28, %68 : vector<8x128xf32>
    %70 = arith.mulf %69, %69 : vector<8x128xf32>
    %cst_32 = arith.constant dense<0.000000e+00> : vector<8xf32>
    %71 = vector.multi_reduction <add>, %70, %cst_32 [1] : vector<8x128xf32> to vector<8xf32>
    %72 = vector.shape_cast %71 : vector<8xf32> to vector<8x1xf32>
    %cst_33 = arith.constant 1.000000e-24 : f32
    %73 = vector.broadcast %cst_33 : f32 to vector<8x1xf32>
    %74 = arith.maximumf %72, %73 : vector<8x1xf32>
    %75 = math.rsqrt %74 : vector<8x1xf32>
    %76 = vector.broadcast %75 : vector<8x1xf32> to vector<8x128xf32>
    %77 = arith.mulf %69, %76 : vector<8x128xf32>
    %c0_34 = arith.constant 0 : index
    %c0_35 = arith.constant 0 : index
    %78 = vector.load %arg11[%c0_34, %c0_35] : memref<8x128xf32, #tpu.memory_space<vmem>>, vector<8x128xf32>
    tpu.vector_store %arg11[%c0_34, %c0_35], %77 {strides = array<i32>} : memref<8x128xf32, #tpu.memory_space<vmem>>, vector<8x128xf32>,
    return
  }
  func.func @transform_0(%arg0: i32) -> (i32, i32) {
    %c0_i32 = arith.constant 0 : i32
    %c0_i32_0 = arith.constant 0 : i32
    return %arg0, %c0_i32 : i32, i32
  }
  func.func @transform_1(%arg0: i32) -> (i32, i32) {
    %c0_i32 = arith.constant 0 : i32
    %c0_i32_0 = arith.constant 0 : i32
    %c0_i32_1 = arith.constant 0 : i32
    return %c0_i32, %c0_i32_0 : i32, i32
  }
  func.func @transform_2(%arg0: i32) -> (i32, i32) {
    %c0_i32 = arith.constant 0 : i32
    %c0_i32_0 = arith.constant 0 : i32
    %c0_i32_1 = arith.constant 0 : i32
    return %c0_i32, %c0_i32_0 : i32, i32
  }
  func.func @transform_3(%arg0: i32) -> (i32, i32) {
    %c0_i32 = arith.constant 0 : i32
    %c0_i32_0 = arith.constant 0 : i32
    %c0_i32_1 = arith.constant 0 : i32
    return %c0_i32, %c0_i32_0 : i32, i32
  }
  func.func @transform_4(%arg0: i32) -> (i32, i32) {
    %c0_i32 = arith.constant 0 : i32
    %c0_i32_0 = arith.constant 0 : i32
    %c0_i32_1 = arith.constant 0 : i32
    return %c0_i32, %c0_i32_0 : i32, i32
  }
  func.func @transform_5(%arg0: i32) -> (i32, i32) {
    %c0_i32 = arith.constant 0 : i32
    %c0_i32_0 = arith.constant 0 : i32
    %c0_i32_1 = arith.constant 0 : i32
    return %c0_i32, %c0_i32_0 : i32, i32
  }
  func.func @transform_6(%arg0: i32) -> (i32, i32) {
    %c0_i32 = arith.constant 0 : i32
    %c0_i32_0 = arith.constant 0 : i32
    %c0_i32_1 = arith.constant 0 : i32
    return %c0_i32, %c0_i32_0 : i32, i32
  }
  func.func @transform_7(%arg0: i32) -> (i32, i32) {
    %c0_i32 = arith.constant 0 : i32
    %c0_i32_0 = arith.constant 0 : i32
    return %arg0, %c0_i32 : i32, i32
  }
  func.func @transform_8(%arg0: i32) -> (i32, i32) {
    %c0_i32 = arith.constant 0 : i32
    %c0_i32_0 = arith.constant 0 : i32
    return %arg0, %c0_i32 : i32, i32
  }
  func.func @transform_9(%arg0: i32) -> (i32, i32, i32) {
    %c0_i32 = arith.constant 0 : i32
    %c0_i32_0 = arith.constant 0 : i32
    %c0_i32_1 = arith.constant 0 : i32
    return %arg0, %c0_i32, %c0_i32_0 : i32, i32, i32
  }
  func.func @transform_10(%arg0: i32) -> (i32, i32) {
    %c0_i32 = arith.constant 0 : i32
    %c0_i32_0 = arith.constant 0 : i32
    return %arg0, %c0_i32 : i32, i32
  }
}

</mosaic_0001>

<bundles_post_ra>
// kernel: tpu_custom_call.1
= control target key start
LH: loop header
LB: loop body
LE: loop exit
PB: predicated region body
PF: predicated region fallthrough
CT: control target
= control target key end

     0   :  { %s7146_s0 = inlined_call_operand.hbm [shape: f32[24,128], index: 0, kind: input, shape index: {}]   ;;  %s7147_s1 = inlined_call_operand.hbm [shape: f32[256,128], index: 1, kind: input, shape index: {}]   ;;  %s7148_s2 = inlined_call_operand.hbm [shape: f32[128,256], index: 2, kind: input, shape index: {}]   ;;  %s7149_s3 = inlined_call_operand.vmem [shape: f32[1,256], index: 3, kind: input, shape index: {}]   ;;  %s7150_s4 = inlined_call_operand.hbm [shape: bf16[128,2048], index: 4, kind: input, shape index: {}]   ;;  %s7151_s5 = inlined_call_operand.hbm [shape: bf16[2048,128], index: 5, kind: input, shape index: {}]   ;;  %s7152_s6 = inlined_call_operand.hbm [shape: f32[1,2048], index: 6, kind: input, shape index: {}]   ;;  %s7153_s7 = inlined_call_operand.hbm [shape: f32[24,256], index: 7, kind: output, shape index: {0}]   ;;  %s7154_s8 = inlined_call_operand.hbm [shape: f32[24,128], index: 8, kind: output, shape index: {1}]   ;;  %s7155_s9 = inlined_call_operand.hbm [shape: bf16[24,16,128], index: 9, kind: output, shape index: {2}]   ;;  %s7156_s10 = inlined_call_operand.hbm [shape: f32[24,128], index: 10, kind: output, shape index: {3}]  }
   0x1   :  { %7176 = sst [smem:[#allocation39_spill]] %s7146_s0 }
   0x2   :  { %7177 = sst [smem:[#allocation40_spill]] %s7147_s1 }
   0x3   :  { %7178 = sst [smem:[#allocation41_spill]] %s7148_s2 }
   0x4   :  { %7179 = sst [smem:[#allocation42_spill]] %s7149_s3 }
   0x5   :  { %7180 = sst [smem:[#allocation43_spill]] %s7150_s4 }
   0x6   :  { %7181 = sst [smem:[#allocation44_spill]] %s7151_s5 }
   0x7   :  { %7182 = sst [smem:[#allocation45_spill]] %s7152_s6 }
   0x8   :  { %7183 = sst [smem:[#allocation46_spill]] %s7155_s9 }
   0x9   :  { %16 = vsyncpa [#allocation3], 0 }
   0xa   :  { %18 = vsyncpa [#allocation3 + $0x1], 0 }
   0xb   :  { %19 = vsyncpa [#allocation6], 0 }
   0xc   :  { %20 = vsyncpa [#allocation9], 0 }
   0xd   :  { %21 = vsyncpa [#allocation12], 0 }
   0xe   :  { %22 = vsyncpa [#allocation4], 0 }
   0xf   :  { %24 = vsyncpa [#allocation4 + $0x1], 0 }
  0x10   :  { %25 = vsyncpa [#allocation15], 0 }
  0x11   :  { %27 = vsyncpa [#allocation15 + $0x1], 0 }
  0x12   :  { %28 = vsyncpa [#allocation18], 0 }
  0x13   :  { %30 = vsyncpa [#allocation18 + $0x1], 0  ;;  %s6185_s13 = smov 0   ;;  %s6187_s14 = smov 0  }
  0x14   :  { %s6189_s15 = smov 0   ;;  %s6191_s16 = smov 0  }
  0x15 LB: > { %s7184_s1 = sld [smem:[#allocation40_spill]]  ;;  %s6209_s20 = sadd.s32 4294967295, %s6110_s16   ;;  %s6110_s16 = sphi %s6191_s16, %s7230_s16   ;;  %s6106_s15 = sphi %s6189_s15, %s7229_s15   ;;  %s6102_s14 = sphi %s6187_s14, %s7228_s14   ;;  %s6098_s13 = sphi %s6185_s13, %s7227_s13  }
  0x16   : > { %p4185_p0 = scmp.ge.s32.totalorder %s6110_s16, 1  ;;  %p57_p1 = scmp.eq.s32.totalorder %s6209_s20, 0 }
  0x17   : > { %p297_p2 = scmp.lt.s32.totalorder %s6110_s16, 4  ;;  %s6112_s22 = smov [#allocation5]  }
  0x18   : > { %s310_s23 = sshll.u32 %s6112_s22, 4  ;;  %s7186_s4 = sld [smem:[#allocation43_spill]]  ;;  %s311_s23 = int_to_ptr.vmem [resolvable:$true] %s310_s23 }
  0x19   : > { %p6214_p3 = pnand %p4185_p0, %p297_p2  ;;  %s6113_s28 = smov [#allocation8]  }
  0x1a   : > { %s341_s29 = sshll.u32 %s6113_s28, 4  ;;  %s6114_s30 = smov 128   ;;  %s342_s29 = int_to_ptr.vmem [resolvable:$true] %s341_s29 }
  0x1b   : > { %s308_s19 = sshll.u32 %s7184_s1, 4  ;;  %p5598_p4 = pneg %p6214_p3  ;;  %s309_s19 = int_to_ptr.hbm [resolvable:$true] %s308_s19 }
  0x1c   : > { %s6115_s11 = smov 8   ;;  %s6116_s12 = smov 1024  }
  0x1d   : > { %p6225_p5 = pnand %p5598_p4, %p57_p1  ;;  %s6117_s17 = smov 64  }
  0x1e   : > { %s339_s26 = sshll.u32 %s7186_s4, 4  ;;  %s7188_s2 = sld [smem:[#allocation41_spill]]  ;;  %s340_s26 = int_to_ptr.hbm [resolvable:$true] %s339_s26 }
  0x1f   : > { %5601 = dma.hbm_to_vmem [thread:$0]  (!%p6225_p5), %s309_s19, 4096, %s311_s23, [#allocation6], %s6114_s30, %s6114_s30, %s6115_s11  }
  0x20   : > { %5607 = dma.hbm_to_vmem [thread:$0]  (!%p6225_p5), %s340_s26, 16384, %s342_s29, [#allocation9], %s6116_s12, %s6116_s12, %s6117_s17  }
  0x21   : > { %s6118_s25 = smov [#allocation7]   ;;  %s7189_s5 = sld [smem:[#allocation44_spill]] }
  0x22   : > { %s324_s1 = sshll.u32 %s6118_s25, 4  ;;  %s6119_s19 = smov 256   ;;  %s325_s1 = int_to_ptr.vmem [resolvable:$true] %s324_s1 }
  0x23   : > { %s6120_s23 = smov 16   ;;  %s6121_s26 = smov [#allocation10]  }
  0x24   : > { %s322_s24 = sshll.u32 %s7188_s2, 4  ;;  %s355_s29 = sshll.u32 %s6121_s26, 4  ;;  %s323_s24 = int_to_ptr.hbm [resolvable:$true] %s322_s24  ;;  %s356_s29 = int_to_ptr.vmem [resolvable:$true] %s355_s29 }
  0x25   : > { %5604 = dma.hbm_to_vmem [thread:$0]  (!%p6225_p5), %s323_s24, 4096, %s325_s1, [#allocation6], %s6119_s19, %s6119_s19, %s6120_s23  }
  0x26   : > { %s7190_s6 = sld [smem:[#allocation45_spill]]  ;;  %s6122_s12 = smov 4  }
  0x27   : > { %s353_s9 = sshll.u32 %s7189_s5, 4  ;;  %s6123_s1 = smov [#allocation11]   ;;  %s354_s9 = int_to_ptr.hbm [resolvable:$true] %s353_s9 }
  0x28   : > { %5610 = dma.hbm_to_vmem [thread:$0]  (!%p6225_p5), %s354_s9, 16384, %s356_s29, [#allocation9], %s6117_s17, %s6117_s17, %s6122_s12  }
  0x29   : > { %s370_s18 = sshll.u32 %s6123_s1, 4  ;;  %s7158_s22 = sadd.s32 4294967294, %s6110_s16   ;;  %s371_s18 = int_to_ptr.vmem [resolvable:$true] %s370_s18 }
  0x2a   : > { %s6250_s24 = sadd.s32 1, %s6110_s16   ;;  %s43_s28 = sadd.s32 1, %s6106_s15 }
  0x2b   : > { %s40_s25 = ssub.s32 %s6110_s16, %s6250_s24  ;;  %p50_p7 = scmp.ne.s32.totalorder %s6106_s15, %s6102_s14 }
  0x2c   : > { %s368_s4 = sshll.u32 %s7190_s6, 4  ;;  %p41_p6 = scmp.eq.s32.totalorder %s40_s25, 0  ;;  %s369_s4 = int_to_ptr.hbm [resolvable:$true] %s368_s4 }
  0x2d   : > { %5613 = dma.hbm_to_vmem [thread:$0]  (!%p6225_p5), %s369_s4, 256, %s371_s18, [#allocation12]  }
  0x2e   : > { %p51_p8 = scmp.eq.s32.totalorder %s6110_s16, 0  ;;  %p56_p9 = scmp.ne.s32.totalorder %s6102_s14, %s6098_s13 }
  0x2f   : > { %s6261_s9 = scalar_select %p41_p6, %s6106_s15, %s43_s28  }
  0x30   : > { %p6263_p10 = por %p51_p8, %p50_p7  ;;  %p6269_p11 = por %p57_p1, %p56_p9 }
  0x31   : > { %p206_p12 = scmp.eq.s32.totalorder %s6209_s20, 2  ;;  %p212_p13 = scmp.eq.s32.totalorder %s7158_s22, 2 }
  0x32   : > { %p5636_p0 = scmp.lt.s32.totalorder %s6110_s16, 3  ;;  %s381_s19 = sand.u32 1, %s6106_s15  }
  0x33   : > { %p6278_p2 = por %p206_p12, %p50_p7  ;;  %p6282_p4 = por %p212_p13, %p56_p9 }
  0x34   : > { %s4192_s29 = sshll.u32 %s381_s19, 3  ;;  %s4193_s30 = sshll.u32 %s6110_s16, 3 }
  0x35   : > { %s7195_s0 = sld [smem:[#allocation39_spill]]  ;;  %s385_s1 = scalar_lea.vmem [#allocation2], %s4192_s29 }
  0x36   : > { %s393_s18 = sshll.u32 %s385_s1, 4  ;;  %p6292_p5 = pnand %p5636_p0, %p6263_p10  ;;  %s394_s18 = int_to_ptr.vmem [resolvable:$true] %s393_s18 }
  0x37   : > { %s382_s22 = scalar_lea.sflag [#allocation3], %s381_s19 }
  0x38   : > { %p5914_p7 = pneg %p6292_p5 }
  0x3b   : > { %s389_s12 = scalar_lea.hbm %s7195_s0, %s4193_s30  ;;  %s5917_s11 = scalar_lea.hbm %s7195_s0, 24 }
  0x3c   : > { %s391_s25 = sshll.u32 %s389_s12, 4  ;;  %s392_s25 = int_to_ptr.hbm [resolvable:$true] %s391_s25 }
  0x3d   : > { %s5910_s2 = sshra.s32 %s392_s25, 4  ;;  %s5911_s2 = int_to_ptr.hbm [resolvable:$true] %s5910_s2 }
  0x3e   : > { %s5912_s5 = scalar_lea.hbm %s5911_s2, 8  ;;  %p5918_p10 = scmp.lt.s32.totalorder %s5911_s2, %s7195_s0 }
  0x3f   : > { %p5913_p6 = scmp.ne.s32.totalorder %s5911_s2, %s5912_s5  ;;  %p5919_p12 = scmp.lt.s32.totalorder %s5917_s11, %s5912_s5 }
  0x41   : > { %p5915_p8 = pnand %p5914_p7, %p5913_p6  ;;  %p5920_p13 = por %p5919_p12, %p5918_p10 }
  0x43   : > { %p5916_p9 = pneg %p5915_p8 }
  0x45   : > { %p5921_p0 = pnand %p5920_p13, %p5916_p9 }
  0x47   : > { %5924 = shalt.err (!%p5921_p0)
}
  0x48   : > { %5617 = dma.hbm_to_vmem [thread:$0]  (!%p6292_p5), %s392_s25, 128, %s394_s18, %s382_s22  }
  0x49   : > { %402 = sbr.rel (%p6214_p3) target bundleno = 1678 (0x68e), region = 48 }
  0x4e   : > { %s6309_s19 = sand.u32 1, %s6102_s14  }
  0x4f   : > { %s6312_s12 = sshll.u32 %s6309_s19, 3  ;;  %s405_s2 = scalar_lea.sflag [#allocation3], %s6309_s19 }
  0x50   : > { %s408_s5 = scalar_lea.vmem [#allocation2], %s6312_s12 }
  0x51   : > { %6069 = dma.done.wait (%p6269_p11), %s405_s2, 128  }
  0x52   : > { %6071 = vsyncadd (%p6269_p11), %s405_s2, 4294967168 }
  0x53   : > { %6073 = dma.done.wait (%p57_p1), [#allocation6], 8192  }
  0x54   : > { %6075 = vsyncadd (%p57_p1), [#allocation6], 4294959104 }
  0x55   : > { %6077 = dma.done.wait (%p57_p1), [#allocation9], 32768  }
  0x56   : > { %6079 = vsyncadd (%p57_p1), [#allocation9], 4294934528 }
  0x57   : > { %6081 = dma.done.wait (%p57_p1), [#allocation12], 256  }
  0x58   : > { %6083 = vsyncadd (%p57_p1), [#allocation12], 4294967040  ;;  %v519_v0 = vld [vmem:[#allocation7 + $0xf0] sm:$0xff]  ;;  %v520_v1 = vld [vmem:[#allocation7 + $0xf8] sm:$0xff]  ;;  %s7197_s3 = sld [smem:[#allocation42_spill]]  ;;  %s4201_s27 = sshll.u32 %s6309_s19, 4  ;;  %v581_v47 = vlaneseq }
  0x59   : > { %v517_v2 = vld [vmem:[#allocation7 + $0xe0] sm:$0xff]  ;;  %521 = vmatpush.msra.mxu0 %v519_v0  ;;  %541 = vmatpush.msra.mxu1 %v520_v1  ;;  %v518_v3 = vld [vmem:[#allocation7 + $0xe8] sm:$0xff]  ;;  %v515_v4 = vld [vmem:[#allocation7 + $0xd0] sm:$0xff]  ;;  %s6344_s1 = scalar_lea.vmem [#allocation13], %s4201_s27  ;;  %s6362_s18 = scalar_lea.vmem [#allocation14], %s6312_s12  ;;  %vm1746_vm6 = vcmask 1047556  }
  0x5a   : > { %v516_v5 = vld [vmem:[#allocation7 + $0xd8] sm:$0xff]  ;;  %v513_v6 = vld [vmem:[#allocation7 + $0xc0] sm:$0xff]  ;;  %v514_v7 = vld [vmem:[#allocation7 + $0xc8] sm:$0xff]  ;;  %v6348_v48 = vand.u32 127, %v581_v47  ;;  %s4203_s25 = sshll.u32 %s6309_s19, 6  ;;  %s3897_s29 = sand.u32 1, %s6209_s20  }
  0x5b   : > { %522 = vmatpush.msra.mxu0 %v517_v2  ;;  %542 = vmatpush.msra.mxu1 %v518_v3  ;;  %v511_v8 = vld [vmem:[#allocation7 + $0xb0] sm:$0xff]  ;;  %v512_v9 = vld [vmem:[#allocation7 + $0xb8] sm:$0xff]  ;;  %v509_v10 = vld [vmem:[#allocation7 + $0xa0] sm:$0xff]  ;;  %s6991_s28 = scalar_lea.vmem [#allocation16], %s4203_s25  ;;  %s7175_s30 = sshll.u32 %s6209_s20, 3 }
  0x5c   : > { %v510_v11 = vld [vmem:[#allocation7 + $0xa8] sm:$0xff]  ;;  %v507_v12 = vld [vmem:[#allocation7 + $0x90] sm:$0xff]  ;;  %v508_v13 = vld [vmem:[#allocation7 + $0x98] sm:$0xff]  ;;  %7198 = vst [vmem:[#allocation26_spill] sm:$0xff] %v6348_v48  ;;  %v6351_v49 = vadd.s32 128, %v6348_v48  ;;  %s3933_s17 = scalar_lea.hbm %s7154_s8, %s7175_s30  ;;  %s3935_s2 = sshll.u32 %s6362_s18, 4  ;;  %s3936_s2 = int_to_ptr.vmem [resolvable:$true] %s3935_s2 }
  0x5d   : > { %523 = vmatpush.msra.mxu0 %v515_v4  ;;  %543 = vmatpush.msra.mxu1 %v516_v5  ;;  %v6334_v14 = vld [vmem:[%s408_s5] sm:$0xff]  ;;  %v505_v16 = vld [vmem:[#allocation7 + $0x80] sm:$0xff]  ;;  %v506_v17 = vld [vmem:[#allocation7 + $0x88] sm:$0xff]  ;;  %s3937_s5 = sshll.u32 %s3933_s17, 4  ;;  %s7054_s21 = scalar_lea.sflag [#allocation15], %s3897_s29  ;;  %s3938_s5 = int_to_ptr.hbm [resolvable:$true] %s3937_s5 }
  0x5e   : > { %v561_v15 = vmul.f32 %v6334_v14, %v6334_v14  ;;  %v503_v18 = vld [vmem:[#allocation7 + $0x70] sm:$0xff]  ;;  %v504_v19 = vld [vmem:[#allocation7 + $0x78] sm:$0xff]  ;;  %v501_v20 = vld [vmem:[#allocation7 + $0x60] sm:$0xff]  ;;  %s5954_s22 = sshra.s32 %s3938_s5, 4  ;;  %s5955_s22 = int_to_ptr.hbm [resolvable:$true] %s5954_s22 }
  0x5f   : > { %524 = vmatpush.msra.mxu0 %v513_v6  ;;  %544 = vmatpush.msra.mxu1 %v514_v7  ;;  %v502_v21 = vld [vmem:[#allocation7 + $0x68] sm:$0xff]  ;;  %v499_v22 = vld [vmem:[#allocation7 + $0x50] sm:$0xff]  ;;  %v500_v23 = vld [vmem:[#allocation7 + $0x58] sm:$0xff]  ;;  %s5956_s27 = scalar_lea.hbm %s5955_s22, 8  ;;  %p5961_p5 = scmp.lt.s32.totalorder %s5955_s22, %s7154_s8 }
  0x60   : > { %562 = vadd.xlane.f32.xlu0 %v561_v15  ;;  %v497_v24 = vld [vmem:[#allocation7 + $0x40] sm:$0xff]  ;;  %v498_v25 = vld [vmem:[#allocation7 + $0x48] sm:$0xff]  ;;  %v495_v26 = vld [vmem:[#allocation7 + $0x30] sm:$0xff]  ;;  %p5957_p1 = scmp.ne.s32.totalorder %s5955_s22, %s5956_s27 }
  0x61   : > { %525 = vmatpush.msra.mxu0 %v511_v8  ;;  %545 = vmatpush.msra.mxu1 %v512_v9  ;;  %v496_v27 = vld [vmem:[#allocation7 + $0x38] sm:$0xff]  ;;  %v493_v28 = vld [vmem:[#allocation7 + $0x20] sm:$0xff]  ;;  %v494_v29 = vld [vmem:[#allocation7 + $0x28] sm:$0xff] }
  0x62   : > { %v491_v30 = vld [vmem:[#allocation7 + $0x10] sm:$0xff]  ;;  %v492_v31 = vld [vmem:[#allocation7 + $0x18] sm:$0xff]  ;;  %v489_v32 = vld [vmem:[#allocation7] sm:$0xff]  ;;  %p5958_p3 = pnand %p5957_p1, %p6278_p2 }
  0x63   : > { %526 = vmatpush.msra.mxu0 %v509_v10  ;;  %546 = vmatpush.msra.mxu1 %v510_v11  ;;  %v490_v33 = vld [vmem:[#allocation7 + $0x8] sm:$0xff]  ;;  %v568_v34 = vld [vmem:[%s7197_s3] sm:$0x3]  ;;  %v625_v56 = vld [vmem:[#allocation5 + $0x78] sm:$0xff]  ;;  %s5960_s3 = scalar_lea.hbm %s7154_s8, 24 }
  0x64   : > { %v570_v40 = vperm.slane %v568_v34, 0  ;;  %v571_v41 = vperm.slane %v568_v34, 1  ;;  %v641_v57 = vld [vmem:[#allocation5 + $0xf8] sm:$0xff]  ;;  %v624_v58 = vld [vmem:[#allocation5 + $0x70] sm:$0xff]  ;;  %642 = vmatpush.msra.mxu2 %v625_v56  ;;  %v623_v60 = vld [vmem:[#allocation5 + $0x68] sm:$0xff]  ;;  %p5959_p11 = pneg %p5958_p3  ;;  %p5962_p6 = scmp.lt.s32.totalorder %s5960_s3, %s5956_s27 }
  0x65   : > { %527 = vmatpush.msra.mxu0 %v507_v12  ;;  %547 = vmatpush.msra.mxu1 %v508_v13  ;;  %v640_v59 = vld [vmem:[#allocation5 + $0xf0] sm:$0xff]  ;;  %v639_v61 = vld [vmem:[#allocation5 + $0xe8] sm:$0xff]  ;;  %v622_v62 = vld [vmem:[#allocation5 + $0x60] sm:$0xff] }
  0x66   : > { %662 = vmatpush.msra.mxu3 %v641_v57  ;;  %643 = vmatpush.msra.mxu2 %v624_v58  ;;  %v638_v63 = vld [vmem:[#allocation5 + $0xe0] sm:$0xff]  ;;  %v621_v0 = vld [vmem:[#allocation5 + $0x58] sm:$0xff]  ;;  %v620_v2 = vld [vmem:[#allocation5 + $0x50] sm:$0xff]  ;;  %p5963_p7 = por %p5962_p6, %p5961_p5 }
  0x67   : > { %528 = vmatpush.msra.mxu0 %v505_v16  ;;  %548 = vmatpush.msra.mxu1 %v506_v17  ;;  %v637_v1 = vld [vmem:[#allocation5 + $0xd8] sm:$0xff]  ;;  %v636_v3 = vld [vmem:[#allocation5 + $0xd0] sm:$0xff]  ;;  %v619_v4 = vld [vmem:[#allocation5 + $0x48] sm:$0xff] }
  0x68   : > { %663 = vmatpush.msra.mxu3 %v640_v59  ;;  %644 = vmatpush.msra.mxu2 %v623_v60  ;;  %v635_v5 = vld [vmem:[#allocation5 + $0xc8] sm:$0xff]  ;;  %v618_v6 = vld [vmem:[#allocation5 + $0x40] sm:$0xff]  ;;  %v617_v8 = vld [vmem:[#allocation5 + $0x38] sm:$0xff]  ;;  %p5964_p8 = pnand %p5963_p7, %p5959_p11 }
  0x69   : > { %529 = vmatpush.msra.mxu0 %v503_v18  ;;  %549 = vmatpush.msra.mxu1 %v504_v19  ;;  %v634_v7 = vld [vmem:[#allocation5 + $0xc0] sm:$0xff]  ;;  %v633_v9 = vld [vmem:[#allocation5 + $0xb8] sm:$0xff]  ;;  %v616_v10 = vld [vmem:[#allocation5 + $0x30] sm:$0xff] }
  0x6a   : > { %664 = vmatpush.msra.mxu3 %v639_v61  ;;  %645 = vmatpush.msra.mxu2 %v622_v62  ;;  %v632_v11 = vld [vmem:[#allocation5 + $0xb0] sm:$0xff]  ;;  %v615_v12 = vld [vmem:[#allocation5 + $0x28] sm:$0xff]  ;;  %v614_v15 = vld [vmem:[#allocation5 + $0x20] sm:$0xff] }
  0x6b   : > { %530 = vmatpush.msra.mxu0 %v501_v20  ;;  %550 = vmatpush.msra.mxu1 %v502_v21  ;;  %v631_v13 = vld [vmem:[#allocation5 + $0xa8] sm:$0xff]  ;;  %v630_v16 = vld [vmem:[#allocation5 + $0xa0] sm:$0xff]  ;;  %v613_v17 = vld [vmem:[#allocation5 + $0x18] sm:$0xff] }
  0x6c   : > { %665 = vmatpush.msra.mxu3 %v638_v63  ;;  %646 = vmatpush.msra.mxu2 %v621_v0  ;;  %v629_v18 = vld [vmem:[#allocation5 + $0x98] sm:$0xff]  ;;  %v4667_v34 = vld [vmem:[#allocation8 + $0x388] sm:$0xf]  ;;  %v5342_v57 = vld [vmem:[#allocation8 + $0x284] sm:$0xf] }
  0x6d   : > { %531 = vmatpush.msra.mxu0 %v499_v22  ;;  %551 = vmatpush.msra.mxu1 %v500_v23  ;;  %v612_v23 = vld [vmem:[#allocation5 + $0x10] sm:$0xff]  ;;  %v4603_v47 = vld [vmem:[#allocation8 + $0x308] sm:$0xf]  ;;  %v4533_v58 = vld [vmem:[#allocation8 + $0x2c0] sm:$0xf0] }
  0x6e   : > { %666 = vmatpush.msra.mxu3 %v637_v1  ;;  %647 = vmatpush.msra.mxu2 %v620_v2  ;;  %v4539_v59 = vld [vmem:[#allocation8 + $0x288] sm:$0xf]  ;;  %v5343_v62 = vld [vmem:[#allocation8 + $0x28c] sm:$0xf]  ;;  %v4536_v0 = vor.u32 %v5342_v57, %v4533_v58  ;;  %v4467_v2 = vld [vmem:[#allocation8 + $0x200] sm:$0xf] }
  0x6f   : > { %532 = vmatpush.msra.mxu0 %v497_v24  ;;  %552 = vmatpush.msra.mxu1 %v498_v25  ;;  %v628_v24 = vld [vmem:[#allocation5 + $0x90] sm:$0xff]  ;;  %v611_v25 = vld [vmem:[#allocation5 + $0x8] sm:$0xff]  ;;  %v5262_v58 = vld [vmem:[#allocation8 + $0x4] sm:$0xf] }
  0x70   : > { %667 = vmatpush.msra.mxu3 %v636_v3  ;;  %648 = vmatpush.msra.mxu2 %v619_v4  ;;  %v5351_v61 = vld [vmem:[#allocation8 + $0x2c4] sm:$0xf0]  ;;  %v4541_v63 = vld [vmem:[#allocation8 + $0x2c8] sm:$0xf0]  ;;  %v5334_v3 = vld [vmem:[#allocation8 + $0x23c] sm:$0xf0] }
  0x71   : > { %533 = vmatpush.msra.mxu0 %v495_v26  ;;  %553 = vmatpush.msra.mxu1 %v496_v27  ;;  %v627_v26 = vld [vmem:[#allocation5 + $0x88] sm:$0xff]  ;;  %v610_v27 = vld [vmem:[#allocation5] sm:$0xff]  ;;  %v4540_v1 = vor.u32 %v5351_v61, %v4539_v59 }
  0x72   : > { %668 = vmatpush.msra.mxu3 %v635_v5  ;;  %649 = vmatpush.msra.mxu2 %v618_v6  ;;  %v5326_v4 = vld [vmem:[#allocation8 + $0x204] sm:$0xf]  ;;  %v4544_v5 = vor.u32 %v5343_v62, %v4541_v63  ;;  %v5271_v62 = vld [vmem:[#allocation8 + $0x44] sm:$0xf0]  ;;  %v5263_v63 = vld [vmem:[#allocation8 + $0xc] sm:$0xf] }
  0x73   : > { %534 = vmatpush.msra.mxu0 %v493_v28  ;;  %554 = vmatpush.msra.mxu1 %v494_v29  ;;  %v626_v28 = vld [vmem:[#allocation5 + $0x80] sm:$0xff] }
  0x74   : > { %669 = vmatpush.msra.mxu3 %v634_v7  ;;  %650 = vmatpush.msra.mxu2 %v617_v8  ;;  %v4659_v29 = vld [vmem:[#allocation8 + $0x380] sm:$0xf]  ;;  %v4469_v6 = vld [vmem:[#allocation8 + $0x240] sm:$0xf0]  ;;  %v4475_v7 = vld [vmem:[#allocation8 + $0x208] sm:$0xf] }
  0x75   : > { %535 = vmatpush.msra.mxu0 %v491_v30  ;;  %555 = vmatpush.msra.mxu1 %v492_v31  ;;  %v5382_v30 = vld [vmem:[#allocation8 + $0x3bc] sm:$0xf0]  ;;  %v5374_v31 = vld [vmem:[#allocation8 + $0x384] sm:$0xf]  ;;  %v5335_v8 = vld [vmem:[#allocation8 + $0x244] sm:$0xf0] }
  0x76   : > { %670 = vmatpush.msra.mxu3 %v633_v9  ;;  %651 = vmatpush.msra.mxu2 %v616_v10  ;;  %v5327_v9 = vld [vmem:[#allocation8 + $0x20c] sm:$0xf]  ;;  %v4213_v59 = vld [vmem:[#allocation8 + $0x40] sm:$0xf0] }
  0x77   : > { %536 = vmatpush.msra.mxu0 %v489_v32  ;;  %556 = vmatpush.msra.mxu1 %v490_v33  ;;  %v4660_v32 = vor.u32 %v5382_v30, %v4659_v29  ;;  %v4661_v33 = vld [vmem:[#allocation8 + $0x3c0] sm:$0xf0]  ;;  %v4477_v10 = vld [vmem:[#allocation8 + $0x248] sm:$0xf0]  ;;  %v5302_v29 = vld [vmem:[#allocation8 + $0x13c] sm:$0xf0] }
  0x78   : > { %537 = vmatmul.f32.vlgmr.msra.gmra.mxu0 %v6334_v14  ;;  %557 = vmatmul.f32.vlgmr.msra.gmra.mxu1 %v6334_v14  ;;  %v5294_v30 = vld [vmem:[#allocation8 + $0x104] sm:$0xf] }
  0x79   : > { %671 = vmatpush.msra.mxu3 %v632_v11  ;;  %652 = vmatpush.msra.mxu2 %v615_v12  ;;  %v4468_v11 = vor.u32 %v5334_v3, %v4467_v2  ;;  %v4472_v12 = vor.u32 %v5326_v4, %v4469_v6  ;;  %v4675_v3 = vld [vmem:[#allocation8 + $0x390] sm:$0xf]  ;;  %v4677_v6 = vld [vmem:[#allocation8 + $0x3d0] sm:$0xf0] }
  0x7a   : > { %1453 = vmatpush.bf16.msrb.mxu0 %v4660_v32  ;;  %v4341_v32 = vld [vmem:[#allocation8 + $0x140] sm:$0xf0]  ;;  %v5384_v4 = vld [vmem:[#allocation8 + $0x3cc] sm:$0xf0] }
  0x7b   : > { %672 = vmatpush.msra.mxu3 %v631_v13  ;;  %653 = vmatpush.msra.mxu2 %v614_v15  ;;  %v4476_v13 = vor.u32 %v5335_v8, %v4475_v7  ;;  %v4403_v15 = vld [vmem:[#allocation8 + $0x180] sm:$0xf]  ;;  %v4683_v7 = vld [vmem:[#allocation8 + $0x398] sm:$0xf] }
  0x7c   : > { %v5385_v8 = vld [vmem:[#allocation8 + $0x3d4] sm:$0xf0] }
  0x7d   : > { %673 = vmatpush.msra.mxu3 %v630_v16  ;;  %654 = vmatpush.msra.mxu2 %v613_v17  ;;  %v5318_v16 = vld [vmem:[#allocation8 + $0x1bc] sm:$0xf0]  ;;  %v5310_v17 = vld [vmem:[#allocation8 + $0x184] sm:$0xf] }
  0x7f   : > { %674 = vmatpush.msra.mxu3 %v629_v18  ;;  %655 = vmatpush.msra.mxu2 %v612_v23  ;;  %v4480_v18 = vor.u32 %v5327_v9, %v4477_v10  ;;  %v5311_v23 = vld [vmem:[#allocation8 + $0x18c] sm:$0xf]  ;;  %v4216_v10 = vor.u32 %v5262_v58, %v4213_v59  ;;  %v5320_v58 = vld [vmem:[#allocation8 + $0x1cc] sm:$0xf0]  ;;  %v5312_v59 = vld [vmem:[#allocation8 + $0x194] sm:$0xf] }
  0x81   : > { %675 = vmatpush.msra.mxu3 %v628_v24  ;;  %656 = vmatpush.msra.mxu2 %v611_v25  ;;  %v4413_v24 = vld [vmem:[#allocation8 + $0x1c8] sm:$0xf0]  ;;  %v4404_v25 = vor.u32 %v5318_v16, %v4403_v15  ;;  %v4676_v16 = vor.u32 %v5384_v4, %v4675_v3 }
  0x83   : > { %676 = vmatpush.msra.mxu3 %v627_v26  ;;  %657 = vmatpush.msra.mxu2 %v610_v27 }
  0x85   : > { %677 = vmatpush.msra.mxu3 %v626_v28  ;;  %v4339_v28 = vld [vmem:[#allocation8 + $0x100] sm:$0xf] }
  0xd3   : > { %v563_v35 = vpop.xlane.xlu0 %562 }
  0xf5   : > { %v538_v36 = vpop.f32.mrf.mxu0  ;;  %v558_v37 = vpop.f32.mrf.mxu1 }
  0xf6   : > { %v564_v38 = vmul.f32 2.0, %v538_v36  ;;  %v565_v39 = vmul.f32 2.0, %v558_v37  ;;  %v4664_v36 = vor.u32 %v5374_v31, %v4661_v33  ;;  %v4416_v31 = vor.u32 %v5311_v23, %v4413_v24  ;;  %v4347_v33 = vld [vmem:[#allocation8 + $0x108] sm:$0xf] }
  0xf7   : > { %v6124_v23 = vmov 1.0  }
  0xf8   : > { %v566_v42 = vsub.f32 %v564_v38, %v563_v35  ;;  %v567_v43 = vsub.f32 %v565_v39, %v563_v35  ;;  %v5383_v35 = vld [vmem:[#allocation8 + $0x3c4] sm:$0xf0]  ;;  %v5375_v38 = vld [vmem:[#allocation8 + $0x38c] sm:$0xf]  ;;  %1466 = vmatpush.bf16.msrb.mxu1 %v4664_v36 }
  0xf9   : > { %v4668_v37 = vor.u32 %v5383_v35, %v4667_v34  ;;  %v4669_v39 = vld [vmem:[#allocation8 + $0x3c8] sm:$0xf0]  ;;  %v5303_v34 = vld [vmem:[#allocation8 + $0x144] sm:$0xf0] }
  0xfa   : > { %v574_v44 = vsub.f32 %v566_v42, %v570_v40  ;;  %v575_v45 = vsub.f32 %v567_v43, %v571_v41  ;;  %v4595_v40 = vld [vmem:[#allocation8 + $0x300] sm:$0xf]  ;;  %v4672_v41 = vor.u32 %v5375_v38, %v4669_v39  ;;  %v5358_v43 = vld [vmem:[#allocation8 + $0x304] sm:$0xf]  ;;  %v5295_v35 = vld [vmem:[#allocation8 + $0x10c] sm:$0xf]  ;;  %v4344_v39 = vor.u32 %v5294_v30, %v4341_v32 }
  0xfb   : > { %v5366_v42 = vld [vmem:[#allocation8 + $0x33c] sm:$0xf0]  ;;  %1479 = vmatpush.bf16.msrb.mxu2 %v4668_v37  ;;  %v4349_v36 = vld [vmem:[#allocation8 + $0x148] sm:$0xf0]  ;;  %v4340_v37 = vor.u32 %v5302_v29, %v4339_v28  ;;  %v5361_v28 = vld [vmem:[#allocation8 + $0x31c] sm:$0xf] }
  0xfc   : > { %576 = vst [vmem:[%s6344_s1] sm:$0xff] %v574_v44  ;;  %v578_v46 = vmax.f32 %v574_v44, %v575_v45  ;;  %1492 = vmatpush.bf16.msrb.mxu3 %v4672_v41  ;;  %v4275_v41 = vld [vmem:[#allocation8 + $0x80] sm:$0xf]  ;;  %v4621_v29 = vld [vmem:[#allocation8 + $0x358] sm:$0xf0]  ;;  %v4547_v32 = vld [vmem:[#allocation8 + $0x290] sm:$0xf] }
  0xfd   : > { %577 = vst [vmem:[%s6344_s1 + $0x8] sm:$0xff] %v575_v45 }
  0xfe   : > { %579 = vmax.xlane.f32.xlu0 %v578_v46 }
 0x171   : > { %v580_v50 = vpop.xlane.xlu0 %579 }
 0x172   : > { %vm584_vm0 = vcmp.eq.f32.partialorder %v574_v44, %v580_v50  ;;  %vm585_vm1 = vcmp.eq.f32.partialorder %v575_v45, %v580_v50  ;;  %v4597_v44 = vld [vmem:[#allocation8 + $0x340] sm:$0xf0]  ;;  %v4596_v45 = vor.u32 %v5366_v42, %v4595_v40  ;;  %v5367_v50 = vld [vmem:[#allocation8 + $0x344] sm:$0xf0]  ;;  %v4348_v40 = vor.u32 %v5303_v34, %v4347_v33  ;;  %v5286_v42 = vld [vmem:[#allocation8 + $0xbc] sm:$0xf0] }
 0x173   : > { %v586_v51 = vsel %vm584_vm0, %v6348_v48, 256  ;;  %v587_v52 = vsel %vm585_vm1, %v6351_v49, 256  ;;  %v4600_v46 = vor.u32 %v5358_v43, %v4597_v44  ;;  %v5278_v43 = vld [vmem:[#allocation8 + $0x84] sm:$0xf]  ;;  %v4352_v44 = vor.u32 %v5295_v35, %v4349_v36  ;;  %v5352_v33 = vld [vmem:[#allocation8 + $0x2cc] sm:$0xf0] }
 0x174   : > { %vm588_vm2 = vcmp.lt.s32.totalorder %v586_v51, %v587_v52  ;;  %1454 = vmatpush.bf16.msrb.mxu0 %v4596_v45  ;;  %v4277_v45 = vld [vmem:[#allocation8 + $0xc0] sm:$0xf0]  ;;  %v5344_v34 = vld [vmem:[#allocation8 + $0x294] sm:$0xf]  ;;  %v4624_v35 = vor.u32 %v5361_v28, %v4621_v29  ;;  %v5281_v29 = vld [vmem:[#allocation8 + $0x9c] sm:$0xf] }
 0x175   : > { %v589_v53 = vsel %vm588_vm2, %v586_v51, %v587_v52  ;;  %v5359_v51 = vld [vmem:[#allocation8 + $0x30c] sm:$0xf]  ;;  %v4604_v52 = vor.u32 %v5367_v50, %v4603_v47  ;;  %1467 = vmatpush.bf16.msrb.mxu1 %v4600_v46  ;;  %v4283_v46 = vld [vmem:[#allocation8 + $0x88] sm:$0xf]  ;;  %v4549_v36 = vld [vmem:[#allocation8 + $0x2d0] sm:$0xf0] }
 0x176   : > { %v591_v54 = vshra.s32 %v589_v53, 16  ;;  %v590_v19 = vand.u32 65535, %v589_v53  ;;  %v4605_v53 = vld [vmem:[#allocation8 + $0x348] sm:$0xf0]  ;;  %v5287_v47 = vld [vmem:[#allocation8 + $0xc4] sm:$0xf0] }
 0x177   : > { %v4608_v56 = vor.u32 %v5359_v51, %v4605_v53  ;;  %1480 = vmatpush.bf16.msrb.mxu2 %v4604_v52  ;;  %v5279_v50 = vld [vmem:[#allocation8 + $0x8c] sm:$0xf]  ;;  %v4276_v52 = vor.u32 %v5286_v42, %v4275_v41  ;;  %v4548_v41 = vor.u32 %v5352_v33, %v4547_v32  ;;  %v4552_v42 = vor.u32 %v5344_v34, %v4549_v36  ;;  %v5272_v32 = vld [vmem:[#allocation8 + $0x4c] sm:$0xf0]  ;;  %v5264_v33 = vld [vmem:[#allocation8 + $0x14] sm:$0xf] }
 0x178   : > { %v593_v55 = vcvt.s32.f32 %v591_v54  ;;  %v592_v21 = vcvt.s32.f32 %v590_v19  ;;  %v4531_v54 = vld [vmem:[#allocation8 + $0x280] sm:$0xf]  ;;  %v4405_v19 = vld [vmem:[#allocation8 + $0x1c0] sm:$0xf0]  ;;  %v4285_v51 = vld [vmem:[#allocation8 + $0xc8] sm:$0xf0] }
 0x179   : > { %1493 = vmatpush.bf16.msrb.mxu3 %v4608_v56  ;;  %1468 = vmatpush.bf16.msrb.mxu1 %v4536_v0  ;;  %v4408_v26 = vor.u32 %v5310_v17, %v4405_v19  ;;  %v5270_v56 = vld [vmem:[#allocation8 + $0x3c] sm:$0xf0]  ;;  %v4288_v57 = vor.u32 %v5279_v50, %v4285_v51  ;;  %v4221_v0 = vld [vmem:[#allocation8 + $0x48] sm:$0xf0]  ;;  %v4611_v19 = vld [vmem:[#allocation8 + $0x310] sm:$0xf] }
 0x17a   : > { %594 = vmin.xlane.f32.xlu1 %v593_v55  ;;  %v4224_v15 = vor.u32 %v5263_v63, %v4221_v0  ;;  %v4485_v50 = vld [vmem:[#allocation8 + $0x250] sm:$0xf0]  ;;  %v4491_v51 = vld [vmem:[#allocation8 + $0x218] sm:$0xf]  ;;  %v5313_v0 = vld [vmem:[#allocation8 + $0x19c] sm:$0xf] }
 0x17b   : > { %1481 = vmatpush.bf16.msrb.mxu2 %v4540_v1  ;;  %v5321_v63 = vld [vmem:[#allocation8 + $0x1d4] sm:$0xf0] }
 0x17c   : > { %v4235_v36 = vld [vmem:[#allocation8 + $0x18] sm:$0xf] }
 0x17d   : > { %1494 = vmatpush.bf16.msrb.mxu3 %v4544_v5  ;;  %1469 = vmatpush.bf16.msrb.mxu1 %v4472_v12  ;;  %v5376_v5 = vld [vmem:[#allocation8 + $0x394] sm:$0xf]  ;;  %v5377_v12 = vld [vmem:[#allocation8 + $0x39c] sm:$0xf] }
 0x17e   : > { %v4680_v17 = vor.u32 %v5376_v5, %v4677_v6  ;;  %v4355_v5 = vld [vmem:[#allocation8 + $0x110] sm:$0xf] }
 0x17f   : > { %1482 = vmatpush.bf16.msrb.mxu2 %v4476_v13  ;;  %v4685_v13 = vld [vmem:[#allocation8 + $0x3d8] sm:$0xf0]  ;;  %v5304_v6 = vld [vmem:[#allocation8 + $0x14c] sm:$0xf0] }
 0x180   : > { %v4688_v24 = vor.u32 %v5377_v12, %v4685_v13  ;;  %v5297_v12 = vld [vmem:[#allocation8 + $0x11c] sm:$0xf] }
 0x181   : > { %1495 = vmatpush.bf16.msrb.mxu3 %v4480_v18  ;;  %1470 = vmatpush.bf16.msrb.mxu1 %v4408_v26  ;;  %v4684_v18 = vor.u32 %v5385_v8, %v4683_v7  ;;  %v4619_v26 = vld [vmem:[#allocation8 + $0x318] sm:$0xf]  ;;  %v5296_v7 = vld [vmem:[#allocation8 + $0x114] sm:$0xf]  ;;  %v4365_v13 = vld [vmem:[#allocation8 + $0x158] sm:$0xf0] }
 0x185   : > { %1496 = vmatpush.bf16.msrb.mxu3 %v4416_v31  ;;  %1471 = vmatpush.bf16.msrb.mxu1 %v4344_v39  ;;  %v5345_v39 = vld [vmem:[#allocation8 + $0x29c] sm:$0xf] }
 0x189   : > { %1497 = vmatpush.bf16.msrb.mxu3 %v4352_v44  ;;  %v4483_v44 = vld [vmem:[#allocation8 + $0x210] sm:$0xf] }
 0x18d   : > { %1498 = vmatpush.bf16.msrb.mxu3 %v4288_v57  ;;  %v4419_v57 = vld [vmem:[#allocation8 + $0x190] sm:$0xf] }
 0x191   : > { %1499 = vmatpush.bf16.msrb.mxu3 %v4224_v15  ;;  %v4356_v15 = vor.u32 %v5304_v6, %v4355_v5  ;;  %v4563_v6 = vld [vmem:[#allocation8 + $0x2a0] sm:$0xf] }
 0x1ed   : > { %v6355_v20 = vpop.xlane.xlu1 %594 }
 0x1ee   : > { %vm596_vm3 = vcmp.eq.f32.partialorder %v593_v55, %v6355_v20  ;;  %v5350_v55 = vld [vmem:[#allocation8 + $0x2bc] sm:$0xf0]  ;;  %v601_v38 = vcvt.f32.s32 %v6355_v20  ;;  %v4280_v20 = vor.u32 %v5278_v43, %v4277_v45  ;;  %v5336_v45 = vld [vmem:[#allocation8 + $0x24c] sm:$0xf0] }
 0x1ef   : > { %v597_v22 = vsel %vm596_vm3, %v592_v21, inf  ;;  %v4532_v60 = vor.u32 %v5350_v55, %v4531_v54  ;;  %v4411_v21 = vld [vmem:[#allocation8 + $0x188] sm:$0xf]  ;;  %v4284_v54 = vor.u32 %v5287_v47, %v4283_v46  ;;  %v4211_v55 = vld [vmem:[#allocation8] sm:$0xf] }
 0x1f0   : > { %598 = vmin.xlane.f32.xlu1 %v597_v22  ;;  %v5319_v22 = vld [vmem:[#allocation8 + $0x1c4] sm:$0xf0]  ;;  %v602_v53 = vshll.u32 %v601_v38, 16  ;;  %v4212_v2 = vor.u32 %v5270_v56, %v4211_v55  ;;  %1472 = vmatpush.bf16.msrb.mxu1 %v4280_v20  ;;  %v5353_v38 = vld [vmem:[#allocation8 + $0x2d4] sm:$0xf0] }
 0x1f1   : > { %1455 = vmatpush.bf16.msrb.mxu0 %v4532_v60  ;;  %v4412_v27 = vor.u32 %v5319_v22, %v4411_v21  ;;  %v4219_v60 = vld [vmem:[#allocation8 + $0x8] sm:$0xf]  ;;  %v5368_v21 = vld [vmem:[#allocation8 + $0x34c] sm:$0xf0]  ;;  %v5360_v22 = vld [vmem:[#allocation8 + $0x314] sm:$0xf] }
 0x1f2   : > { %v5328_v46 = vld [vmem:[#allocation8 + $0x214] sm:$0xf]  ;;  %v4493_v20 = vld [vmem:[#allocation8 + $0x258] sm:$0xf0] }
 0x1f3   : > { %1483 = vmatpush.bf16.msrb.mxu2 %v4412_v27  ;;  %v5369_v27 = vld [vmem:[#allocation8 + $0x354] sm:$0xf0]  ;;  %v4488_v55 = vor.u32 %v5328_v46, %v4485_v50  ;;  %v4691_v46 = vld [vmem:[#allocation8 + $0x3a0] sm:$0xf]  ;;  %v5378_v50 = vld [vmem:[#allocation8 + $0x3a4] sm:$0xf] }
 0x1f4   : > { %1473 = vmatpush.bf16.msrb.mxu1 %v4216_v10  ;;  %v4620_v31 = vor.u32 %v5369_v27, %v4619_v26  ;;  %v4363_v10 = vld [vmem:[#allocation8 + $0x118] sm:$0xf] }
 0x1f5   : > { %1456 = vmatpush.bf16.msrb.mxu0 %v4468_v11  ;;  %v4220_v11 = vor.u32 %v5271_v62, %v4219_v60  ;;  %v4427_v62 = vld [vmem:[#allocation8 + $0x198] sm:$0xf] }
 0x1f6   : > { %v4428_v4 = vor.u32 %v5321_v63, %v4427_v62  ;;  %v5289_v26 = vld [vmem:[#allocation8 + $0xd4] sm:$0xf0]  ;;  %v5362_v63 = vld [vmem:[#allocation8 + $0x324] sm:$0xf] }
 0x1f7   : > { %1484 = vmatpush.bf16.msrb.mxu2 %v4348_v40  ;;  %v4557_v40 = vld [vmem:[#allocation8 + $0x2d8] sm:$0xf0] }
 0x1f8   : > { %1518 = vmatpush.bf16.msra.mxu1 %v4680_v17  ;;  %v4560_v47 = vor.u32 %v5345_v39, %v4557_v40  ;;  %v5265_v40 = vld [vmem:[#allocation8 + $0x1c] sm:$0xf] }
 0x1f9   : > { %1457 = vmatpush.bf16.msrb.mxu0 %v4404_v25  ;;  %v4613_v25 = vld [vmem:[#allocation8 + $0x350] sm:$0xf0] }
 0x1fa   : > { %v4616_v30 = vor.u32 %v5360_v22, %v4613_v25  ;;  %v5280_v22 = vld [vmem:[#allocation8 + $0x94] sm:$0xf]  ;;  %v4299_v25 = vld [vmem:[#allocation8 + $0x98] sm:$0xf] }
 0x1fb   : > { %1485 = vmatpush.bf16.msrb.mxu2 %v4284_v54  ;;  %v4484_v54 = vor.u32 %v5336_v45, %v4483_v44  ;;  %v4300_v28 = vor.u32 %v5289_v26, %v4299_v25  ;;  %v4501_v25 = vld [vmem:[#allocation8 + $0x260] sm:$0xf0]  ;;  %v4507_v26 = vld [vmem:[#allocation8 + $0x228] sm:$0xf] }
 0x1fc   : > { %1519 = vmatpush.bf16.msra.mxu1 %v4616_v30 }
 0x1fd   : > { %1458 = vmatpush.bf16.msrb.mxu0 %v4340_v37  ;;  %v4555_v37 = vld [vmem:[#allocation8 + $0x298] sm:$0xf] }
 0x1fe   : > { %v4556_v43 = vor.u32 %v5353_v38, %v4555_v37  ;;  %v5273_v37 = vld [vmem:[#allocation8 + $0x54] sm:$0xf0] }
 0x1ff   : > { %1486 = vmatpush.bf16.msrb.mxu2 %v4220_v11  ;;  %v5305_v11 = vld [vmem:[#allocation8 + $0x154] sm:$0xf0]  ;;  %v4236_v39 = vor.u32 %v5273_v37, %v4235_v36  ;;  %v4437_v36 = vld [vmem:[#allocation8 + $0x1e0] sm:$0xf0]  ;;  %v4443_v37 = vld [vmem:[#allocation8 + $0x1a8] sm:$0xf] }
 0x200   : > { %1520 = vmatpush.bf16.msra.mxu1 %v4552_v42  ;;  %v4364_v17 = vor.u32 %v5305_v11, %v4363_v10  ;;  %v5346_v10 = vld [vmem:[#allocation8 + $0x2a4] sm:$0xf] }
 0x201   : > { %1459 = vmatpush.bf16.msrb.mxu0 %v4276_v52  ;;  %v5337_v52 = vld [vmem:[#allocation8 + $0x254] sm:$0xf0]  ;;  %v4565_v11 = vld [vmem:[#allocation8 + $0x2e0] sm:$0xf0] }
 0x202   : > { %v4492_v56 = vor.u32 %v5337_v52, %v4491_v51  ;;  %v4693_v51 = vld [vmem:[#allocation8 + $0x3e0] sm:$0xf0]  ;;  %v4699_v52 = vld [vmem:[#allocation8 + $0x3a8] sm:$0xf] }
 0x204   : > { %1521 = vmatpush.bf16.msra.mxu1 %v4488_v55  ;;  %v4701_v55 = vld [vmem:[#allocation8 + $0x3e8] sm:$0xf0] }
 0x205   : > { %1460 = vmatpush.bf16.msrb.mxu0 %v4212_v2  ;;  %v4420_v2 = vor.u32 %v5320_v58, %v4419_v57  ;;  %v4696_v58 = vor.u32 %v5378_v50, %v4693_v51  ;;  %v4373_v50 = vld [vmem:[#allocation8 + $0x160] sm:$0xf0]  ;;  %v4379_v51 = vld [vmem:[#allocation8 + $0x128] sm:$0xf] }
 0x209   : > { %1505 = vmatpush.bf16.msra.mxu0 %v4676_v16 }
 0x263   : > { %v599_v61 = vpop.xlane.xlu1 %598 }
 0x264   : > { %v600_v1 = vcvt.f32.s32 %v599_v61  ;;  %v4421_v61 = vld [vmem:[#allocation8 + $0x1d0] sm:$0xf0] }
 0x265   : > { %v4424_v3 = vor.u32 %v5312_v59, %v4421_v61  ;;  %v4627_v59 = vld [vmem:[#allocation8 + $0x320] sm:$0xf] }
 0x266   : > { %v603_v9 = vadd.s32 %v602_v53, %v600_v1  ;;  %v5329_v53 = vld [vmem:[#allocation8 + $0x21c] sm:$0xf] }
 0x267   : > { %v4496_v60 = vor.u32 %v5329_v53, %v4493_v20  ;;  %v4429_v1 = vld [vmem:[#allocation8 + $0x1d8] sm:$0xf0]  ;;  %1522 = vmatpush.bf16.msra.mxu1 %v4424_v3  ;;  %v5387_v20 = vld [vmem:[#allocation8 + $0x3e4] sm:$0xf0]  ;;  %v4637_v3 = vld [vmem:[#allocation8 + $0x368] sm:$0xf0] }
 0x268   : > { %vm604_vm4 = vcmp.eq.s32.totalorder %v6348_v48, %v603_v9  ;;  %vm605_vm5 = vcmp.eq.s32.totalorder %v6351_v49, %v603_v9  ;;  %v4612_v49 = vor.u32 %v5368_v21, %v4611_v19  ;;  %v4432_v8 = vor.u32 %v5313_v0, %v4429_v1  ;;  %v4357_v9 = vld [vmem:[#allocation8 + $0x150] sm:$0xf0]  ;;  %v4291_v19 = vld [vmem:[#allocation8 + $0x90] sm:$0xf]  ;;  %v4629_v0 = vld [vmem:[#allocation8 + $0x360] sm:$0xf0] }
 0x269   : > { %4207 = vmatmul.msk.f32.vlgmr.msra.gmra.mxu2 %vm604_vm4, %v6124_v23  ;;  %4208 = vmatmul.msk.f32.vlgmr.msra.gmra.mxu3 %vm605_vm5, %v6124_v23  ;;  %v4360_v16 = vor.u32 %v5296_v7, %v4357_v9  ;;  %v5288_v21 = vld [vmem:[#allocation8 + $0xcc] sm:$0xf0]  ;;  %v4700_v61 = vor.u32 %v5387_v20, %v4699_v52  ;;  %v4635_v1 = vld [vmem:[#allocation8 + $0x328] sm:$0xf]  ;;  %v4632_v5 = vor.u32 %v5362_v63, %v4629_v0  ;;  %v5354_v7 = vld [vmem:[#allocation8 + $0x2dc] sm:$0xf0] }
 0x26a   : > { %1531 = vmatpush.bf16.msra.mxu2 %v4684_v18  ;;  %1544 = vmatpush.bf16.msra.mxu3 %v4688_v24  ;;  %v4368_v18 = vor.u32 %v5297_v12, %v4365_v13  ;;  %v4292_v23 = vor.u32 %v5288_v21, %v4291_v19  ;;  %v4293_v24 = vld [vmem:[#allocation8 + $0xd0] sm:$0xf0]  ;;  %v4571_v12 = vld [vmem:[#allocation8 + $0x2a8] sm:$0xf]  ;;  %v4499_v19 = vld [vmem:[#allocation8 + $0x220] sm:$0xf] }
 0x26b   : > { %1506 = vmatpush.bf16.msra.mxu0 %v4612_v49  ;;  %1523 = vmatpush.bf16.msra.mxu1 %v4360_v16  ;;  %v4296_v27 = vor.u32 %v5280_v22, %v4293_v24  ;;  %v4301_v49 = vld [vmem:[#allocation8 + $0xd8] sm:$0xf0]  ;;  %v5355_v13 = vld [vmem:[#allocation8 + $0x2e4] sm:$0xf0]  ;;  %v4573_v16 = vld [vmem:[#allocation8 + $0x2e8] sm:$0xf0] }
 0x26c   : > { %v4304_v30 = vor.u32 %v5281_v29, %v4301_v49  ;;  %v5338_v21 = vld [vmem:[#allocation8 + $0x25c] sm:$0xf0]  ;;  %v4572_v22 = vor.u32 %v5355_v13, %v4571_v12  ;;  %v5330_v24 = vld [vmem:[#allocation8 + $0x224] sm:$0xf]  ;;  %v4509_v29 = vld [vmem:[#allocation8 + $0x268] sm:$0xf0] }
 0x26d   : > { %v4500_v49 = vor.u32 %v5338_v21, %v4499_v19  ;;  %v5307_v52 = vld [vmem:[#allocation8 + $0x164] sm:$0xf0]  ;;  %v4381_v20 = vld [vmem:[#allocation8 + $0x168] sm:$0xf0]  ;;  %v4715_v19 = vld [vmem:[#allocation8 + $0x3b8] sm:$0xf] }
 0x26e   : > { %1532 = vmatpush.bf16.msra.mxu2 %v4620_v31  ;;  %1545 = vmatpush.bf16.msra.mxu3 %v4624_v35  ;;  %v4227_v31 = vld [vmem:[#allocation8 + $0x10] sm:$0xf]  ;;  %v4229_v35 = vld [vmem:[#allocation8 + $0x50] sm:$0xf0]  ;;  %v4315_v63 = vld [vmem:[#allocation8 + $0xa8] sm:$0xf] }
 0x26f   : > { %1507 = vmatpush.bf16.msra.mxu0 %v4548_v41  ;;  %1524 = vmatpush.bf16.msra.mxu1 %v4296_v27  ;;  %v4228_v34 = vor.u32 %v5272_v32, %v4227_v31  ;;  %v4232_v38 = vor.u32 %v5264_v33, %v4229_v35  ;;  %v4237_v41 = vld [vmem:[#allocation8 + $0x58] sm:$0xf0]  ;;  %v5339_v27 = vld [vmem:[#allocation8 + $0x264] sm:$0xf0]  ;;  %v4435_v31 = vld [vmem:[#allocation8 + $0x1a0] sm:$0xf] }
 0x270   : > { %v4240_v42 = vor.u32 %v5265_v40, %v4237_v41  ;;  %v5322_v32 = vld [vmem:[#allocation8 + $0x1dc] sm:$0xf0]  ;;  %v4508_v33 = vor.u32 %v5339_v27, %v4507_v26  ;;  %v5314_v35 = vld [vmem:[#allocation8 + $0x1a4] sm:$0xf]  ;;  %v4445_v40 = vld [vmem:[#allocation8 + $0x1e8] sm:$0xf0] }
 0x271   : > { %v4436_v41 = vor.u32 %v5322_v32, %v4435_v31  ;;  %v5291_v0 = vld [vmem:[#allocation8 + $0xe4] sm:$0xf0]  ;;  %v5267_v12 = vld [vmem:[#allocation8 + $0x2c] sm:$0xf] }
 0x272   : > { %1533 = vmatpush.bf16.msra.mxu2 %v4556_v43  ;;  %1546 = vmatpush.bf16.msra.mxu3 %v4560_v47  ;;  %v5386_v47 = vld [vmem:[#allocation8 + $0x3dc] sm:$0xf0]  ;;  %v4253_v13 = vld [vmem:[#allocation8 + $0x68] sm:$0xf0] }
 0x273   : > { %1508 = vmatpush.bf16.msra.mxu0 %v4484_v54  ;;  %1525 = vmatpush.bf16.msra.mxu1 %v4232_v38  ;;  %v5379_v54 = vld [vmem:[#allocation8 + $0x3ac] sm:$0xf]  ;;  %v4692_v57 = vor.u32 %v5386_v47, %v4691_v46  ;;  %v5323_v38 = vld [vmem:[#allocation8 + $0x1e4] sm:$0xf0]  ;;  %v5298_v47 = vld [vmem:[#allocation8 + $0x124] sm:$0xf]  ;;  %v4256_v27 = vor.u32 %v5267_v12, %v4253_v13 }
 0x274   : > { %v4704_v62 = vor.u32 %v5379_v54, %v4701_v55  ;;  %v4376_v55 = vor.u32 %v5298_v47, %v4373_v50  ;;  %v4587_v47 = vld [vmem:[#allocation8 + $0x2b8] sm:$0xf] }
 0x275   : > { %v5357_v50 = vld [vmem:[#allocation8 + $0x2f4] sm:$0xf0] }
 0x276   : > { %1534 = vmatpush.bf16.msra.mxu2 %v4492_v56  ;;  %1547 = vmatpush.bf16.msra.mxu3 %v4496_v60  ;;  %v5370_v60 = vld [vmem:[#allocation8 + $0x35c] sm:$0xf0] }
 0x277   : > { %1509 = vmatpush.bf16.msra.mxu0 %v4420_v2  ;;  %v5371_v2 = vld [vmem:[#allocation8 + $0x364] sm:$0xf0] }
 0x27a   : > { %1535 = vmatpush.bf16.msra.mxu2 %v4428_v4  ;;  %1548 = vmatpush.bf16.msra.mxu3 %v4432_v8  ;;  %v4628_v4 = vor.u32 %v5370_v60, %v4627_v59  ;;  %v4636_v8 = vor.u32 %v5371_v2, %v4635_v1  ;;  %v4380_v59 = vor.u32 %v5307_v52, %v4379_v51  ;;  %v5283_v1 = vld [vmem:[#allocation8 + $0xac] sm:$0xf]  ;;  %v5349_v51 = vld [vmem:[#allocation8 + $0x2bc] sm:$0xf] }
 0x27b   : > { %1510 = vmatpush.bf16.msra.mxu0 %v4356_v15  ;;  %v5347_v15 = vld [vmem:[#allocation8 + $0x2ac] sm:$0xf]  ;;  %v4589_v52 = vld [vmem:[#allocation8 + $0x2f8] sm:$0xf0] }
 0x27c   : > { %v4317_v2 = vld [vmem:[#allocation8 + $0xe8] sm:$0xf0] }
 0x27e   : > { %1536 = vmatpush.bf16.msra.mxu2 %v4364_v17  ;;  %1549 = vmatpush.bf16.msra.mxu3 %v4368_v18  ;;  %v4564_v17 = vor.u32 %v5354_v7, %v4563_v6  ;;  %v4568_v18 = vor.u32 %v5346_v10, %v4565_v11  ;;  %v5266_v6 = vld [vmem:[#allocation8 + $0x24] sm:$0xf]  ;;  %v4251_v10 = vld [vmem:[#allocation8 + $0x28] sm:$0xf] }
 0x27f   : > { %1511 = vmatpush.bf16.msra.mxu0 %v4292_v23  ;;  %v4576_v23 = vor.u32 %v5347_v15, %v4573_v16  ;;  %v4245_v7 = vld [vmem:[#allocation8 + $0x60] sm:$0xf0]  ;;  %v5275_v11 = vld [vmem:[#allocation8 + $0x64] sm:$0xf0]  ;;  %v4707_v15 = vld [vmem:[#allocation8 + $0x3b0] sm:$0xf] }
 0x280   : > { %v5388_v16 = vld [vmem:[#allocation8 + $0x3ec] sm:$0xf0]  ;;  %v4252_v26 = vor.u32 %v5275_v11, %v4251_v10  ;;  %v5317_v10 = vld [vmem:[#allocation8 + $0x1bc] sm:$0xf] }
 0x281   : > { %v4461_v11 = vld [vmem:[#allocation8 + $0x1f8] sm:$0xf0] }
 0x282   : > { %1537 = vmatpush.bf16.msra.mxu2 %v4300_v28  ;;  %1550 = vmatpush.bf16.msra.mxu3 %v4304_v30  ;;  %v5331_v28 = vld [vmem:[#allocation8 + $0x22c] sm:$0xf]  ;;  %v4504_v30 = vor.u32 %v5330_v24, %v4501_v25  ;;  %v5381_v24 = vld [vmem:[#allocation8 + $0x3bc] sm:$0xf] }
 0x283   : > { %1512 = vmatpush.bf16.msra.mxu0 %v4228_v34  ;;  %v4512_v34 = vor.u32 %v5331_v28, %v4509_v29  ;;  %v4717_v25 = vld [vmem:[#allocation8 + $0x3f8] sm:$0xf0]  ;;  %v4708_v28 = vor.u32 %v5388_v16, %v4707_v15  ;;  %v4387_v15 = vld [vmem:[#allocation8 + $0x130] sm:$0xf] }
 0x284   : > { %v4720_v32 = vor.u32 %v5381_v24, %v4717_v25  ;;  %v5308_v16 = vld [vmem:[#allocation8 + $0x16c] sm:$0xf0]  ;;  %v5301_v24 = vld [vmem:[#allocation8 + $0x13c] sm:$0xf] }
 0x285   : > { %v4397_v25 = vld [vmem:[#allocation8 + $0x178] sm:$0xf0] }
 0x286   : > { %1538 = vmatpush.bf16.msra.mxu2 %v4236_v39  ;;  %1551 = vmatpush.bf16.msra.mxu3 %v4240_v42  ;;  %v5315_v39 = vld [vmem:[#allocation8 + $0x1ac] sm:$0xf]  ;;  %v4440_v42 = vor.u32 %v5314_v35, %v4437_v36  ;;  %v4651_v35 = vld [vmem:[#allocation8 + $0x338] sm:$0xf] }
 0x287   : > { %v4448_v46 = vor.u32 %v5315_v39, %v4445_v40  ;;  %v5373_v36 = vld [vmem:[#allocation8 + $0x374] sm:$0xf0] }
 0x2ec   : > { %v659_v43 = vpop.f32.mrf.mxu2  ;;  %v679_v44 = vpop.f32.mrf.mxu3 }
 0x2ed   : > { %v680_v45 = vadd.f32 %v679_v44, %v659_v43  ;;  %v4371_v43 = vld [vmem:[#allocation8 + $0x120] sm:$0xf] }
 0x2ee   : > { %v5306_v44 = vld [vmem:[#allocation8 + $0x15c] sm:$0xf0] }
 0x2ef   : > { %682 = vst [vmem:[%s6362_s18] sm:$0xff] %v680_v45  ;;  %v683_v53 = vsub.f32 %v6334_v14, %v680_v45  ;;  %v5363_v14 = vld [vmem:[#allocation8 + $0x32c] sm:$0xf]  ;;  %v4444_v45 = vor.u32 %v5323_v38, %v4443_v37  ;;  %v4372_v54 = vor.u32 %v5306_v44, %v4371_v43  ;;  %v5365_v37 = vld [vmem:[#allocation8 + $0x33c] sm:$0xf]  ;;  %v4652_v43 = vor.u32 %v5373_v36, %v4651_v35 }
 0x2f0   : > { %v4640_v9 = vor.u32 %v5363_v14, %v4637_v3  ;;  %v4243_v14 = vld [vmem:[#allocation8 + $0x20] sm:$0xf]  ;;  %v4653_v38 = vld [vmem:[#allocation8 + $0x378] sm:$0xf0] }
 0x2f1   : > { %v6366_v56 = vpack.c.bf16 %v683_v53, %v683_v53  ;;  %v5299_v53 = vld [vmem:[#allocation8 + $0x12c] sm:$0xf]  ;;  %v4656_v44 = vor.u32 %v5365_v37, %v4653_v38  ;;  %v5285_v35 = vld [vmem:[#allocation8 + $0xbc] sm:$0xf] }
 0x2f2   : > { %v4384_v60 = vor.u32 %v5299_v53, %v4381_v20  ;;  %v4333_v36 = vld [vmem:[#allocation8 + $0xf8] sm:$0xf0] }
 0x2f3   : > { %1461 = vmatmul.bf16.vlgmr.msrb.gmra.mxu0 %v6366_v56  ;;  %1474 = vmatmul.bf16.vlgmr.msrb.gmra.mxu1 %v6366_v56 }
 0x2f4   : > { %1487 = vmatmul.bf16.vlgmr.msrb.gmra.mxu2 %v6366_v56  ;;  %1500 = vmatmul.bf16.vlgmr.msrb.gmra.mxu3 %v6366_v56 }
 0x2f5   : > { %1557 = vmatpush.bf16.msrb.mxu0 %v4692_v57  ;;  %1570 = vmatpush.bf16.msrb.mxu1 %v4696_v58  ;;  %v4307_v57 = vld [vmem:[#allocation8 + $0xa0] sm:$0xf] }
 0x2f6   : > { %1583 = vmatpush.bf16.msrb.mxu2 %v4700_v61  ;;  %1596 = vmatpush.bf16.msrb.mxu3 %v4704_v62  ;;  %v5290_v58 = vld [vmem:[#allocation8 + $0xdc] sm:$0xf0]  ;;  %v5282_v61 = vld [vmem:[#allocation8 + $0xa4] sm:$0xf] }
 0x2f7   : > { %v4309_v62 = vld [vmem:[#allocation8 + $0xe0] sm:$0xf0]  ;;  %v4308_v3 = vor.u32 %v5290_v58, %v4307_v57  ;;  %v4588_v57 = vor.u32 %v5357_v50, %v4587_v47  ;;  %v4592_v58 = vor.u32 %v5349_v51, %v4589_v52  ;;  %v5269_v47 = vld [vmem:[#allocation8 + $0x3c] sm:$0xf] }
 0x2f8   : > { %v4269_v50 = vld [vmem:[#allocation8 + $0x78] sm:$0xf0] }
 0x2f9   : > { %1558 = vmatpush.bf16.msrb.mxu0 %v4628_v4  ;;  %1571 = vmatpush.bf16.msrb.mxu1 %v4632_v5  ;;  %v4312_v4 = vor.u32 %v5282_v61, %v4309_v62  ;;  %v5274_v5 = vld [vmem:[#allocation8 + $0x5c] sm:$0xf0]  ;;  %v4523_v61 = vld [vmem:[#allocation8 + $0x238] sm:$0xf] }
 0x2fa   : > { %1584 = vmatpush.bf16.msrb.mxu2 %v4636_v8  ;;  %1597 = vmatpush.bf16.msrb.mxu3 %v4640_v9  ;;  %v4316_v8 = vor.u32 %v5291_v0, %v4315_v63  ;;  %v4320_v9 = vor.u32 %v5283_v1, %v4317_v2  ;;  %v4244_v21 = vor.u32 %v5274_v5, %v4243_v14  ;;  %v5341_v62 = vld [vmem:[#allocation8 + $0x274] sm:$0xf0]  ;;  %v5333_v63 = vld [vmem:[#allocation8 + $0x23c] sm:$0xf]  ;;  %v4451_v14 = vld [vmem:[#allocation8 + $0x1b0] sm:$0xf] }
 0x2fb   : > { %v4525_v0 = vld [vmem:[#allocation8 + $0x278] sm:$0xf0] }
 0x2fc   : > { %v4528_v5 = vor.u32 %v5333_v63, %v4525_v0 }
 0x2fd   : > { %1559 = vmatpush.bf16.msrb.mxu0 %v4564_v17  ;;  %1572 = vmatpush.bf16.msrb.mxu1 %v4568_v18  ;;  %v5380_v17 = vld [vmem:[#allocation8 + $0x3b4] sm:$0xf] }
 0x2fe   : > { %1585 = vmatpush.bf16.msrb.mxu2 %v4572_v22  ;;  %1598 = vmatpush.bf16.msrb.mxu3 %v4576_v23  ;;  %v4709_v18 = vld [vmem:[#allocation8 + $0x3f0] sm:$0xf0]  ;;  %v4248_v22 = vor.u32 %v5266_v6, %v4245_v7  ;;  %v5389_v23 = vld [vmem:[#allocation8 + $0x3f4] sm:$0xf0] }
 0x2ff   : > { %v4712_v29 = vor.u32 %v5380_v17, %v4709_v18  ;;  %v4716_v31 = vor.u32 %v5389_v23, %v4715_v19  ;;  %v5316_v6 = vld [vmem:[#allocation8 + $0x1b4] sm:$0xf]  ;;  %v4464_v18 = vor.u32 %v5317_v10, %v4461_v11  ;;  %v5309_v23 = vld [vmem:[#allocation8 + $0x174] sm:$0xf0] }
 0x300   : > { %v4453_v7 = vld [vmem:[#allocation8 + $0x1f0] sm:$0xf0] }
 0x301   : > { %1560 = vmatpush.bf16.msrb.mxu0 %v4500_v49  ;;  %1573 = vmatpush.bf16.msrb.mxu1 %v4504_v30  ;;  %v4643_v49 = vld [vmem:[#allocation8 + $0x330] sm:$0xf]  ;;  %v4456_v13 = vor.u32 %v5316_v6, %v4453_v7  ;;  %v5300_v19 = vld [vmem:[#allocation8 + $0x134] sm:$0xf] }
 0x302   : > { %1586 = vmatpush.bf16.msrb.mxu2 %v4508_v33  ;;  %1599 = vmatpush.bf16.msrb.mxu3 %v4512_v34  ;;  %v5372_v30 = vld [vmem:[#allocation8 + $0x36c] sm:$0xf0]  ;;  %v5364_v33 = vld [vmem:[#allocation8 + $0x334] sm:$0xf] }
 0x303   : > { %1513 = vmatmul.bf16.vlgmr.msra.gmra.mxu0 %v6366_v56  ;;  %1526 = vmatmul.bf16.vlgmr.msra.gmra.mxu1 %v6366_v56  ;;  %v4645_v34 = vld [vmem:[#allocation8 + $0x370] sm:$0xf0]  ;;  %v4644_v39 = vor.u32 %v5372_v30, %v4643_v49  ;;  %v4400_v30 = vor.u32 %v5301_v24, %v4397_v25 }
 0x304   : > { %1539 = vmatmul.bf16.vlgmr.msra.gmra.mxu2 %v6366_v56  ;;  %1552 = vmatmul.bf16.vlgmr.msra.gmra.mxu3 %v6366_v56  ;;  %v4648_v40 = vor.u32 %v5364_v33, %v4645_v34  ;;  %v4331_v33 = vld [vmem:[#allocation8 + $0xb8] sm:$0xf] }
 0x305   : > { %1561 = vmatpush.bf16.msrb.mxu0 %v4436_v41  ;;  %1574 = vmatpush.bf16.msrb.mxu1 %v4440_v42  ;;  %v4579_v41 = vld [vmem:[#allocation8 + $0x2b0] sm:$0xf]  ;;  %v5293_v34 = vld [vmem:[#allocation8 + $0xf4] sm:$0xf0] }
 0x306   : > { %1587 = vmatpush.bf16.msrb.mxu2 %v4444_v45  ;;  %1600 = vmatpush.bf16.msrb.mxu3 %v4448_v46  ;;  %v5356_v42 = vld [vmem:[#allocation8 + $0x2ec] sm:$0xf0]  ;;  %v5348_v45 = vld [vmem:[#allocation8 + $0x2b4] sm:$0xf] }
 0x307   : > { %v4581_v46 = vld [vmem:[#allocation8 + $0x2f0] sm:$0xf0]  ;;  %v4580_v53 = vor.u32 %v5356_v42, %v4579_v41  ;;  %v4332_v41 = vor.u32 %v5293_v34, %v4331_v33  ;;  %v4336_v42 = vor.u32 %v5285_v35, %v4333_v36 }
 0x308   : > { %v4584_v20 = vor.u32 %v5348_v45, %v4581_v46  ;;  %v4267_v45 = vld [vmem:[#allocation8 + $0x38] sm:$0xf] }
 0x309   : > { %1562 = vmatpush.bf16.msrb.mxu0 %v4372_v54  ;;  %1575 = vmatpush.bf16.msrb.mxu1 %v4376_v55  ;;  %v4515_v54 = vld [vmem:[#allocation8 + $0x230] sm:$0xf]  ;;  %v5277_v46 = vld [vmem:[#allocation8 + $0x74] sm:$0xf0] }
 0x30a   : > { %1588 = vmatpush.bf16.msrb.mxu2 %v4380_v59  ;;  %1601 = vmatpush.bf16.msrb.mxu3 %v4384_v60  ;;  %v5340_v55 = vld [vmem:[#allocation8 + $0x26c] sm:$0xf0]  ;;  %v5332_v59 = vld [vmem:[#allocation8 + $0x234] sm:$0xf] }
 0x30b   : > { %v4517_v60 = vld [vmem:[#allocation8 + $0x270] sm:$0xf0]  ;;  %v4516_v1 = vor.u32 %v5340_v55, %v4515_v54  ;;  %v6384_v54 = vld [vmem:[#allocation11] sm:$0xff] }
 0x30c   : > { %v4520_v2 = vor.u32 %v5332_v59, %v4517_v60  ;;  %v1681_v59 = vperm.slane %v6384_v54, 0  ;;  %v1683_v63 = vperm.slane %v6384_v54, 2  ;;  %v1684_v0 = vperm.slane %v6384_v54, 3 }
 0x30d   : > { %1563 = vmatpush.bf16.msrb.mxu0 %v4308_v3  ;;  %1576 = vmatpush.bf16.msrb.mxu1 %v4312_v4  ;;  %v5324_v3 = vld [vmem:[#allocation8 + $0x1ec] sm:$0xf0]  ;;  %v4524_v4 = vor.u32 %v5341_v62, %v4523_v61  ;;  %v1682_v61 = vperm.slane %v6384_v54, 1  ;;  %v1687_v35 = vperm.slane %v6384_v54, 6  ;;  %v1688_v36 = vperm.slane %v6384_v54, 7 }
 0x30e   : > { %1589 = vmatpush.bf16.msrb.mxu2 %v4316_v8  ;;  %1602 = vmatpush.bf16.msrb.mxu3 %v4320_v9  ;;  %v4459_v8 = vld [vmem:[#allocation8 + $0x1b8] sm:$0xf]  ;;  %v4452_v12 = vor.u32 %v5324_v3, %v4451_v14 }
 0x30f   : > { %v5325_v9 = vld [vmem:[#allocation8 + $0x1f4] sm:$0xf0] }
 0x310   : > { %v4460_v17 = vor.u32 %v5325_v9, %v4459_v8  ;;  %v6125_v9 = vmov 1983009808  }
 0x311   : > { %1564 = vmatpush.bf16.msrb.mxu0 %v4244_v21  ;;  %1577 = vmatpush.bf16.msrb.mxu1 %v4248_v22  ;;  %v4389_v21 = vld [vmem:[#allocation8 + $0x170] sm:$0xf0]  ;;  %v4395_v22 = vld [vmem:[#allocation8 + $0x138] sm:$0xf]  ;;  %v1751_v10 = vunpack.c.l.s4 %v6125_v9 }
 0x312   : > { %1590 = vmatpush.bf16.msrb.mxu2 %v4252_v26  ;;  %1603 = vmatpush.bf16.msrb.mxu3 %v4256_v27  ;;  %v4388_v26 = vor.u32 %v5308_v16, %v4387_v15  ;;  %v4392_v27 = vor.u32 %v5300_v19, %v4389_v21  ;;  %v4396_v49 = vor.u32 %v5309_v23, %v4395_v22  ;;  %v1685_v19 = vperm.slane %v6384_v54, 4 }
 0x313   : > { %v6390_v16 = vunpack.c.0.s8 %v1751_v10 }
 0x314   : > { %1565 = vmatmul.bf16.vlgmr.msrb.gmra.mxu0 %v6366_v56  ;;  %1578 = vmatmul.bf16.vlgmr.msrb.gmra.mxu1 %v6366_v56 }
 0x315   : > { %1609 = vmatpush.bf16.msra.mxu0 %v4708_v28  ;;  %1622 = vmatpush.bf16.msra.mxu1 %v4712_v29  ;;  %v4323_v28 = vld [vmem:[#allocation8 + $0xb0] sm:$0xf]  ;;  %7199 = vst [vmem:[#allocation27_spill] sm:$0xff] %v6390_v16 }
 0x316   : > { %1635 = vmatpush.bf16.msra.mxu2 %v4716_v31  ;;  %1648 = vmatpush.bf16.msra.mxu3 %v4720_v32  ;;  %v5292_v29 = vld [vmem:[#allocation8 + $0xec] sm:$0xf0]  ;;  %v5284_v31 = vld [vmem:[#allocation8 + $0xb4] sm:$0xf] }
 0x317   : > { %1591 = vmatmul.bf16.vlgmr.msrb.gmra.mxu2 %v6366_v56  ;;  %1604 = vmatmul.bf16.vlgmr.msrb.gmra.mxu3 %v6366_v56  ;;  %v4325_v32 = vld [vmem:[#allocation8 + $0xf0] sm:$0xf0]  ;;  %v4324_v37 = vor.u32 %v5292_v29, %v4323_v28 }
 0x318   : > { %v4328_v38 = vor.u32 %v5284_v31, %v4325_v32 }
 0x319   : > { %1610 = vmatpush.bf16.msra.mxu0 %v4644_v39  ;;  %1623 = vmatpush.bf16.msra.mxu1 %v4648_v40  ;;  %v4259_v39 = vld [vmem:[#allocation8 + $0x30] sm:$0xf] }
 0x31a   : > { %1636 = vmatpush.bf16.msra.mxu2 %v4652_v43  ;;  %1649 = vmatpush.bf16.msra.mxu3 %v4656_v44  ;;  %v5276_v40 = vld [vmem:[#allocation8 + $0x6c] sm:$0xf0]  ;;  %v5268_v43 = vld [vmem:[#allocation8 + $0x34] sm:$0xf] }
 0x31b   : > { %v4261_v44 = vld [vmem:[#allocation8 + $0x70] sm:$0xf0]  ;;  %v4260_v51 = vor.u32 %v5276_v40, %v4259_v39 }
 0x31c   : > { %v4264_v52 = vor.u32 %v5268_v43, %v4261_v44 }
 0x31d   : > { %1611 = vmatpush.bf16.msra.mxu0 %v4580_v53  ;;  %1624 = vmatpush.bf16.msra.mxu1 %v4584_v20  ;;  %v4268_v53 = vor.u32 %v5277_v46, %v4267_v45  ;;  %v4272_v20 = vor.u32 %v5269_v47, %v4269_v50 }
 0x31e   : > { %1637 = vmatpush.bf16.msra.mxu2 %v4588_v57  ;;  %1650 = vmatpush.bf16.msra.mxu3 %v4592_v58 }
 0x321   : > { %1612 = vmatpush.bf16.msra.mxu0 %v4516_v1  ;;  %1625 = vmatpush.bf16.msra.mxu1 %v4520_v2 }
 0x322   : > { %1638 = vmatpush.bf16.msra.mxu2 %v4524_v4  ;;  %1651 = vmatpush.bf16.msra.mxu3 %v4528_v5 }
 0x325   : > { %1613 = vmatpush.bf16.msra.mxu0 %v4452_v12  ;;  %1626 = vmatpush.bf16.msra.mxu1 %v4456_v13 }
 0x326   : > { %1639 = vmatpush.bf16.msra.mxu2 %v4460_v17  ;;  %1652 = vmatpush.bf16.msra.mxu3 %v4464_v18 }
 0x329   : > { %1614 = vmatpush.bf16.msra.mxu0 %v4388_v26  ;;  %1627 = vmatpush.bf16.msra.mxu1 %v4392_v27  ;;  %v1686_v26 = vperm.slane %v6384_v54, 5 }
 0x32a   : > { %1640 = vmatpush.bf16.msra.mxu2 %v4396_v49  ;;  %1653 = vmatpush.bf16.msra.mxu3 %v4400_v30 }
 0x32d   : > { %1615 = vmatpush.bf16.msra.mxu0 %v4324_v37  ;;  %1628 = vmatpush.bf16.msra.mxu1 %v4328_v38 }
 0x32e   : > { %1641 = vmatpush.bf16.msra.mxu2 %v4332_v41  ;;  %1654 = vmatpush.bf16.msra.mxu3 %v4336_v42  ;;  %v6126_v41 = vmov 1934713408  }
 0x32f   : > { %v1799_v42 = vunpack.c.l.s4 %v6126_v41 }
 0x331   : > { %1616 = vmatpush.bf16.msra.mxu0 %v4260_v51  ;;  %1629 = vmatpush.bf16.msra.mxu1 %v4264_v52 }
 0x332   : > { %1642 = vmatpush.bf16.msra.mxu2 %v4268_v53  ;;  %1655 = vmatpush.bf16.msra.mxu3 %v4272_v20 }
 0x334   : > { %1617 = vmatmul.bf16.vlgmr.msra.gmra.mxu0 %v6366_v56  ;;  %1630 = vmatmul.bf16.vlgmr.msra.gmra.mxu1 %v6366_v56 }
 0x335   : > { %1643 = vmatmul.bf16.vlgmr.msra.gmra.mxu2 %v6366_v56  ;;  %1656 = vmatmul.bf16.vlgmr.msra.gmra.mxu3 %v6366_v56 }
 0x370   : > { %v1462_v55 = vpop.f32.mrf.mxu0  ;;  %v1475_v57 = vpop.f32.mrf.mxu1 }
 0x371   : > { %v1661_v58 = vmul.f32 2.0, %v1462_v55  ;;  %v1662_v60 = vmul.f32 2.0, %v1475_v57  ;;  %v6406_v55 = vunpack.c.0.s8 %v1799_v42 }
 0x373   : > { %v1713_v62 = vsub.f32 %v1661_v58, %v1681_v59  ;;  %v1714_v14 = vsub.f32 %v1662_v60, %v1682_v61  ;;  %7200 = vst [vmem:[#allocation28_spill] sm:$0xff] %v6406_v55 }
 0x375   : > { %v1729_v6 = vmul.f32 100.0, %v1713_v62  ;;  %v1730_v11 = vmul.f32 100.0, %v1714_v14 }
 0x377   : > { %v1488_v1 = vpop.f32.mrf.mxu2  ;;  %v1501_v2 = vpop.f32.mrf.mxu3  ;;  %v1748_v13 = vrot.slane %v1729_v6, 4  ;;  %v1760_v21 = vrot.slane %v1730_v11, 4 }
 0x378   : > { %v1663_v3 = vmul.f32 2.0, %v1488_v1  ;;  %v1664_v56 = vmul.f32 2.0, %v1501_v2  ;;  %v1464_v4 = vpop.f32.mrf.mxu0  ;;  %v1477_v5 = vpop.f32.mrf.mxu1 }
 0x37a   : > { %v1715_v7 = vsub.f32 %v1663_v3, %v1683_v63  ;;  %v1716_v8 = vsub.f32 %v1664_v56, %v1684_v0 }
 0x37c   : > { %v1731_v12 = vmul.f32 100.0, %v1715_v7  ;;  %v1732_v15 = vmul.f32 100.0, %v1716_v8 }
 0x37e   : > { %v1745_v22 = vrot.slane %v1731_v12, 4  ;;  %v1749_v23 = vsel %vm1746_vm6, %v1731_v12, %v1748_v13  ;;  %v1761_v27 = vsel %vm1746_vm6, %v1732_v15, %v1760_v21  ;;  %v1758_v34 = vrot.slane %v1732_v15, 4 }
 0x37f   : > { %v1490_v17 = vpop.f32.mrf.mxu2  ;;  %v1503_v18 = vpop.f32.mrf.mxu3  ;;  %v1757_v49 = vperm.slane %v1749_v23, %v6390_v16  ;;  %v1769_v33 = vperm.slane %v1761_v27, %v6390_v16 }
 0x380   : > { %v1514_v24 = vpop.f32.mrf.mxu0  ;;  %v1527_v25 = vpop.f32.mrf.mxu1  ;;  %v1747_v30 = vsel %vm1746_vm6, %v1745_v22, %v1729_v6  ;;  %v1759_v52 = vsel %vm1746_vm6, %v1758_v34, %v1730_v11 }
 0x381   : > { %v1665_v28 = vmul.f32 2.0, %v1514_v24  ;;  %v1666_v29 = vmul.f32 2.0, %v1527_v25  ;;  %v6402_v37 = vperm.slane %v1747_v30, %v6390_v16  ;;  %v1808_v38 = vrot.slane %v1757_v49, 4 }
 0x382   : > { %v1806_v51 = vrot.slane %v1769_v33, 4  ;;  %v1765_v62 = vperm.slane %v1759_v52, %v6390_v16 }
 0x383   : > { %v1717_v31 = vsub.f32 %v1665_v28, %v1685_v19  ;;  %v1718_v32 = vsub.f32 %v1666_v29, %v1686_v26  ;;  %v1796_v54 = vrot.slane %v6402_v37, 4  ;;  %v1809_v57 = vsel %vm1746_vm6, %v1769_v33, %v1808_v38 }
 0x384   : > { %v1807_v63 = vsel %vm1746_vm6, %v1806_v51, %v1757_v49  ;;  %v1817_v6 = vperm.slane %v1809_v57, %v6406_v55  ;;  %v1794_v34 = vrot.slane %v1765_v62, 4  ;;  %v1678_v51 = vld [vmem:[#allocation11 + $0x8] sm:$0xff] }
 0x385   : > { %v1733_v43 = vmul.f32 100.0, %v1717_v31  ;;  %v1734_v44 = vmul.f32 100.0, %v1718_v32  ;;  %v1813_v9 = vperm.slane %v1807_v63, %v6406_v55  ;;  %v1797_v10 = vsel %vm1746_vm6, %v1765_v62, %v1796_v54 }
 0x386   : > { %v1805_v22 = vperm.slane %v1797_v10, %v6406_v55  ;;  %v1856_v24 = vrot.slane %v1817_v6, 4  ;;  %v1689_v57 = vperm.slane %v1678_v51, 0  ;;  %v1692_v63 = vperm.slane %v1678_v51, 3 }
 0x387   : > { %v1540_v39 = vpop.f32.mrf.mxu2  ;;  %v1553_v40 = vpop.f32.mrf.mxu3  ;;  %v1772_v58 = vrot.slane %v1733_v43, 4  ;;  %v1784_v59 = vrot.slane %v1734_v44, 4  ;;  %v1852_v28 = vrot.slane %v1813_v9, 4 }
 0x388   : > { %v1667_v45 = vmul.f32 2.0, %v1540_v39  ;;  %v1668_v46 = vmul.f32 2.0, %v1553_v40  ;;  %v1516_v47 = vpop.f32.mrf.mxu0  ;;  %v1529_v50 = vpop.f32.mrf.mxu1  ;;  %v1848_v33 = vrot.slane %v1805_v22, 4 }
 0x38a   : > { %v1719_v53 = vsub.f32 %v1667_v45, %v1687_v35  ;;  %v1720_v20 = vsub.f32 %v1668_v46, %v1688_v36 }
 0x38c   : > { %v1735_v60 = vmul.f32 100.0, %v1719_v53  ;;  %v1736_v61 = vmul.f32 100.0, %v1720_v20 }
 0x38e   : > { %v1770_v0 = vrot.slane %v1735_v60, 4  ;;  %v1773_v1 = vsel %vm1746_vm6, %v1735_v60, %v1772_v58  ;;  %v1782_v2 = vrot.slane %v1736_v61, 4  ;;  %v1785_v14 = vsel %vm1746_vm6, %v1736_v61, %v1784_v59 }
 0x38f   : > { %v1781_v3 = vperm.slane %v1773_v1, %v6390_v16  ;;  %v1793_v56 = vperm.slane %v1785_v14, %v6390_v16  ;;  %v1542_v4 = vpop.f32.mrf.mxu2  ;;  %v1555_v5 = vpop.f32.mrf.mxu3  ;;  %v1690_v59 = vperm.slane %v1678_v51, 1  ;;  %v1691_v61 = vperm.slane %v1678_v51, 2 }
 0x390   : > { %v1771_v7 = vsel %vm1746_vm6, %v1770_v0, %v1733_v43  ;;  %v1783_v8 = vsel %vm1746_vm6, %v1782_v2, %v1734_v44  ;;  %v1795_v44 = vsel %vm1746_vm6, %v1794_v34, %v6402_v37 }
 0x391   : > { %v1777_v11 = vperm.slane %v1771_v7, %v6390_v16  ;;  %v1832_v12 = vrot.slane %v1781_v3, 4  ;;  %v1789_v13 = vperm.slane %v1783_v8, %v6390_v16  ;;  %v1830_v15 = vrot.slane %v1793_v56, 4  ;;  %v1566_v17 = vpop.f32.mrf.mxu0  ;;  %v1579_v18 = vpop.f32.mrf.mxu1 }
 0x392   : > { %v1801_v50 = vperm.slane %v1795_v44, %v6406_v55  ;;  %v1669_v54 = vmul.f32 2.0, %v1566_v17  ;;  %v1670_v58 = vmul.f32 2.0, %v1579_v18 }
 0x393   : > { %v1818_v19 = vrot.slane %v1789_v13, 4  ;;  %v1833_v21 = vsel %vm1746_vm6, %v1793_v56, %v1832_v12  ;;  %v1831_v25 = vsel %vm1746_vm6, %v1830_v15, %v1781_v3  ;;  %v1820_v26 = vrot.slane %v1777_v11, 4 }
 0x394   : > { %v1841_v23 = vperm.slane %v1833_v21, %v6406_v55  ;;  %v1837_v27 = vperm.slane %v1831_v25, %v6406_v55  ;;  %v1721_v1 = vsub.f32 %v1669_v54, %v1689_v57  ;;  %v1722_v2 = vsub.f32 %v1670_v58, %v1690_v59 }
 0x395   : > { %v1821_v49 = vsel %vm1746_vm6, %v1789_v13, %v1820_v26  ;;  %v1819_v30 = vsel %vm1746_vm6, %v1818_v19, %v1777_v11  ;;  %v1844_v5 = vrot.slane %v1801_v50, 4  ;;  %v1693_v13 = vperm.slane %v1678_v51, 4 }
 0x396   : > { %v6428_v29 = vsel %vm1746_vm6, %v1841_v23, %v1856_v24  ;;  %v6434_v31 = vsel %vm1746_vm6, %v1837_v27, %v1852_v28  ;;  %v1829_v32 = vperm.slane %v1821_v49, %v6406_v55  ;;  %v1825_v39 = vperm.slane %v1819_v30, %v6406_v55 }
 0x397   : > { %7201 = vst [vmem:[#allocation29_spill] sm:$0xff] %v6428_v29  ;;  %1998 = vmax.xlane.f32.xlu2 %v6428_v29  ;;  %1990 = vmax.xlane.f32.xlu0 %v6434_v31  ;;  %v1854_v42 = vrot.slane %v1841_v23, 4  ;;  %v1850_v37 = vrot.slane %v1837_v27, 4  ;;  %v1737_v56 = vmul.f32 100.0, %v1721_v1  ;;  %v1738_v4 = vmul.f32 100.0, %v1722_v2 }
 0x398   : > { %v6439_v38 = vsel %vm1746_vm6, %v1829_v32, %v1848_v33  ;;  %v1846_v43 = vrot.slane %v1829_v32, 4  ;;  %v1842_v45 = vrot.slane %v1825_v39, 4  ;;  %v6463_v8 = vsel %vm1746_vm6, %v1825_v39, %v1844_v5 }
 0x399   : > { %v1581_v40 = vpop.f32.mrf.mxu1  ;;  %1982 = vmax.xlane.f32.xlu1 %v6439_v38  ;;  %v1568_v41 = vpop.f32.mrf.mxu0  ;;  %v6446_v46 = vsel %vm1746_vm6, %v1854_v42, %v1817_v6  ;;  %v6459_v0 = vsel %vm1746_vm6, %v1850_v37, %v1813_v9  ;;  %v1860_v10 = vrot.slane %v1737_v56, 4  ;;  %v1872_v11 = vrot.slane %v1738_v4, 4 }
 0x39a   : > { %v1592_v35 = vpop.f32.mrf.mxu2  ;;  %v1605_v36 = vpop.f32.mrf.mxu3  ;;  %7202 = vst [vmem:[#allocation30_spill] sm:$0xff] %v6446_v46  ;;  %v6450_v47 = vsel %vm1746_vm6, %v1846_v43, %v1805_v22  ;;  %v6455_v20 = vsel %vm1746_vm6, %v1842_v45, %v1801_v50  ;;  %v1694_v15 = vperm.slane %v1678_v51, 5  ;;  %v1695_v27 = vperm.slane %v1678_v51, 6 }
 0x39b   : > { %v1671_v60 = vmul.f32 2.0, %v1592_v35  ;;  %v1672_v62 = vmul.f32 2.0, %v1605_v36  ;;  %v1696_v28 = vperm.slane %v1678_v51, 7 }
 0x39d   : > { %v1723_v14 = vsub.f32 %v1671_v60, %v1691_v61  ;;  %v1724_v3 = vsub.f32 %v1672_v62, %v1692_v63 }
 0x39f   : > { %1994 = vmax.xlane.f32.xlu2 %v6446_v46  ;;  %1978 = vmax.xlane.f32.xlu0 %v6450_v47  ;;  %v1739_v6 = vmul.f32 100.0, %v1723_v14  ;;  %v1740_v7 = vmul.f32 100.0, %v1724_v3 }
 0x3a1   : > { %1970 = vmax.xlane.f32.xlu1 %v6455_v20  ;;  %v1861_v19 = vsel %vm1746_vm6, %v1739_v6, %v1860_v10  ;;  %v1873_v21 = vsel %vm1746_vm6, %v1740_v7, %v1872_v11  ;;  %v1858_v26 = vrot.slane %v1739_v6, 4  ;;  %v1870_v37 = vrot.slane %v1740_v7, 4 }
 0x3a2   : > { %v1594_v52 = vpop.f32.mrf.mxu2  ;;  %v1607_v53 = vpop.f32.mrf.mxu3  ;;  %v1869_v24 = vperm.slane %v1861_v19, %v6390_v16  ;;  %v1881_v25 = vperm.slane %v1873_v21, %v6390_v16 }
 0x3a3   : > { %v1859_v42 = vsel %vm1746_vm6, %v1858_v26, %v1737_v56  ;;  %v1871_v11 = vsel %vm1746_vm6, %v1870_v37, %v1738_v4 }
 0x3a4   : > { %v1920_v40 = vrot.slane %v1869_v24, 4  ;;  %v1918_v41 = vrot.slane %v1881_v25, 4  ;;  %v1865_v51 = vperm.slane %v1859_v42, %v6390_v16 }
 0x3a6   : > { %v1921_v54 = vsel %vm1746_vm6, %v1881_v25, %v1920_v40  ;;  %v1919_v57 = vsel %vm1746_vm6, %v1918_v41, %v1869_v24 }
 0x3a7   : > { %1986 = vmax.xlane.f32.xlu2 %v6459_v0  ;;  %v1929_v56 = vperm.slane %v1921_v54, %v6406_v55  ;;  %v1925_v5 = vperm.slane %v1919_v57, %v6406_v55 }
 0x3a9   : > { %v1968_v19 = vrot.slane %v1929_v56, 4 }
 0x3af   : > { %1974 = vmax.xlane.f32.xlu2 %v6463_v8 }
 0x3b1   : > { %v1618_v12 = vpop.f32.mrf.mxu0  ;;  %v1631_v9 = vpop.f32.mrf.mxu1 }
 0x3b2   : > { %v1673_v17 = vmul.f32 2.0, %v1618_v12  ;;  %v1674_v18 = vmul.f32 2.0, %v1631_v9  ;;  %v1908_v12 = vrot.slane %v1865_v51, 4 }
 0x3b4   : > { %v1725_v22 = vsub.f32 %v1673_v17, %v1693_v13  ;;  %v1726_v23 = vsub.f32 %v1674_v18, %v1694_v15 }
 0x3b6   : > { %v1741_v32 = vmul.f32 100.0, %v1725_v22  ;;  %v1742_v33 = vmul.f32 100.0, %v1726_v23  ;;  %v1964_v22 = vrot.slane %v1925_v5, 4  ;;  %v1877_v23 = vperm.slane %v1871_v11, %v6390_v16 }
 0x3b8   : > { %v1644_v49 = vpop.f32.mrf.mxu2  ;;  %v1657_v30 = vpop.f32.mrf.mxu3  ;;  %v1884_v45 = vrot.slane %v1741_v32, 4  ;;  %v1896_v50 = vrot.slane %v1742_v33, 4 }
 0x3b9   : > { %v1675_v34 = vmul.f32 2.0, %v1644_v49  ;;  %v1676_v35 = vmul.f32 2.0, %v1657_v30  ;;  %v1620_v36 = vpop.f32.mrf.mxu0  ;;  %v1633_v39 = vpop.f32.mrf.mxu1  ;;  %v1906_v30 = vrot.slane %v1877_v23, 4 }
 0x3bb   : > { %v1727_v43 = vsub.f32 %v1675_v34, %v1695_v27  ;;  %v1728_v44 = vsub.f32 %v1676_v35, %v1696_v28  ;;  %v1909_v27 = vsel %vm1746_vm6, %v1877_v23, %v1908_v12  ;;  %v1907_v36 = vsel %vm1746_vm6, %v1906_v30, %v1865_v51 }
 0x3bc   : > { %v1917_v34 = vperm.slane %v1909_v27, %v6406_v55 }
 0x3bd   : > { %v1743_v52 = vmul.f32 100.0, %v1727_v43  ;;  %v1744_v53 = vmul.f32 100.0, %v1728_v44  ;;  %v1913_v44 = vperm.slane %v1907_v36, %v6406_v55 }
 0x3be   : > { %v1960_v42 = vrot.slane %v1917_v34, 4 }
 0x3bf   : > { %v1882_v58 = vrot.slane %v1743_v52, 4  ;;  %v1885_v59 = vsel %vm1746_vm6, %v1743_v52, %v1884_v45  ;;  %v1894_v60 = vrot.slane %v1744_v53, 4  ;;  %v1897_v61 = vsel %vm1746_vm6, %v1744_v53, %v1896_v50 }
 0x3c0   : > { %v1893_v62 = vperm.slane %v1885_v59, %v6390_v16  ;;  %v1905_v63 = vperm.slane %v1897_v61, %v6390_v16  ;;  %v1646_v1 = vpop.f32.mrf.mxu2  ;;  %v1659_v2 = vpop.f32.mrf.mxu3  ;;  %v1956_v50 = vrot.slane %v1913_v44, 4 }
 0x3c1   : > { %v1883_v14 = vsel %vm1746_vm6, %v1882_v58, %v1741_v32  ;;  %v1895_v3 = vsel %vm1746_vm6, %v1894_v60, %v1742_v33 }
 0x3c2   : > { %v1889_v6 = vperm.slane %v1883_v14, %v6390_v16  ;;  %v1944_v7 = vrot.slane %v1893_v62, 4  ;;  %v1942_v10 = vrot.slane %v1905_v63, 4  ;;  %v1901_v9 = vperm.slane %v1895_v3, %v6390_v16 }
 0x3c4   : > { %v1932_v13 = vrot.slane %v1889_v6, 4  ;;  %v1945_v15 = vsel %vm1746_vm6, %v1905_v63, %v1944_v7  ;;  %v1943_v17 = vsel %vm1746_vm6, %v1942_v10, %v1893_v62  ;;  %v1930_v32 = vrot.slane %v1901_v9, 4 }
 0x3c5   : > { %v1953_v18 = vperm.slane %v1945_v15, %v6406_v55  ;;  %v1949_v21 = vperm.slane %v1943_v17, %v6406_v55 }
 0x3c6   : > { %v1933_v24 = vsel %vm1746_vm6, %v1901_v9, %v1932_v13  ;;  %v1931_v39 = vsel %vm1746_vm6, %v1930_v32, %v1889_v6 }
 0x3c7   : > { %v6492_v4 = vsel %vm1746_vm6, %v1953_v18, %v1968_v19  ;;  %v6495_v25 = vsel %vm1746_vm6, %v1949_v21, %v1964_v22  ;;  %v1966_v26 = vrot.slane %v1953_v18, 4  ;;  %v1941_v28 = vperm.slane %v1933_v24, %v6406_v55 }
 0x3c8   : > { %7203 = vst [vmem:[#allocation31_spill] sm:$0xff] %v6492_v4  ;;  %2000 = vmax.xlane.f32.xlu1 %v6492_v4  ;;  %1992 = vmax.xlane.f32.xlu2 %v6495_v25  ;;  %v1962_v33 = vrot.slane %v1949_v21, 4  ;;  %v1937_v45 = vperm.slane %v1931_v39, %v6406_v55 }
 0x3c9   : > { %7204 = vst [vmem:[#allocation32_spill] sm:$0xff] %v6495_v25  ;;  %v6502_v49 = vsel %vm1746_vm6, %v1966_v26, %v1929_v56  ;;  %v1958_v35 = vrot.slane %v1941_v28, 4  ;;  %v6517_v43 = vsel %vm1746_vm6, %v1941_v28, %v1960_v42 }
 0x3ca   : > { %7205 = vst [vmem:[#allocation33_spill] sm:$0xff] %v6502_v49  ;;  %1996 = vmax.xlane.f32.xlu0 %v6502_v49  ;;  %v6509_v40 = vsel %vm1746_vm6, %v1962_v33, %v1925_v5  ;;  %v1954_v52 = vrot.slane %v1937_v45, 4  ;;  %v6523_v53 = vsel %vm1746_vm6, %v1937_v45, %v1956_v50 }
 0x3cb   : > { %v6512_v41 = vsel %vm1746_vm6, %v1958_v35, %v1917_v34 }
 0x3cc   : > { %v6527_v51 = vsel %vm1746_vm6, %v1954_v52, %v1913_v44 }
 0x3d0   : > { %1988 = vmax.xlane.f32.xlu1 %v6509_v40  ;;  %1980 = vmax.xlane.f32.xlu2 %v6512_v41 }
 0x3d2   : > { %1984 = vmax.xlane.f32.xlu0 %v6517_v43 }
 0x3d8   : > { %1976 = vmax.xlane.f32.xlu1 %v6523_v53 }
 0x3da   : > { %1972 = vmax.xlane.f32.xlu0 %v6527_v51 }
 0x40a   : > { %v6530_v37 = vpop.xlane.xlu2 %1998  ;;  %v6534_v54 = vpop.xlane.xlu0 %1990 }
 0x40b   : > { %7206 = vst [vmem:[#allocation34_spill] sm:$0xff] %v6530_v37  ;;  %vm2160_vm7 = vcmp.eq.f32.partialorder %v6428_v29, %v6530_v37  ;;  %vm2156_vm8 = vcmp.eq.f32.partialorder %v6434_v31, %v6534_v54 }
 0x40c   : > { %v6537_v57 = vsel %vm2160_vm7, %v6348_v48, 128  ;;  %v6542_v58 = vsel %vm2156_vm8, %v6348_v48, 128  ;;  %v6548_v62 = vpop.xlane.xlu1 %1982 }
 0x40d   : > { %v2375_v59 = vshra.s32 %v6537_v57, 16  ;;  %v2319_v60 = vshra.s32 %v6542_v58, 16  ;;  %vm2152_vm11 = vcmp.eq.f32.partialorder %v6439_v38, %v6548_v62  ;;  %v2374_v16 = vand.u32 65535, %v6537_v57 }
 0x40e   : > { %v6575_v7 = vsel %vm2152_vm11, %v6348_v48, 128 }
 0x40f   : > { %v6546_v61 = vcvt.s32.f32 %v2375_v59  ;;  %v6550_v63 = vcvt.s32.f32 %v2319_v60  ;;  %v2263_v13 = vshra.s32 %v6575_v7, 16 }
 0x411   : > { %2378 = vmin.xlane.f32.xlu0 %v6546_v61  ;;  %2322 = vmin.xlane.f32.xlu1 %v6550_v63  ;;  %v6594_v17 = vcvt.s32.f32 %v2263_v13 }
 0x412   : > { %v6554_v1 = vpop.xlane.xlu2 %1994  ;;  %v6558_v2 = vpop.xlane.xlu0 %1978 }
 0x413   : > { %7207 = vst [vmem:[#allocation35_spill] sm:$0xff] %v6554_v1  ;;  %vm2158_vm9 = vcmp.eq.f32.partialorder %v6446_v46, %v6554_v1  ;;  %vm2150_vm10 = vcmp.eq.f32.partialorder %v6450_v47, %v6558_v2 }
 0x414   : > { %v6561_v14 = vsel %vm2158_vm9, %v6348_v48, 128  ;;  %v6568_v3 = vsel %vm2150_vm10, %v6348_v48, 128  ;;  %v6580_v11 = vpop.xlane.xlu1 %1970 }
 0x415   : > { %v2347_v56 = vshra.s32 %v6561_v14, 16  ;;  %v2235_v5 = vshra.s32 %v6568_v3, 16  ;;  %vm2146_vm13 = vcmp.eq.f32.partialorder %v6455_v20, %v6580_v11 }
 0x416   : > { %v6599_v19 = vsel %vm2146_vm13, %v6348_v48, 128 }
 0x417   : > { %v6572_v6 = vcvt.s32.f32 %v2347_v56  ;;  %v6577_v10 = vcvt.s32.f32 %v2235_v5  ;;  %v2179_v22 = vshra.s32 %v6599_v19, 16 }
 0x419   : > { %2350 = vmin.xlane.f32.xlu2 %v6572_v6  ;;  %2238 = vmin.xlane.f32.xlu1 %v6577_v10  ;;  %v6612_v26 = vcvt.s32.f32 %v2179_v22 }
 0x41a   : > { %v6583_v12 = vpop.xlane.xlu2 %1986 }
 0x41b   : > { %vm2154_vm12 = vcmp.eq.f32.partialorder %v6459_v0, %v6583_v12 }
 0x41c   : > { %v6589_v9 = vsel %vm2154_vm12, %v6348_v48, 128 }
 0x41d   : > { %v2291_v15 = vshra.s32 %v6589_v9, 16 }
 0x41f   : > { %v6596_v18 = vcvt.s32.f32 %v2291_v15 }
 0x421   : > { %2266 = vmin.xlane.f32.xlu2 %v6594_v17  ;;  %2294 = vmin.xlane.f32.xlu0 %v6596_v18 }
 0x422   : > { %v6603_v21 = vpop.xlane.xlu2 %1974 }
 0x423   : > { %vm2148_vm14 = vcmp.eq.f32.partialorder %v6463_v8, %v6603_v21 }
 0x424   : > { %v6609_v23 = vsel %vm2148_vm14, %v6348_v48, 128 }
 0x425   : > { %v2207_v24 = vshra.s32 %v6609_v23, 16 }
 0x427   : > { %v6614_v27 = vcvt.s32.f32 %v2207_v24 }
 0x429   : > { %2182 = vmin.xlane.f32.xlu2 %v6612_v26  ;;  %2210 = vmin.xlane.f32.xlu0 %v6614_v27 }
 0x43b   : > { %v6618_v28 = vpop.xlane.xlu1 %2000  ;;  %v6620_v30 = vpop.xlane.xlu2 %1992 }
 0x43c   : > { %7208 = vst [vmem:[#allocation36_spill] sm:$0xff] %v6618_v28  ;;  %vm2161_vm15 = vcmp.eq.f32.partialorder %v6492_v4, %v6618_v28  ;;  %vm2157_vm0 = vcmp.eq.f32.partialorder %v6495_v25, %v6620_v30  ;;  %v2376_v28 = vcvt.s32.f32 %v2374_v16 }
 0x43d   : > { %7209 = vst [vmem:[#allocation37_spill] sm:$0xff] %v6620_v30  ;;  %v6627_v32 = vsel %vm2161_vm15, %v6348_v48, 128  ;;  %v6630_v33 = vsel %vm2157_vm0, %v6348_v48, 128  ;;  %v6632_v34 = vpop.xlane.xlu0 %1996 }
 0x43e   : > { %7210 = vst [vmem:[#allocation38_spill] sm:$0xff] %v6632_v34  ;;  %vm2159_vm1 = vcmp.eq.f32.partialorder %v6502_v49, %v6632_v34  ;;  %v2389_v36 = vshra.s32 %v6627_v32, 16  ;;  %v2333_v39 = vshra.s32 %v6630_v33, 16 }
 0x43f   : > { %v6637_v35 = vsel %vm2159_vm1, %v6348_v48, 128 }
 0x440   : > { %v2361_v42 = vshra.s32 %v6637_v35, 16  ;;  %v6642_v44 = vcvt.s32.f32 %v2389_v36  ;;  %v6644_v45 = vcvt.s32.f32 %v2333_v39 }
 0x442   : > { %v6646_v50 = vcvt.s32.f32 %v2361_v42  ;;  %2392 = vmin.xlane.f32.xlu2 %v6642_v44  ;;  %2336 = vmin.xlane.f32.xlu0 %v6644_v45 }
 0x443   : > { %v6650_v52 = vpop.xlane.xlu1 %1988  ;;  %v6652_v59 = vpop.xlane.xlu2 %1980 }
 0x444   : > { %vm2155_vm2 = vcmp.eq.f32.partialorder %v6509_v40, %v6650_v52  ;;  %vm2151_vm3 = vcmp.eq.f32.partialorder %v6512_v41, %v6652_v59  ;;  %2364 = vmin.xlane.f32.xlu1 %v6646_v50 }
 0x445   : > { %v6660_v60 = vsel %vm2155_vm2, %v6348_v48, 128  ;;  %v6663_v56 = vsel %vm2151_vm3, %v6348_v48, 128  ;;  %v6665_v5 = vpop.xlane.xlu0 %1984 }
 0x446   : > { %vm2153_vm4 = vcmp.eq.f32.partialorder %v6517_v43, %v6665_v5  ;;  %v2305_v15 = vshra.s32 %v6660_v60, 16  ;;  %v2249_v22 = vshra.s32 %v6663_v56, 16 }
 0x447   : > { %v6670_v13 = vsel %vm2153_vm4, %v6348_v48, 128 }
 0x448   : > { %v2277_v24 = vshra.s32 %v6670_v13, 16  ;;  %v6675_v36 = vcvt.s32.f32 %v2305_v15  ;;  %v6677_v39 = vcvt.s32.f32 %v2249_v22 }
 0x44a   : > { %v6679_v42 = vcvt.s32.f32 %v2277_v24  ;;  %2308 = vmin.xlane.f32.xlu2 %v6675_v36  ;;  %2252 = vmin.xlane.f32.xlu0 %v6677_v39 }
 0x44b   : > { %v6683_v29 = vpop.xlane.xlu1 %1976 }
 0x44c   : > { %vm2149_vm5 = vcmp.eq.f32.partialorder %v6523_v53, %v6683_v29  ;;  %2280 = vmin.xlane.f32.xlu1 %v6679_v42 }
 0x44d   : > { %v6689_v37 = vsel %vm2149_vm5, %v6348_v48, 128  ;;  %v6691_v15 = vpop.xlane.xlu0 %1972 }
 0x44e   : > { %vm2147_vm7 = vcmp.eq.f32.partialorder %v6527_v51, %v6691_v15  ;;  %v2221_v22 = vshra.s32 %v6689_v37, 16 }
 0x44f   : > { %v6697_v24 = vsel %vm2147_vm7, %v6348_v48, 128  ;;  %v2346_v48 = vand.u32 65535, %v6561_v14  ;;  %v2262_v14 = vand.u32 65535, %v6575_v7 }
 0x450   : > { %v6699_v25 = vcvt.s32.f32 %v2221_v22  ;;  %v2193_v30 = vshra.s32 %v6697_v24, 16 }
 0x451   : > { %v2348_v49 = vcvt.s32.f32 %v2346_v48 }
 0x452   : > { %v6702_v55 = vcvt.s32.f32 %v2193_v30  ;;  %2224 = vmin.xlane.f32.xlu2 %v6699_v25  ;;  %v2234_v30 = vand.u32 65535, %v6568_v3  ;;  %v2290_v3 = vand.u32 65535, %v6589_v9 }
 0x454   : > { %2196 = vmin.xlane.f32.xlu1 %v6702_v55  ;;  %v2236_v57 = vcvt.s32.f32 %v2234_v30  ;;  %v2292_v30 = vcvt.s32.f32 %v2290_v3 }
 0x484   : > { %v6707_v4 = vpop.xlane.xlu0 %2378  ;;  %v6709_v46 = vpop.xlane.xlu1 %2322 }
 0x485   : > { %vm2380_vm8 = vcmp.eq.f32.partialorder %v6546_v61, %v6707_v4  ;;  %vm2324_vm11 = vcmp.eq.f32.partialorder %v6550_v63, %v6709_v46 }
 0x486   : > { %v2381_v22 = vsel %vm2380_vm8, %v2376_v28, inf  ;;  %v2318_v28 = vand.u32 65535, %v6542_v58  ;;  %v2178_v58 = vand.u32 65535, %v6599_v19  ;;  %v2388_v19 = vand.u32 65535, %v6627_v32 }
 0x487   : > { %2382 = vmin.xlane.f32.xlu1 %v2381_v22  ;;  %v2304_v32 = vand.u32 65535, %v6660_v60 }
 0x48c   : > { %v6715_v1 = vpop.xlane.xlu2 %2350  ;;  %v6717_v34 = vpop.xlane.xlu1 %2238 }
 0x48d   : > { %vm2352_vm9 = vcmp.eq.f32.partialorder %v6572_v6, %v6715_v1  ;;  %vm2240_vm10 = vcmp.eq.f32.partialorder %v6577_v10, %v6717_v34  ;;  %v2264_v6 = vcvt.s32.f32 %v2262_v14  ;;  %v2320_v10 = vcvt.s32.f32 %v2318_v28 }
 0x48e   : > { %v2353_v16 = vsel %vm2352_vm9, %v2348_v49, inf  ;;  %v2241_v61 = vsel %vm2240_vm10, %v2236_v57, inf  ;;  %v2206_v57 = vand.u32 65535, %v6609_v23  ;;  %v2360_v23 = vand.u32 65535, %v6637_v35 }
 0x48f   : > { %2354 = vmin.xlane.f32.xlu0 %v2353_v16  ;;  %2242 = vmin.xlane.f32.xlu2 %v2241_v61  ;;  %v2325_v9 = vsel %vm2324_vm11, %v2320_v10, inf  ;;  %v2180_v61 = vcvt.s32.f32 %v2178_v58  ;;  %v2248_v35 = vand.u32 65535, %v6663_v56  ;;  %v2306_v58 = vcvt.s32.f32 %v2304_v32 }
 0x490   : > { %v2208_v14 = vcvt.s32.f32 %v2206_v57  ;;  %v2004_v56 = vsub.f32 %v6463_v8, %v6603_v21 }
 0x494   : > { %v6726_v48 = vpop.xlane.xlu2 %2266  ;;  %v6728_v22 = vpop.xlane.xlu0 %2294 }
 0x495   : > { %vm2268_vm12 = vcmp.eq.f32.partialorder %v6594_v17, %v6726_v48  ;;  %vm2296_vm13 = vcmp.eq.f32.partialorder %v6596_v18, %v6728_v22 }
 0x496   : > { %v2269_v49 = vsel %vm2268_vm12, %v2264_v6, inf  ;;  %v2297_v7 = vsel %vm2296_vm13, %v2292_v30, inf  ;;  %v2390_v6 = vcvt.s32.f32 %v2388_v19 }
 0x497   : > { %2270 = vmin.xlane.f32.xlu0 %v2269_v49  ;;  %2298 = vmin.xlane.f32.xlu1 %v2297_v7  ;;  %v2276_v49 = vand.u32 65535, %v6670_v13 }
 0x498   : > { %2326 = vmin.xlane.f32.xlu2 %v2325_v9 }
 0x49c   : > { %v6738_v63 = vpop.xlane.xlu2 %2182  ;;  %v6740_v16 = vpop.xlane.xlu0 %2210 }
 0x49d   : > { %vm2184_vm14 = vcmp.eq.f32.partialorder %v6612_v26, %v6738_v63  ;;  %vm2212_vm15 = vcmp.eq.f32.partialorder %v6614_v27, %v6740_v16  ;;  %v2362_v26 = vcvt.s32.f32 %v2360_v23 }
 0x49e   : > { %v2185_v17 = vsel %vm2184_vm14, %v2180_v61, inf  ;;  %v2213_v18 = vsel %vm2212_vm15, %v2208_v14, inf  ;;  %v2003_v14 = vsub.f32 %v6527_v51, %v6691_v15 }
 0x49f   : > { %2186 = vmin.xlane.f32.xlu0 %v2185_v17  ;;  %2214 = vmin.xlane.f32.xlu1 %v2213_v18  ;;  %v2002_v17 = vsub.f32 %v6455_v20, %v6580_v11  ;;  %v2192_v18 = vand.u32 65535, %v6697_v24  ;;  %v2006_v11 = vsub.f32 %v6450_v47, %v6558_v2  ;;  %v2007_v24 = vsub.f32 %v6512_v41, %v6652_v59 }
 0x4a0   : > { %v2020_v8 = vmul.f32 1.442695, %v2003_v14  ;;  %v2010_v41 = vsub.f32 %v6459_v0, %v6583_v12  ;;  %v2009_v59 = vsub.f32 %v6517_v43, %v6665_v5  ;;  %v5412_v0 = vld [vmem:[#allocation10 + $0xb0] sm:$0xff]  ;;  %v5395_v12 = vld [vmem:[#allocation10 + $0x28] sm:$0xff] }
 0x4a1   : > { %v2018_v51 = vmul.f32 1.442695, %v2002_v17  ;;  %v5411_v5 = vld [vmem:[#allocation10 + $0xa8] sm:$0xff]  ;;  %v2011_v17 = vsub.f32 %v6509_v40, %v6650_v52  ;;  %v7211_v40 = vld [vmem:[#allocation38_spill] sm:$0xff] }
 0x4a2   : > { %v7212_v52 = vld [vmem:[#allocation33_spill] sm:$0xff] }
 0x4b5   : > { %v6748_v3 = vpop.xlane.xlu2 %2392  ;;  %v6750_v28 = vpop.xlane.xlu0 %2336 }
 0x4b6   : > { %vm2394_vm0 = vcmp.eq.f32.partialorder %v6642_v44, %v6748_v3  ;;  %v2250_v44 = vcvt.s32.f32 %v2248_v35  ;;  %vm2338_vm5 = vcmp.eq.f32.partialorder %v6644_v45, %v6750_v28  ;;  %v5421_v35 = vld [vmem:[#allocation10 + $0xf8] sm:$0xff] }
 0x4b7   : > { %v6752_v30 = vpop.xlane.xlu1 %2364  ;;  %v2395_v27 = vsel %vm2394_vm0, %v2390_v6, inf  ;;  %v5397_v6 = vld [vmem:[#allocation10 + $0x38] sm:$0xff]  ;;  %3706 = vmatpush.bf16.msrb.mxu3 %v5421_v35  ;;  %v7215_v35 = vld [vmem:[#allocation36_spill] sm:$0xff] }
 0x4b8   : > { %vm2366_vm1 = vcmp.eq.f32.partialorder %v6646_v50, %v6752_v30  ;;  %2396 = vmin.xlane.f32.xlu0 %v2395_v27  ;;  %v2278_v50 = vcvt.s32.f32 %v2276_v49  ;;  %3667 = vmatpush.bf16.msrb.mxu0 %v5397_v6  ;;  %v2028_v27 = vmul.f32 1.442695, %v2007_v24  ;;  %v5404_v49 = vld [vmem:[#allocation10 + $0x70] sm:$0xff]  ;;  %v5409_v24 = vld [vmem:[#allocation10 + $0x98] sm:$0xff] }
 0x4b9   : > { %v2367_v10 = vsel %vm2366_vm1, %v2362_v26, inf  ;;  %v2005_v26 = vsub.f32 %v6523_v53, %v6683_v29  ;;  %v5413_v29 = vld [vmem:[#allocation10 + $0xb8] sm:$0xff]  ;;  %v5396_v53 = vld [vmem:[#allocation10 + $0x30] sm:$0xff] }
 0x4ba   : > { %2368 = vmin.xlane.f32.xlu2 %v2367_v10  ;;  %3693 = vmatpush.bf16.msrb.mxu2 %v5413_v29  ;;  %v5392_v6 = vld [vmem:[#allocation10 + $0x10] sm:$0xff] }
 0x4bb   : > { %v2024_v2 = vmul.f32 1.442695, %v2005_v26  ;;  %v5400_v26 = vld [vmem:[#allocation10 + $0x50] sm:$0xff] }
 0x4bc   : > { %3668 = vmatpush.bf16.msrb.mxu0 %v5396_v53  ;;  %v5416_v29 = vld [vmem:[#allocation10 + $0xd0] sm:$0xff] }
 0x4bd   : > { %v6761_v7 = vpop.xlane.xlu2 %2308  ;;  %v6763_v9 = vpop.xlane.xlu0 %2252 }
 0x4be   : > { %vm2310_vm2 = vcmp.eq.f32.partialorder %v6675_v36, %v6761_v7  ;;  %vm2254_vm3 = vcmp.eq.f32.partialorder %v6677_v39, %v6763_v9  ;;  %v2220_v36 = vand.u32 65535, %v6689_v37  ;;  %v2332_v39 = vand.u32 65535, %v6630_v33  ;;  %3694 = vmatpush.bf16.msrb.mxu2 %v5412_v0  ;;  %v5399_v0 = vld [vmem:[#allocation10 + $0x48] sm:$0xff] }
 0x4bf   : > { %v6765_v57 = vpop.xlane.xlu1 %2280  ;;  %v2311_v60 = vsel %vm2310_vm2, %v2306_v58, inf  ;;  %v2255_v61 = vsel %vm2254_vm3, %v2250_v44, inf  ;;  %v2194_v37 = vcvt.s32.f32 %v2192_v18  ;;  %v2008_v58 = vsub.f32 %v6439_v38, %v6548_v62  ;;  %v5420_v44 = vld [vmem:[#allocation10 + $0xf0] sm:$0xff]  ;;  %v5410_v18 = vld [vmem:[#allocation10 + $0xa0] sm:$0xff] }
 0x4c0   : > { %vm2282_vm4 = vcmp.eq.f32.partialorder %v6679_v42, %v6765_v57  ;;  %2312 = vmin.xlane.f32.xlu0 %v2311_v60  ;;  %2256 = vmin.xlane.f32.xlu1 %v2255_v61  ;;  %v2022_v42 = vmul.f32 1.442695, %v2004_v56  ;;  %v2222_v19 = vcvt.s32.f32 %v2220_v36  ;;  %v2334_v23 = vcvt.s32.f32 %v2332_v39  ;;  %v5419_v36 = vld [vmem:[#allocation10 + $0xe8] sm:$0xff]  ;;  %v5402_v39 = vld [vmem:[#allocation10 + $0x60] sm:$0xff] }
 0x4c1   : > { %v2283_v13 = vsel %vm2282_vm4, %v2278_v50, inf  ;;  %v5403_v50 = vld [vmem:[#allocation10 + $0x68] sm:$0xff]  ;;  %v2034_v60 = vmul.f32 1.442695, %v2010_v41  ;;  %v2032_v61 = vmul.f32 1.442695, %v2009_v59  ;;  %3669 = vmatpush.bf16.msrb.mxu0 %v5395_v12  ;;  %3707 = vmatpush.bf16.msrb.mxu3 %v5420_v44  ;;  %v2012_v62 = vsub.f32 %v6434_v31, %v6534_v54 }
 0x4c2   : > { %2284 = vmin.xlane.f32.xlu2 %v2283_v13  ;;  %v2339_v20 = vsel %vm2338_vm5, %v2334_v23, inf  ;;  %5693 = vpow2.f32 %v2022_v42  ;;  %v2030_v43 = vmul.f32 1.442695, %v2008_v58  ;;  %v5394_v13 = vld [vmem:[#allocation10 + $0x20] sm:$0xff]  ;;  %3695 = vmatpush.bf16.msrb.mxu2 %v5411_v5  ;;  %v5393_v42 = vld [vmem:[#allocation10 + $0x18] sm:$0xff]  ;;  %v5391_v41 = vld [vmem:[#allocation10 + $0x8] sm:$0xff] }
 0x4c3   : > { %5695 = vpow2.f32 %v2020_v8  ;;  %v5418_v8 = vld [vmem:[#allocation10 + $0xe0] sm:$0xff]  ;;  %v2036_v31 = vmul.f32 1.442695, %v2011_v17  ;;  %v5407_v12 = vld [vmem:[#allocation10 + $0x88] sm:$0xff] }
 0x4c4   : > { %5697 = vpow2.f32 %v2018_v51  ;;  %v5390_v44 = vld [vmem:[#allocation10] sm:$0xff] }
 0x4c5   : > { %v6784_v21 = vpop.xlane.xlu2 %2224  ;;  %3670 = vmatpush.bf16.msrb.mxu0 %v5394_v13  ;;  %3708 = vmatpush.bf16.msrb.mxu3 %v5419_v36  ;;  %v5406_v13 = vld [vmem:[#allocation10 + $0x80] sm:$0xff] }
 0x4c6   : > { %vm2226_vm7 = vcmp.eq.f32.partialorder %v6699_v25, %v6784_v21  ;;  %v5405_v25 = vld [vmem:[#allocation10 + $0x78] sm:$0xff]  ;;  %3696 = vmatpush.bf16.msrb.mxu2 %v5410_v18  ;;  %v5414_v17 = vld [vmem:[#allocation10 + $0xc0] sm:$0xff]  ;;  %v5428_v18 = vld [vmem:[#allocation10 + $0x130] sm:$0xff] }
 0x4c7   : > { %v6786_v15 = vpop.xlane.xlu1 %2196  ;;  %v2227_v33 = vsel %vm2226_vm7, %v2222_v19, inf  ;;  %3680 = vmatpush.bf16.msrb.mxu1 %v5405_v25  ;;  %v2038_v19 = vmul.f32 1.442695, %v2012_v62  ;;  %v5417_v25 = vld [vmem:[#allocation10 + $0xd8] sm:$0xff] }
 0x4c8   : > { %vm2198_vm8 = vcmp.eq.f32.partialorder %v6702_v55, %v6786_v15  ;;  %2228 = vmin.xlane.f32.xlu0 %v2227_v33  ;;  %2340 = vmin.xlane.f32.xlu1 %v2339_v20  ;;  %v2026_v55 = vmul.f32 1.442695, %v2006_v11  ;;  %v6798_v47 = vpop.eup %5693  ;;  %v7213_v33 = vld [vmem:[#allocation35_spill] sm:$0xff]  ;;  %v7214_v20 = vld [vmem:[#allocation30_spill] sm:$0xff] }
 0x4c9   : > { %v2199_v45 = vsel %vm2198_vm8, %v2194_v37, inf  ;;  %v6800_v10 = vpop.eup %5695  ;;  %3671 = vmatpush.bf16.msrb.mxu0 %v5393_v42  ;;  %3709 = vmatpush.bf16.msrb.mxu3 %v5418_v8  ;;  %v2015_v37 = vsub.f32 %v7212_v52, %v7211_v40  ;;  %v2014_v11 = vsub.f32 %v7214_v20, %v7213_v33  ;;  %v5437_v62 = vld [vmem:[#allocation10 + $0x178] sm:$0xff]  ;;  %v5436_v8 = vld [vmem:[#allocation10 + $0x170] sm:$0xff]  ;;  %v5435_v52 = vld [vmem:[#allocation10 + $0x168] sm:$0xff] }
 0x4ca   : > { %2200 = vmin.xlane.f32.xlu2 %v2199_v45  ;;  %v6802_v32 = vpop.eup %5697  ;;  %5699 = vpow2.f32 %v2026_v55  ;;  %v5401_v45 = vld [vmem:[#allocation10 + $0x58] sm:$0xff]  ;;  %3697 = vmatpush.bf16.msrb.mxu2 %v5409_v24  ;;  %v5452_v40 = vld [vmem:[#allocation10 + $0x1f0] sm:$0xff]  ;;  %v5426_v33 = vld [vmem:[#allocation10 + $0x120] sm:$0xff] }
 0x4cb   : > { %5701 = vpow2.f32 %v2028_v27  ;;  %3681 = vmatpush.bf16.msrb.mxu1 %v5404_v49  ;;  %v2044_v55 = vmul.f32 1.442695, %v2015_v37  ;;  %v5408_v27 = vld [vmem:[#allocation10 + $0x90] sm:$0xff]  ;;  %v7216_v49 = vld [vmem:[#allocation31_spill] sm:$0xff]  ;;  %v5443_v37 = vld [vmem:[#allocation10 + $0x1a8] sm:$0xff] }
 0x4cc   : > { %5703 = vpow2.f32 %v2024_v2  ;;  %v2042_v2 = vmul.f32 1.442695, %v2014_v11  ;;  %v2017_v58 = vsub.f32 %v7216_v49, %v7215_v35  ;;  %v5453_v42 = vld [vmem:[#allocation10 + $0x1f8] sm:$0xff]  ;;  %v5451_v11 = vld [vmem:[#allocation10 + $0x1e8] sm:$0xff]  ;;  %v2357_v35 = vcvt.f32.s32 %v6715_v1 }
 0x4cd   : > { %5705 = vpow2.f32 %v2034_v60  ;;  %3672 = vmatpush.bf16.msrb.mxu0 %v5392_v6  ;;  %3710 = vmatpush.bf16.msrb.mxu3 %v5417_v25  ;;  %v5429_v60 = vld [vmem:[#allocation10 + $0x138] sm:$0xff]  ;;  %v5442_v6 = vld [vmem:[#allocation10 + $0x1a0] sm:$0xff]  ;;  %v2385_v25 = vcvt.f32.s32 %v6707_v4  ;;  %v5440_v4 = vld [vmem:[#allocation10 + $0x190] sm:$0xff] }
 0x4ce   : > { %5707 = vpow2.f32 %v2032_v61  ;;  %3698 = vmatpush.bf16.msrb.mxu2 %v5408_v27  ;;  %v2048_v61 = vmul.f32 1.442695, %v2017_v58  ;;  %v5449_v49 = vld [vmem:[#allocation10 + $0x1d8] sm:$0xff] }
 0x4cf   : > { %3682 = vmatpush.bf16.msrb.mxu1 %v5403_v50  ;;  %5709 = vpow2.f32 %v2030_v43  ;;  %v5415_v50 = vld [vmem:[#allocation10 + $0xc8] sm:$0xff]  ;;  %v5398_v43 = vld [vmem:[#allocation10 + $0x40] sm:$0xff]  ;;  %v2386_v58 = vshll.u32 %v2385_v25, 16 }
 0x4d0   : > { %2052 = vadd.xlane.f32.xlu0 %v6800_v10  ;;  %2054 = vadd.xlane.f32.xlu1 %v6798_v47  ;;  %v6813_v56 = vpop.eup %5699  ;;  %5711 = vpow2.f32 %v2038_v19  ;;  %v5444_v19 = vld [vmem:[#allocation10 + $0x1b0] sm:$0xff] }
 0x4d1   : > { %v6815_v14 = vpop.eup %5701  ;;  %5713 = vpow2.f32 %v2036_v31  ;;  %3673 = vmatpush.bf16.msrb.mxu0 %v5391_v41  ;;  %3711 = vmatpush.bf16.msrb.mxu3 %v5416_v29  ;;  %v5427_v31 = vld [vmem:[#allocation10 + $0x128] sm:$0xff]  ;;  %v5441_v41 = vld [vmem:[#allocation10 + $0x198] sm:$0xff]  ;;  %v5424_v29 = vld [vmem:[#allocation10 + $0x110] sm:$0xff] }
 0x4d2   : > { %2050 = vadd.xlane.f32.xlu2 %v6802_v32  ;;  %v6817_v38 = vpop.eup %5703  ;;  %5715 = vpow2.f32 %v2044_v55  ;;  %3699 = vmatpush.bf16.msrb.mxu2 %v5407_v12  ;;  %v5450_v55 = vld [vmem:[#allocation10 + $0x1e0] sm:$0xff]  ;;  %v5432_v12 = vld [vmem:[#allocation10 + $0x150] sm:$0xff] }
 0x4d3   : > { %3683 = vmatpush.bf16.msrb.mxu1 %v5402_v39  ;;  %v6826_v23 = vpop.eup %5705  ;;  %5717 = vpow2.f32 %v2042_v2  ;;  %v5445_v39 = vld [vmem:[#allocation10 + $0x1b8] sm:$0xff] }
 0x4d4   : > { %v6828_v54 = vpop.eup %5707  ;;  %5719 = vpow2.f32 %v2048_v61  ;;  %v5433_v2 = vld [vmem:[#allocation10 + $0x158] sm:$0xff]  ;;  %v2358_v61 = vshll.u32 %v2357_v35, 16 }
 0x4d5   : > { %v6830_v51 = vpop.eup %5709  ;;  %3674 = vmatpush.bf16.msrb.mxu0 %v5390_v44  ;;  %3712 = vmatpush.bf16.msrb.mxu3 %v5415_v50 }
 0x4d6   : > { %v6839_v53 = vpop.eup %5711  ;;  %3700 = vmatpush.bf16.msrb.mxu2 %v5406_v13 }
 0x4d7   : > { %3684 = vmatpush.bf16.msrb.mxu1 %v5401_v45  ;;  %v6841_v59 = vpop.eup %5713  ;;  %v5434_v45 = vld [vmem:[#allocation10 + $0x160] sm:$0xff] }
 0x4d8   : > { %2058 = vadd.xlane.f32.xlu0 %v6813_v56  ;;  %2060 = vadd.xlane.f32.xlu1 %v6815_v14  ;;  %v6847_v5 = vpop.eup %5715 }
 0x4d9   : > { %3719 = vmatpush.bf16.msra.mxu0 %v5429_v60  ;;  %v6849_v36 = vpop.eup %5717  ;;  %3713 = vmatpush.bf16.msrb.mxu3 %v5414_v17  ;;  %v5423_v60 = vld [vmem:[#allocation10 + $0x108] sm:$0xff]  ;;  %v2273_v17 = vcvt.f32.s32 %v6726_v48  ;;  %v6127_v48 = vmov 0.0  }
 0x4da   : > { %2056 = vadd.xlane.f32.xlu2 %v6817_v38  ;;  %3745 = vmatpush.bf16.msra.mxu2 %v5445_v39  ;;  %v6853_v20 = vpop.eup %5719 }
 0x4db   : > { %3685 = vmatpush.bf16.msrb.mxu1 %v5400_v26  ;;  %v5425_v26 = vld [vmem:[#allocation10 + $0x118] sm:$0xff]  ;;  %v2274_v25 = vshll.u32 %v2273_v17, 16 }
 0x4dd   : > { %3720 = vmatpush.bf16.msra.mxu0 %v5428_v18  ;;  %3758 = vmatpush.bf16.msra.mxu3 %v5453_v42  ;;  %v5439_v42 = vld [vmem:[#allocation10 + $0x188] sm:$0xff] }
 0x4de   : > { %3746 = vmatpush.bf16.msra.mxu2 %v5444_v19  ;;  %v7217_v19 = vld [vmem:[#allocation26_spill] sm:$0xff] }
 0x4df   : > { %3686 = vmatpush.bf16.msrb.mxu1 %v5399_v0  ;;  %v2245_v0 = vcvt.f32.s32 %v6717_v34  ;;  %v5431_v34 = vld [vmem:[#allocation10 + $0x148] sm:$0xff] }
 0x4e0   : > { %2064 = vadd.xlane.f32.xlu0 %v6828_v54  ;;  %2066 = vadd.xlane.f32.xlu1 %v6826_v23 }
 0x4e1   : > { %3721 = vmatpush.bf16.msra.mxu0 %v5427_v31  ;;  %3759 = vmatpush.bf16.msra.mxu3 %v5452_v40  ;;  %v2246_v39 = vshll.u32 %v2245_v0, 16  ;;  %v5422_v40 = vld [vmem:[#allocation10 + $0x100] sm:$0xff] }
 0x4e2   : > { %2062 = vadd.xlane.f32.xlu2 %v6830_v51  ;;  %3747 = vmatpush.bf16.msra.mxu2 %v5443_v37  ;;  %v2329_v37 = vcvt.f32.s32 %v6709_v46 }
 0x4e3   : > { %3687 = vmatpush.bf16.msrb.mxu1 %v5398_v43 }
 0x4e5   : > { %3722 = vmatpush.bf16.msra.mxu0 %v5426_v33  ;;  %3760 = vmatpush.bf16.msra.mxu3 %v5451_v11 }
 0x4e6   : > { %3748 = vmatpush.bf16.msra.mxu2 %v5442_v6  ;;  %v5438_v6 = vld [vmem:[#allocation10 + $0x180] sm:$0xff] }
 0x4e7   : > { %3732 = vmatpush.bf16.msra.mxu1 %v5437_v62  ;;  %v5448_v62 = vld [vmem:[#allocation10 + $0x1d0] sm:$0xff] }
 0x4e8   : > { %2070 = vadd.xlane.f32.xlu0 %v6839_v53 }
 0x4e9   : > { %3723 = vmatpush.bf16.msra.mxu0 %v5425_v26  ;;  %3761 = vmatpush.bf16.msra.mxu3 %v5450_v55 }
 0x4ea   : > { %2068 = vadd.xlane.f32.xlu2 %v6841_v59  ;;  %3749 = vmatpush.bf16.msra.mxu2 %v5441_v41 }
 0x4eb   : > { %3733 = vmatpush.bf16.msra.mxu1 %v5436_v8  ;;  %v2301_v8 = vcvt.f32.s32 %v6728_v22 }
 0x4ed   : > { %3724 = vmatpush.bf16.msra.mxu0 %v5424_v29  ;;  %3762 = vmatpush.bf16.msra.mxu3 %v5449_v49  ;;  %v2302_v26 = vshll.u32 %v2301_v8, 16  ;;  %v2330_v49 = vshll.u32 %v2329_v37, 16 }
 0x4ee   : > { %3750 = vmatpush.bf16.msra.mxu2 %v5440_v4 }
 0x4ef   : > { %3734 = vmatpush.bf16.msra.mxu1 %v5435_v52  ;;  %v5447_v52 = vld [vmem:[#allocation10 + $0x1c8] sm:$0xff] }
 0x4f0   : > { %2076 = vadd.xlane.f32.xlu0 %v6847_v5 }
 0x4f1   : > { %3725 = vmatpush.bf16.msra.mxu0 %v5423_v60  ;;  %3763 = vmatpush.bf16.msra.mxu3 %v5448_v62  ;;  %v2189_v60 = vcvt.f32.s32 %v6738_v63 }
 0x4f2   : > { %2074 = vadd.xlane.f32.xlu2 %v6849_v36  ;;  %3751 = vmatpush.bf16.msra.mxu2 %v5439_v42 }
 0x4f3   : > { %3735 = vmatpush.bf16.msra.mxu1 %v5434_v45 }
 0x4f5   : > { %3726 = vmatpush.bf16.msra.mxu0 %v5422_v40  ;;  %3764 = vmatpush.bf16.msra.mxu3 %v5447_v52 }
 0x4f6   : > { %3752 = vmatpush.bf16.msra.mxu2 %v5438_v6 }
 0x4f7   : > { %3736 = vmatpush.bf16.msra.mxu1 %v5433_v2 }
 0x4fa   : > { %2080 = vadd.xlane.f32.xlu2 %v6853_v20  ;;  %v2383_v24 = vpop.xlane.xlu1 %2382 }
 0x4fb   : > { %v2384_v27 = vcvt.f32.s32 %v2383_v24  ;;  %3737 = vmatpush.bf16.msra.mxu1 %v5432_v12  ;;  %v5430_v24 = vld [vmem:[#allocation10 + $0x140] sm:$0xff] }
 0x4fd   : > { %v2387_v44 = vadd.s32 %v2386_v58, %v2384_v27 }
 0x4ff   : > { %vm2416_vm9 = vcmp.eq.s32.totalorder %v7217_v19, %v2387_v44  ;;  %3738 = vmatpush.bf16.msra.mxu1 %v5431_v34 }
 0x500   : > { %v4735_v11 = vsel %vm2416_vm9, 1.0, %v6127_v48 }
 0x501   : > { %v2464_v58 = vpack.c.bf16 %v4735_v11, %v4735_v11  ;;  %v7218_v11 = vld [vmem:[#allocation27_spill] sm:$0xff] }
 0x502   : > { %v2355_v50 = vpop.xlane.xlu0 %2354  ;;  %v2243_v43 = vpop.xlane.xlu2 %2242 }
 0x503   : > { %v2356_v13 = vcvt.f32.s32 %v2355_v50  ;;  %v2244_v1 = vcvt.f32.s32 %v2243_v43  ;;  %3739 = vmatpush.bf16.msra.mxu1 %v5430_v24  ;;  %v5446_v50 = vld [vmem:[#allocation10 + $0x1c0] sm:$0xff]  ;;  %v2217_v43 = vcvt.f32.s32 %v6740_v16  ;;  %v2501_v62 = vrot.slane %v2464_v58, 4 }
 0x504   : > { %3765 = vmatpush.bf16.msra.mxu3 %v5446_v50 }
 0x505   : > { %v2359_v18 = vadd.s32 %v2358_v61, %v2356_v13  ;;  %v2247_v31 = vadd.s32 %v2246_v39, %v2244_v1  ;;  %v2190_v1 = vshll.u32 %v2189_v60, 16  ;;  %v2218_v42 = vshll.u32 %v2217_v43, 16 }
 0x507   : > { %vm2414_vm10 = vcmp.eq.s32.totalorder %v7217_v19, %v2359_v18  ;;  %vm2406_vm11 = vcmp.eq.s32.totalorder %v7217_v19, %v2247_v31 }
 0x508   : > { %v4733_v33 = vsel %vm2414_vm10, 1.0, %v6127_v48  ;;  %v4725_v22 = vsel %vm2406_vm11, 1.0, %v6127_v48 }
 0x509   : > { %v2462_v45 = vpack.c.bf16 %v4733_v33, %v4733_v33  ;;  %v2454_v46 = vpack.c.bf16 %v4725_v22, %v4725_v22 }
 0x50a   : > { %v2299_v55 = vpop.xlane.xlu1 %2298  ;;  %v2271_v27 = vpop.xlane.xlu0 %2270 }
 0x50b   : > { %v2473_v2 = vrot.slane %v2462_v45, 4  ;;  %v2327_v41 = vpop.xlane.xlu2 %2326  ;;  %v2300_v29 = vcvt.f32.s32 %v2299_v55  ;;  %v2272_v35 = vcvt.f32.s32 %v2271_v27 }
 0x50c   : > { %v2328_v0 = vcvt.f32.s32 %v2327_v41 }
 0x50d   : > { %v2474_v12 = vsel %vm1746_vm6, %v2473_v2, %v2454_v46  ;;  %v2303_v4 = vadd.s32 %v2302_v26, %v2300_v29  ;;  %v2275_v44 = vadd.s32 %v2274_v25, %v2272_v35 }
 0x50e   : > { %v2331_v61 = vadd.s32 %v2330_v49, %v2328_v0  ;;  %v2478_v22 = vperm.slane %v2474_v12, %v7218_v11 }
 0x50f   : > { %vm2410_vm12 = vcmp.eq.s32.totalorder %v7217_v19, %v2303_v4  ;;  %vm2408_vm13 = vcmp.eq.s32.totalorder %v7217_v19, %v2275_v44  ;;  %v7219_v44 = vld [vmem:[#allocation28_spill] sm:$0xff] }
 0x510   : > { %vm2412_vm14 = vcmp.eq.s32.totalorder %v7217_v19, %v2331_v61  ;;  %v4727_v13 = vsel %vm2408_vm13, 1.0, %v6127_v48  ;;  %v4729_v18 = vsel %vm2410_vm12, 1.0, %v6127_v48  ;;  %v2479_v41 = vrot.slane %v2478_v22, 4  ;;  %v5461_v61 = vld [vmem:[#allocation10 + $0x238] sm:$0xff] }
 0x511   : > { %v2456_v39 = vpack.c.bf16 %v4727_v13, %v4727_v13  ;;  %v4731_v17 = vsel %vm2412_vm14, 1.0, %v6127_v48  ;;  %v2458_v52 = vpack.c.bf16 %v4729_v18, %v4729_v18  ;;  %v5469_v18 = vld [vmem:[#allocation10 + $0x278] sm:$0xff] }
 0x512   : > { %v2215_v63 = vpop.xlane.xlu1 %2214  ;;  %v2187_v34 = vpop.xlane.xlu0 %2186  ;;  %v2460_v40 = vpack.c.bf16 %v4731_v17, %v4731_v17 }
 0x513   : > { %v2502_v16 = vsel %vm1746_vm6, %v2501_v62, %v2456_v39  ;;  %v2216_v8 = vcvt.f32.s32 %v2215_v63  ;;  %v2188_v31 = vcvt.f32.s32 %v2187_v34  ;;  %v2466_v26 = vrot.slane %v2458_v52, 4  ;;  %v5460_v52 = vld [vmem:[#allocation10 + $0x230] sm:$0xff] }
 0x514   : > { %v2506_v45 = vperm.slane %v2502_v16, %v7218_v11  ;;  %v2495_v25 = vrot.slane %v2460_v40, 4  ;;  %v5477_v40 = vld [vmem:[#allocation10 + $0x2b8] sm:$0xff] }
 0x515   : > { %v2219_v37 = vadd.s32 %v2218_v42, %v2216_v8  ;;  %v2191_v33 = vadd.s32 %v2190_v1, %v2188_v31 }
 0x516   : > { %v2507_v29 = vrot.slane %v2506_v45, 4 }
 0x517   : > { %vm2404_vm15 = vcmp.eq.s32.totalorder %v7217_v19, %v2219_v37  ;;  %vm2402_vm0 = vcmp.eq.s32.totalorder %v7217_v19, %v2191_v33 }
 0x518   : > { %v4723_v24 = vsel %vm2404_vm15, 1.0, %v6127_v48  ;;  %v4721_v6 = vsel %vm2402_vm0, 1.0, %v6127_v48 }
 0x519   : > { %v2452_v55 = vpack.c.bf16 %v4723_v24, %v4723_v24  ;;  %v2450_v27 = vpack.c.bf16 %v4721_v6, %v4721_v6 }
 0x51b   : > { %v2496_v46 = vsel %vm1746_vm6, %v2495_v25, %v2452_v55  ;;  %v2468_v2 = vsel %vm1746_vm6, %v2466_v26, %v2450_v27  ;;  %v5485_v26 = vld [vmem:[#allocation10 + $0x2f8] sm:$0xff]  ;;  %v5468_v55 = vld [vmem:[#allocation10 + $0x270] sm:$0xff] }
 0x51c   : > { %v2500_v35 = vperm.slane %v2496_v46, %v7218_v11  ;;  %v2472_v49 = vperm.slane %v2468_v2, %v7218_v11  ;;  %v2399_v46 = vcvt.f32.s32 %v6748_v3 }
 0x51e   : > { %v2509_v58 = vrot.slane %v2500_v35, 4  ;;  %v2481_v0 = vrot.slane %v2472_v49, 4  ;;  %v2480_v12 = vsel %vm1746_vm6, %v2479_v41, %v2472_v49  ;;  %v2508_v4 = vsel %vm1746_vm6, %v2507_v29, %v2500_v35  ;;  %v5476_v49 = vld [vmem:[#allocation10 + $0x2b0] sm:$0xff] }
 0x51f   : > { %v2486_v50 = vperm.slane %v2480_v12, %v7219_v44  ;;  %v2514_v60 = vperm.slane %v2508_v4, %v7219_v44  ;;  %v2371_v35 = vcvt.f32.s32 %v6752_v30  ;;  %v5467_v30 = vld [vmem:[#allocation10 + $0x268] sm:$0xff] }
 0x520   : > { %v2482_v43 = vsel %vm1746_vm6, %v2478_v22, %v2481_v0  ;;  %v2510_v13 = vsel %vm1746_vm6, %v2506_v45, %v2509_v58  ;;  %v5459_v58 = vld [vmem:[#allocation10 + $0x228] sm:$0xff] }
 0x521   : > { %v2581_v62 = vpack.i.b16 %v2514_v60, %v2486_v50  ;;  %v2583_v39 = vshrl.u32 %v2486_v50, 16  ;;  %v2584_v1 = vshrl.u32 %v2514_v60, 16  ;;  %v2491_v17 = vrot.slane %v2486_v50, 4 }
 0x522   : > { %v2519_v63 = vrot.slane %v2514_v60, 4  ;;  %v6895_v34 = vperm.slane %v2482_v43, %v7219_v44  ;;  %v6898_v42 = vperm.slane %v2510_v13, %v7219_v44  ;;  %v5484_v60 = vld [vmem:[#allocation10 + $0x2f0] sm:$0xff] }
 0x523   : > { %3675 = vmatmul.bf16.vlgmr.msrb.gmra.mxu0 %v2581_v62  ;;  %v2585_v16 = vpack.i.b16 %v2584_v1, %v2583_v39  ;;  %v2492_v8 = vsel %vm1746_vm6, 0, %v2491_v17  ;;  %v2372_v39 = vshll.u32 %v2371_v35, 16  ;;  %v5475_v17 = vld [vmem:[#allocation10 + $0x2a8] sm:$0xff] }
 0x524   : > { %3771 = vmatpush.bf16.msrb.mxu0 %v5461_v61  ;;  %v2520_v31 = vsel %vm1746_vm6, 0, %v2519_v63  ;;  %v2591_v37 = vshrl.u32 %v2492_v8, 16  ;;  %v2597_v33 = vpack.i.b16 %v6898_v42, %v6895_v34  ;;  %v2599_v22 = vshrl.u32 %v6895_v34, 16 }
 0x525   : > { %3688 = vmatmul.bf16.vlgmr.msrb.gmra.mxu1 %v2585_v16  ;;  %v2589_v45 = vpack.i.b16 %v2520_v31, %v2492_v8  ;;  %v2592_v24 = vshrl.u32 %v2520_v31, 16  ;;  %v2600_v6 = vshrl.u32 %v6898_v42, 16  ;;  %v2493_v25 = vrot.slane %v6895_v34, 4  ;;  %v5483_v31 = vld [vmem:[#allocation10 + $0x2e8] sm:$0xff]  ;;  %v5481_v34 = vld [vmem:[#allocation10 + $0x2d8] sm:$0xff] }
 0x526   : > { %3784 = vmatpush.bf16.msrb.mxu1 %v5469_v18  ;;  %v2521_v27 = vrot.slane %v6898_v42, 4  ;;  %v2400_v61 = vshll.u32 %v2399_v46, 16  ;;  %v5458_v18 = vld [vmem:[#allocation10 + $0x220] sm:$0xff]  ;;  %v2315_v16 = vcvt.f32.s32 %v6761_v7  ;;  %v5464_v42 = vld [vmem:[#allocation10 + $0x250] sm:$0xff] }
 0x527   : > { %3701 = vmatmul.bf16.vlgmr.msrb.gmra.mxu2 %v2589_v45  ;;  %v2593_v2 = vpack.i.b16 %v2592_v24, %v2591_v37  ;;  %v6909_v41 = vpack.i.b16 %v2600_v6, %v2599_v22  ;;  %v6912_v29 = vsel %vm1746_vm6, 0, %v2493_v25  ;;  %v2287_v37 = vcvt.f32.s32 %v6765_v57  ;;  %v5474_v22 = vld [vmem:[#allocation10 + $0x2a0] sm:$0xff]  ;;  %v5457_v45 = vld [vmem:[#allocation10 + $0x218] sm:$0xff] }
 0x528   : > { %3797 = vmatpush.bf16.msrb.mxu2 %v5477_v40  ;;  %3772 = vmatpush.bf16.msrb.mxu0 %v5460_v52  ;;  %v6916_v0 = vsel %vm1746_vm6, 0, %v2521_v27  ;;  %v2607_v12 = vshrl.u32 %v6912_v29, 16  ;;  %v5466_v40 = vld [vmem:[#allocation10 + $0x260] sm:$0xff]  ;;  %v2259_v52 = vcvt.f32.s32 %v6763_v9  ;;  %v2316_v24 = vshll.u32 %v2315_v16, 16 }
 0x529   : > { %3714 = vmatmul.bf16.vlgmr.msrb.gmra.mxu3 %v2593_v2  ;;  %v2605_v3 = vpack.i.b16 %v6916_v0, %v6912_v29  ;;  %v2608_v4 = vshrl.u32 %v6916_v0, 16  ;;  %v5482_v25 = vld [vmem:[#allocation10 + $0x2e0] sm:$0xff]  ;;  %v2288_v2 = vshll.u32 %v2287_v37, 16 }
 0x52a   : > { %3810 = vmatpush.bf16.msrb.mxu3 %v5485_v26  ;;  %3785 = vmatpush.bf16.msrb.mxu1 %v5468_v55  ;;  %v5465_v26 = vld [vmem:[#allocation10 + $0x258] sm:$0xff]  ;;  %v2260_v55 = vshll.u32 %v2259_v52, 16 }
 0x52b   : > { %v2397_v50 = vpop.xlane.xlu0 %2396  ;;  %v6922_v62 = vpack.i.b16 %v2608_v4, %v2607_v12 }
 0x52c   : > { %v2398_v43 = vcvt.f32.s32 %v2397_v50  ;;  %3798 = vmatpush.bf16.msrb.mxu2 %v5476_v49  ;;  %3773 = vmatpush.bf16.msrb.mxu0 %v5459_v58  ;;  %v5473_v49 = vld [vmem:[#allocation10 + $0x298] sm:$0xff]  ;;  %v5456_v58 = vld [vmem:[#allocation10 + $0x210] sm:$0xff] }
 0x52d   : > { %v2369_v13 = vpop.xlane.xlu2 %2368 }
 0x52e   : > { %v2370_v1 = vcvt.f32.s32 %v2369_v13  ;;  %v2401_v63 = vadd.s32 %v2400_v61, %v2398_v43  ;;  %3811 = vmatpush.bf16.msrb.mxu3 %v5484_v60  ;;  %3786 = vmatpush.bf16.msrb.mxu1 %v5467_v30  ;;  %v2343_v60 = vcvt.f32.s32 %v6750_v28  ;;  %v2203_v43 = vcvt.f32.s32 %v6786_v15  ;;  %v5472_v28 = vld [vmem:[#allocation10 + $0x290] sm:$0xff] }
 0x530   : > { %v2373_v8 = vadd.s32 %v2372_v39, %v2370_v1  ;;  %vm2417_vm1 = vcmp.eq.s32.totalorder %v7217_v19, %v2401_v63  ;;  %3799 = vmatpush.bf16.msrb.mxu2 %v5475_v17  ;;  %3774 = vmatpush.bf16.msrb.mxu0 %v5458_v18  ;;  %v5455_v39 = vld [vmem:[#allocation10 + $0x208] sm:$0xff]  ;;  %v2344_v15 = vshll.u32 %v2343_v60, 16  ;;  %v5480_v18 = vld [vmem:[#allocation10 + $0x2d0] sm:$0xff]  ;;  %v2204_v37 = vshll.u32 %v2203_v43, 16  ;;  %v5509_v60 = vld [vmem:[#allocation10 + $0x3b8] sm:$0xff] }
 0x531   : > { %v4736_v9 = vsel %vm2417_vm1, 1.0, %v6127_v48  ;;  %v5463_v63 = vld [vmem:[#allocation10 + $0x248] sm:$0xff] }
 0x532   : > { %vm2415_vm2 = vcmp.eq.s32.totalorder %v7217_v19, %v2373_v8  ;;  %3812 = vmatpush.bf16.msrb.mxu3 %v5483_v31  ;;  %3787 = vmatpush.bf16.msrb.mxu1 %v5466_v40  ;;  %v2465_v30 = vpack.c.bf16 %v4736_v9, %v4736_v9 }
 0x533   : > { %v2257_v6 = vpop.xlane.xlu1 %2256  ;;  %v2313_v7 = vpop.xlane.xlu0 %2312  ;;  %3727 = vmatmul.bf16.vlgmr.msra.gmra.mxu0 %v2597_v33  ;;  %v4734_v12 = vsel %vm2415_vm2, 1.0, %v6127_v48  ;;  %v2231_v33 = vcvt.f32.s32 %v6784_v21 }
 0x534   : > { %v2258_v27 = vcvt.f32.s32 %v2257_v6  ;;  %v2314_v57 = vcvt.f32.s32 %v2313_v7  ;;  %3800 = vmatpush.bf16.msrb.mxu2 %v5474_v22  ;;  %3775 = vmatpush.bf16.msrb.mxu0 %v5457_v45  ;;  %v2463_v13 = vpack.c.bf16 %v4734_v12, %v4734_v12  ;;  %v2557_v1 = vrot.slane %v2465_v30, 4  ;;  %v5454_v6 = vld [vmem:[#allocation10 + $0x200] sm:$0xff]  ;;  %v5492_v30 = vld [vmem:[#allocation10 + $0x330] sm:$0xff] }
 0x535   : > { %v2285_v46 = vpop.xlane.xlu2 %2284  ;;  %3740 = vmatmul.bf16.vlgmr.msra.gmra.mxu1 %v6909_v41  ;;  %v2232_v16 = vshll.u32 %v2231_v33, 16 }
 0x536   : > { %v2286_v35 = vcvt.f32.s32 %v2285_v46  ;;  %v2261_v4 = vadd.s32 %v2260_v55, %v2258_v27  ;;  %v2317_v50 = vadd.s32 %v2316_v24, %v2314_v57  ;;  %3813 = vmatpush.bf16.msrb.mxu3 %v5482_v25  ;;  %3788 = vmatpush.bf16.msrb.mxu1 %v5465_v26  ;;  %v5471_v24 = vld [vmem:[#allocation10 + $0x288] sm:$0xff]  ;;  %v5493_v26 = vld [vmem:[#allocation10 + $0x338] sm:$0xff]  ;;  %v5462_v46 = vld [vmem:[#allocation10 + $0x240] sm:$0xff] }
 0x537   : > { %3753 = vmatmul.bf16.vlgmr.msra.gmra.mxu2 %v2605_v3  ;;  %v5479_v57 = vld [vmem:[#allocation10 + $0x2c8] sm:$0xff] }
 0x538   : > { %v2289_v61 = vadd.s32 %v2288_v2, %v2286_v35  ;;  %vm2407_vm3 = vcmp.eq.s32.totalorder %v7217_v19, %v2261_v4  ;;  %vm2411_vm4 = vcmp.eq.s32.totalorder %v7217_v19, %v2317_v50  ;;  %3801 = vmatpush.bf16.msrb.mxu2 %v5473_v49  ;;  %3776 = vmatpush.bf16.msrb.mxu0 %v5456_v58  ;;  %v5501_v2 = vld [vmem:[#allocation10 + $0x378] sm:$0xff]  ;;  %v5470_v58 = vld [vmem:[#allocation10 + $0x280] sm:$0xff] }
 0x539   : > { %v4726_v41 = vsel %vm2407_vm3, 1.0, %v6127_v48  ;;  %3766 = vmatmul.bf16.vlgmr.msra.gmra.mxu3 %v6922_v62  ;;  %v4730_v8 = vsel %vm2411_vm4, 1.0, %v6127_v48  ;;  %v2529_v62 = vrot.slane %v2463_v13, 4 }
 0x53a   : > { %vm2409_vm5 = vcmp.eq.s32.totalorder %v7217_v19, %v2289_v61  ;;  %v2455_v17 = vpack.c.bf16 %v4726_v41, %v4726_v41  ;;  %3814 = vmatpush.bf16.msrb.mxu3 %v5481_v34  ;;  %3789 = vmatpush.bf16.msrb.mxu1 %v5464_v42  ;;  %v2459_v9 = vpack.c.bf16 %v4730_v8, %v4730_v8  ;;  %v5516_v8 = vld [vmem:[#allocation10 + $0x3f0] sm:$0xff] }
 0x53b   : > { %v4728_v21 = vsel %vm2409_vm5, 1.0, %v6127_v48  ;;  %v2341_v0 = vpop.xlane.xlu1 %2340  ;;  %v2229_v3 = vpop.xlane.xlu0 %2228 }
 0x53c   : > { %v2457_v29 = vpack.c.bf16 %v4728_v21, %v4728_v21  ;;  %v2342_v31 = vcvt.f32.s32 %v2341_v0  ;;  %v2230_v40 = vcvt.f32.s32 %v2229_v3  ;;  %3802 = vmatpush.bf16.msrb.mxu2 %v5472_v28  ;;  %3777 = vmatpush.bf16.msrb.mxu0 %v5455_v39  ;;  %v2530_v55 = vsel %vm1746_vm6, %v2529_v62, %v2455_v17  ;;  %v5517_v39 = vld [vmem:[#allocation10 + $0x3f8] sm:$0xff]  ;;  %v5500_v21 = vld [vmem:[#allocation10 + $0x370] sm:$0xff]  ;;  %v5491_v0 = vld [vmem:[#allocation10 + $0x328] sm:$0xff] }
 0x53d   : > { %v2201_v52 = vpop.xlane.xlu2 %2200  ;;  %v2534_v12 = vperm.slane %v2530_v55, %v7218_v11  ;;  %v2523_v61 = vrot.slane %v2459_v9, 4 }
 0x53e   : > { %v2558_v22 = vsel %vm1746_vm6, %v2557_v1, %v2457_v29  ;;  %v2202_v45 = vcvt.f32.s32 %v2201_v52  ;;  %v2345_v7 = vadd.s32 %v2344_v15, %v2342_v31  ;;  %v2233_v25 = vadd.s32 %v2232_v16, %v2230_v40  ;;  %3815 = vmatpush.bf16.msrb.mxu3 %v5480_v18  ;;  %3790 = vmatpush.bf16.msrb.mxu1 %v5463_v63  ;;  %v5508_v29 = vld [vmem:[#allocation10 + $0x3b0] sm:$0xff]  ;;  %v5499_v31 = vld [vmem:[#allocation10 + $0x368] sm:$0xff] }
 0x53f   : > { %v6962_v34 = vperm.slane %v2558_v22, %v7218_v11  ;;  %v2535_v15 = vrot.slane %v2534_v12, 4  ;;  %v5507_v22 = vld [vmem:[#allocation10 + $0x3a8] sm:$0xff] }
 0x540   : > { %v2205_v27 = vadd.s32 %v2204_v37, %v2202_v45  ;;  %vm2413_vm7 = vcmp.eq.s32.totalorder %v7217_v19, %v2345_v7  ;;  %vm2405_vm8 = vcmp.eq.s32.totalorder %v7217_v19, %v2233_v25  ;;  %3803 = vmatpush.bf16.msrb.mxu2 %v5471_v24  ;;  %3778 = vmatpush.bf16.msrb.mxu0 %v5454_v6 }
 0x541   : > { %v4732_v35 = vsel %vm2413_vm7, 1.0, %v6127_v48  ;;  %v4724_v49 = vsel %vm2405_vm8, 1.0, %v6127_v48  ;;  %v2563_v3 = vrot.slane %v6962_v34, 4 }
 0x542   : > { %vm2403_vm9 = vcmp.eq.s32.totalorder %v7217_v19, %v2205_v27  ;;  %v2461_v4 = vpack.c.bf16 %v4732_v35, %v4732_v35  ;;  %3816 = vmatpush.bf16.msrb.mxu3 %v5479_v57  ;;  %3791 = vmatpush.bf16.msrb.mxu1 %v5462_v46  ;;  %v5478_v19 = vld [vmem:[#allocation10 + $0x2c0] sm:$0xff]  ;;  %v2453_v41 = vpack.c.bf16 %v4724_v49, %v4724_v49  ;;  %v5515_v35 = vld [vmem:[#allocation10 + $0x3e8] sm:$0xff] }
 0x543   : > { %v4722_v50 = vsel %vm2403_vm9, 1.0, %v6127_v48  ;;  %v2055_v33 = vpop.xlane.xlu1 %2054  ;;  %v2053_v43 = vpop.xlane.xlu0 %2052 }
 0x544   : > { %3823 = vmatpush.bf16.msra.mxu0 %v5493_v26  ;;  %v2451_v42 = vpack.c.bf16 %v4722_v50, %v4722_v50  ;;  %v2551_v13 = vrot.slane %v2461_v4, 4  ;;  %5721 = vrcp.f32 %v2053_v43  ;;  %3804 = vmatpush.bf16.msrb.mxu2 %v5470_v58  ;;  %v5490_v26 = vld [vmem:[#allocation10 + $0x320] sm:$0xff] }
 0x545   : > { %v2051_v28 = vpop.xlane.xlu2 %2050  ;;  %v5498_v4 = vld [vmem:[#allocation10 + $0x360] sm:$0xff] }
 0x546   : > { %3836 = vmatpush.bf16.msra.mxu1 %v5501_v2  ;;  %v2524_v48 = vsel %vm1746_vm6, %v2523_v61, %v2451_v42  ;;  %v2552_v1 = vsel %vm1746_vm6, %v2551_v13, %v2453_v41  ;;  %5723 = vrcp.f32 %v2051_v28  ;;  %3817 = vmatpush.bf16.msrb.mxu3 %v5478_v19  ;;  %v5506_v42 = vld [vmem:[#allocation10 + $0x3a0] sm:$0xff] }
 0x547   : > { %v2528_v17 = vperm.slane %v2524_v48, %v7218_v11  ;;  %v2556_v18 = vperm.slane %v2552_v1, %v7218_v11  ;;  %5725 = vrcp.f32 %v2055_v33 }
 0x548   : > { %3849 = vmatpush.bf16.msra.mxu2 %v5509_v60  ;;  %3824 = vmatpush.bf16.msra.mxu0 %v5492_v30 }
 0x549   : > { %v2537_v63 = vrot.slane %v2528_v17, 4  ;;  %v2536_v16 = vsel %vm1746_vm6, %v2535_v15, %v2528_v17  ;;  %v2564_v52 = vsel %vm1746_vm6, %v2563_v3, %v2556_v18  ;;  %v2565_v37 = vrot.slane %v2556_v18, 4  ;;  %v5505_v18 = vld [vmem:[#allocation10 + $0x398] sm:$0xff] }
 0x54a   : > { %3862 = vmatpush.bf16.msra.mxu3 %v5517_v39  ;;  %3837 = vmatpush.bf16.msra.mxu1 %v5500_v21  ;;  %v2542_v40 = vperm.slane %v2536_v16, %v7219_v44  ;;  %v2570_v62 = vperm.slane %v2564_v52, %v7219_v44  ;;  %v5722_v45 = vpop.eup %5721  ;;  %v5497_v39 = vld [vmem:[#allocation10 + $0x358] sm:$0xff] }
 0x54b   : > { %v2538_v11 = vsel %vm1746_vm6, %v2534_v12, %v2537_v63  ;;  %v2061_v24 = vpop.xlane.xlu1 %2060  ;;  %v2059_v6 = vpop.xlane.xlu0 %2058  ;;  %v2099_v27 = vmul.f32 %v5722_v45, %v6800_v10  ;;  %v2566_v60 = vsel %vm1746_vm6, %v6962_v34, %v2565_v37  ;;  %v5514_v34 = vld [vmem:[#allocation10 + $0x3e0] sm:$0xff]  ;;  %v5488_v63 = vld [vmem:[#allocation10 + $0x310] sm:$0xff]  ;;  %v5513_v45 = vld [vmem:[#allocation10 + $0x3d8] sm:$0xff] }
 0x54c   : > { %3850 = vmatpush.bf16.msra.mxu2 %v5508_v29  ;;  %3825 = vmatpush.bf16.msra.mxu0 %v5491_v0  ;;  %v2615_v7 = vshrl.u32 %v2542_v40, 16  ;;  %v2547_v25 = vrot.slane %v2542_v40, 4  ;;  %v6976_v55 = vperm.slane %v2538_v11, %v7219_v44  ;;  %v5724_v9 = vpop.eup %5723  ;;  %5727 = vrcp.f32 %v2061_v24  ;;  %v5496_v24 = vld [vmem:[#allocation10 + $0x350] sm:$0xff] }
 0x54d   : > { %v2057_v57 = vpop.xlane.xlu2 %2056  ;;  %v2613_v46 = vpack.i.b16 %v2570_v62, %v2542_v40  ;;  %v2616_v2 = vshrl.u32 %v2570_v62, 16  ;;  %v2098_v49 = vmul.f32 %v5724_v9, %v6802_v32  ;;  %5729 = vrcp.f32 %v2059_v6  ;;  %v5489_v32 = vld [vmem:[#allocation10 + $0x318] sm:$0xff]  ;;  %v5726_v28 = vpop.eup %5725 }
 0x54e   : > { %3863 = vmatpush.bf16.msra.mxu3 %v5516_v8  ;;  %3838 = vmatpush.bf16.msra.mxu1 %v5499_v31  ;;  %v2548_v58 = vsel %vm1746_vm6, 0, %v2547_v25  ;;  %v2575_v12 = vrot.slane %v2570_v62, 4  ;;  %5731 = vrcp.f32 %v2057_v57  ;;  %v6985_v33 = vperm.slane %v2566_v60, %v7219_v44  ;;  %v5504_v25 = vld [vmem:[#allocation10 + $0x390] sm:$0xff]  ;;  %v5502_v60 = vld [vmem:[#allocation10 + $0x380] sm:$0xff] }
 0x54f   : > { %3779 = vmatmul.bf16.vlgmr.msrb.gmra.mxu0 %v2613_v46  ;;  %v2617_v50 = vpack.i.b16 %v2616_v2, %v2615_v7  ;;  %v2623_v10 = vshrl.u32 %v2548_v58, 16  ;;  %v5524_v30 = vpack.c.bf16 %v2099_v27, %v2098_v49  ;;  %v2631_v43 = vshrl.u32 %v6976_v55, 16  ;;  %v5503_v46 = vld [vmem:[#allocation10 + $0x388] sm:$0xff]  ;;  %v5486_v2 = vld [vmem:[#allocation10 + $0x300] sm:$0xff] }
 0x550   : > { %3851 = vmatpush.bf16.msra.mxu2 %v5507_v22  ;;  %v2576_v61 = vsel %vm1746_vm6, 0, %v2575_v12  ;;  %3826 = vmatpush.bf16.msra.mxu0 %v5490_v26  ;;  %v2549_v41 = vrot.slane %v6976_v55, 4  ;;  %v2629_v44 = vpack.i.b16 %v6985_v33, %v6976_v55  ;;  %v2632_v21 = vshrl.u32 %v6985_v33, 16  ;;  %v5487_v26 = vld [vmem:[#allocation10 + $0x308] sm:$0xff] }
 0x551   : > { %3792 = vmatmul.bf16.vlgmr.msrb.gmra.mxu1 %v2617_v50  ;;  %v2621_v19 = vpack.i.b16 %v2576_v61, %v2548_v58  ;;  %v2624_v13 = vshrl.u32 %v2576_v61, 16  ;;  %5525 = vst [vmem:[%s6991_s28] sm:$0xff] %v5524_v30   ;;  %v2577_v48 = vrot.slane %v6985_v33, 4  ;;  %v2100_v22 = vmul.f32 %v5726_v28, %v6798_v47  ;;  %v5512_v47 = vld [vmem:[#allocation10 + $0x3d0] sm:$0xff]  ;;  %v5494_v50 = vld [vmem:[#allocation10 + $0x340] sm:$0xff] }
 0x552   : > { %3864 = vmatpush.bf16.msra.mxu3 %v5515_v35  ;;  %3839 = vmatpush.bf16.msra.mxu1 %v5498_v4  ;;  %v5728_v15 = vpop.eup %5727  ;;  %v6999_v17 = vsel %vm1746_vm6, 0, %v2549_v41  ;;  %v7002_v16 = vpack.i.b16 %v2632_v21, %v2631_v43  ;;  %v5511_v4 = vld [vmem:[#allocation10 + $0x3c8] sm:$0xff]  ;;  %v5510_v61 = vld [vmem:[#allocation10 + $0x3c0] sm:$0xff] }
 0x553   : > { %3805 = vmatmul.bf16.vlgmr.msrb.gmra.mxu2 %v2621_v19  ;;  %v2625_v1 = vpack.i.b16 %v2624_v13, %v2623_v10  ;;  %v5730_v29 = vpop.eup %5729  ;;  %v2103_v0 = vmul.f32 %v5728_v15, %v6815_v14  ;;  %v2065_v3 = vpop.xlane.xlu0 %2064  ;;  %v7005_v8 = vsel %vm1746_vm6, 0, %v2577_v48  ;;  %v2639_v31 = vshrl.u32 %v6999_v17, 16 }
 0x554   : > { %3852 = vmatpush.bf16.msra.mxu2 %v5506_v42  ;;  %3827 = vmatpush.bf16.msra.mxu0 %v5489_v32  ;;  %v5732_v40 = vpop.eup %5731  ;;  %v2102_v52 = vmul.f32 %v5730_v29, %v6813_v56  ;;  %v2637_v14 = vpack.i.b16 %v7005_v8, %v6999_v17  ;;  %v2640_v62 = vshrl.u32 %v7005_v8, 16  ;;  %5733 = vrcp.f32 %v2065_v3  ;;  %v2067_v9 = vpop.xlane.xlu1 %2066 }
 0x555   : > { %3818 = vmatmul.bf16.vlgmr.msrb.gmra.mxu3 %v2625_v1  ;;  %v2063_v37 = vpop.xlane.xlu2 %2062  ;;  %v2101_v11 = vmul.f32 %v5732_v40, %v6817_v38  ;;  %v5495_v38 = vld [vmem:[#allocation10 + $0x348] sm:$0xff] }
 0x556   : > { %3865 = vmatpush.bf16.msra.mxu3 %v5514_v34  ;;  %3840 = vmatpush.bf16.msra.mxu1 %v5497_v39  ;;  %v5534_v6 = vpack.c.bf16 %v2103_v0, %v2102_v52  ;;  %5735 = vrcp.f32 %v2063_v37  ;;  %v2641_v56 = vpack.i.b16 %v2640_v62, %v2639_v31 }
 0x557   : > { %v5529_v7 = vpack.c.bf16 %v2101_v11, %v2100_v22  ;;  %5737 = vrcp.f32 %v2067_v9 }
 0x558   : > { %3853 = vmatpush.bf16.msra.mxu2 %v5505_v18  ;;  %3828 = vmatpush.bf16.msra.mxu0 %v5488_v63  ;;  %5562 = vst [vmem:[%s6991_s28 + $0x10] sm:$0xff] %v5534_v6  }
 0x559   : > { %5561 = vst [vmem:[%s6991_s28 + $0x8] sm:$0xff] %v5529_v7  }
 0x55a   : > { %3866 = vmatpush.bf16.msra.mxu3 %v5513_v45  ;;  %3841 = vmatpush.bf16.msra.mxu1 %v5496_v24  ;;  %v5734_v27 = vpop.eup %5733 }
 0x55b   : > { %v7016_v57 = vpop.xlane.xlu0 %2070  ;;  %v2105_v58 = vmul.f32 %v5734_v27, %v6828_v54 }
 0x55c   : > { %3854 = vmatpush.bf16.msra.mxu2 %v5504_v25  ;;  %3829 = vmatpush.bf16.msra.mxu0 %v5487_v26  ;;  %v5736_v35 = vpop.eup %5735 }
 0x55d   : > { %v2069_v49 = vpop.xlane.xlu2 %2068  ;;  %v2104_v12 = vmul.f32 %v5736_v35, %v6830_v51  ;;  %v5738_v30 = vpop.eup %5737 }
 0x55e   : > { %5739 = vrcp.f32 %v2069_v49  ;;  %3867 = vmatpush.bf16.msra.mxu3 %v5512_v47  ;;  %3842 = vmatpush.bf16.msra.mxu1 %v5495_v38  ;;  %v2106_v42 = vmul.f32 %v5738_v30, %v6826_v23  ;;  %v5759_v30 = vld [vmem:[%s6362_s18] sm:$0xff] }
 0x55f   : > { %v5539_v10 = vpack.c.bf16 %v2105_v58, %v2104_v12  ;;  %v7220_v12 = vld [vmem:[#allocation37_spill] sm:$0xff] }
 0x560   : > { %3855 = vmatpush.bf16.msra.mxu2 %v5503_v46  ;;  %3830 = vmatpush.bf16.msra.mxu0 %v5486_v2 }
 0x561   : > { %5563 = vst [vmem:[%s6991_s28 + $0x18] sm:$0xff] %v5539_v10  }
 0x562   : > { %3868 = vmatpush.bf16.msra.mxu3 %v5511_v4  ;;  %3843 = vmatpush.bf16.msra.mxu1 %v5494_v50  ;;  %v7221_v4 = vld [vmem:[#allocation32_spill] sm:$0xff] }
 0x563   : > { %3831 = vmatmul.bf16.vlgmr.msra.gmra.mxu0 %v2629_v44  ;;  %v2077_v51 = vpop.xlane.xlu0 %2076  ;;  %v2013_v50 = vsub.f32 %v7221_v4, %v7220_v12 }
 0x564   : > { %v5740_v54 = vpop.eup %5739  ;;  %3856 = vmatpush.bf16.msra.mxu2 %v5502_v60  ;;  %5741 = vrcp.f32 %v2077_v51 }
 0x565   : > { %v2107_v32 = vmul.f32 %v5740_v54, %v6841_v59  ;;  %v2075_v43 = vpop.xlane.xlu2 %2074  ;;  %3844 = vmatmul.bf16.vlgmr.msra.gmra.mxu1 %v7002_v16  ;;  %v2040_v54 = vmul.f32 1.442695, %v2013_v50 }
 0x566   : > { %5743 = vrcp.f32 %v2075_v43  ;;  %3869 = vmatpush.bf16.msra.mxu3 %v5510_v61  ;;  %v7223_v43 = vld [vmem:[#allocation29_spill] sm:$0xff] }
 0x567   : > { %v5544_v19 = vpack.c.bf16 %v2107_v32, %v2106_v42  ;;  %3857 = vmatmul.bf16.vlgmr.msra.gmra.mxu2 %v2637_v14  ;;  %v7222_v32 = vld [vmem:[#allocation34_spill] sm:$0xff]  ;;  %5745 = vpow2.f32 %v2040_v54 }
 0x569   : > { %5564 = vst [vmem:[%s6991_s28 + $0x20] sm:$0xff] %v5544_v19   ;;  %3870 = vmatmul.bf16.vlgmr.msra.gmra.mxu3 %v2641_v56  ;;  %v2016_v19 = vsub.f32 %v7223_v43, %v7222_v32 }
 0x56a   : > { %v5742_v55 = vpop.eup %5741 }
 0x56b   : > { %v2111_v13 = vmul.f32 %v5742_v55, %v6847_v5 }
 0x56c   : > { %v5744_v33 = vpop.eup %5743 }
 0x56d   : > { %v2110_v41 = vmul.f32 %v5744_v33, %v6849_v36  ;;  %v2046_v33 = vmul.f32 1.442695, %v2016_v19 }
 0x56f   : > { %v5554_v23 = vpack.c.bf16 %v2111_v13, %v2110_v41  ;;  %v7040_v13 = vpop.eup %5745  ;;  %5747 = vpow2.f32 %v2046_v33 }
 0x571   : > { %5566 = vst [vmem:[%s6991_s28 + $0x30] sm:$0xff] %v5554_v23  }
 0x575   : > { %v7043_v41 = vpop.eup %5747 }
 0x5a0   : > { %v3676_v28 = vpop.f32.mrf.mxu0 }
 0x5a2   : > { %v3689_v59 = vpop.f32.mrf.mxu1 }
 0x5a3   : > { %v3690_v5 = vadd.f32 %v3689_v59, %v3676_v28 }
 0x5a8   : > { %v3678_v34 = vpop.f32.mrf.mxu0 }
 0x5aa   : > { %v3702_v39 = vpop.f32.mrf.mxu2  ;;  %v3691_v44 = vpop.f32.mrf.mxu1 }
 0x5ab   : > { %v3703_v36 = vadd.f32 %v3702_v39, %v3690_v5 }
 0x5ac   : > { %v3715_v21 = vpop.f32.mrf.mxu3 }
 0x5ad   : > { %v3716_v8 = vadd.f32 %v3715_v21, %v3703_v36 }
 0x5b0   : > { %v3728_v48 = vpop.f32.mrf.mxu0 }
 0x5b1   : > { %v3729_v40 = vadd.f32 %v3728_v48, %v3716_v8 }
 0x5b2   : > { %v3704_v15 = vpop.f32.mrf.mxu2  ;;  %v3741_v1 = vpop.f32.mrf.mxu1 }
 0x5b3   : > { %v3742_v37 = vadd.f32 %v3741_v1, %v3729_v40 }
 0x5b4   : > { %v3717_v17 = vpop.f32.mrf.mxu3 }
 0x5b8   : > { %v3730_v29 = vpop.f32.mrf.mxu0 }
 0x5ba   : > { %v3754_v0 = vpop.f32.mrf.mxu2  ;;  %v3743_v3 = vpop.f32.mrf.mxu1 }
 0x5bb   : > { %v3755_v14 = vadd.f32 %v3754_v0, %v3742_v37 }
 0x5bc   : > { %v3767_v18 = vpop.f32.mrf.mxu3 }
 0x5bd   : > { %v3768_v45 = vadd.f32 %v3767_v18, %v3755_v14 }
 0x5c2   : > { %v3756_v63 = vpop.f32.mrf.mxu2 }
 0x5c4   : > { %v3769_v16 = vpop.f32.mrf.mxu3 }
 0x5cc   : > { %v3780_v31 = vpop.f32.mrf.mxu0 }
 0x5cd   : > { %v3781_v6 = vadd.f32 %v3780_v31, %v3768_v45 }
 0x5ce   : > { %v3793_v52 = vpop.f32.mrf.mxu1 }
 0x5cf   : > { %v3794_v56 = vadd.f32 %v3793_v52, %v3781_v6 }
 0x5d4   : > { %v3782_v62 = vpop.f32.mrf.mxu0 }
 0x5d6   : > { %v3806_v22 = vpop.f32.mrf.mxu2  ;;  %v3795_v11 = vpop.f32.mrf.mxu1 }
 0x5d7   : > { %v3807_v25 = vadd.f32 %v3806_v22, %v3794_v56 }
 0x5d8   : > { %v3819_v24 = vpop.f32.mrf.mxu3 }
 0x5d9   : > { %v3820_v38 = vadd.f32 %v3819_v24, %v3807_v25 }
 0x5de   : > { %v3808_v7 = vpop.f32.mrf.mxu2 }
 0x5e0   : > { %v3821_v26 = vpop.f32.mrf.mxu3  ;;  %v3832_v9 = vpop.f32.mrf.mxu0 }
 0x5e1   : > { %v3833_v27 = vadd.f32 %v3832_v9, %v3820_v38 }
 0x5e2   : > { %v3845_v47 = vpop.f32.mrf.mxu1 }
 0x5e3   : > { %v3846_v2 = vadd.f32 %v3845_v47, %v3833_v27 }
 0x5e8   : > { %v3834_v46 = vpop.f32.mrf.mxu0 }
 0x5ea   : > { %v3858_v35 = vpop.f32.mrf.mxu2  ;;  %v3847_v49 = vpop.f32.mrf.mxu1 }
 0x5eb   : > { %v3859_v58 = vadd.f32 %v3858_v35, %v3846_v2 }
 0x5ec   : > { %v3871_v10 = vpop.f32.mrf.mxu3 }
 0x5ed   : > { %v3872_v60 = vadd.f32 %v3871_v10, %v3859_v58 }
 0x5ef   : > { %v7034_v61 = vadd.f32 %v5759_v30, %v3872_v60 }
 0x5f1   : > { %v3876_v51 = vmul.f32 %v7034_v61, %v7034_v61 }
 0x5f2   : > { %v3860_v42 = vpop.f32.mrf.mxu2 }
 0x5f3   : > { %3877 = vadd.xlane.f32.xlu1 %v3876_v51 }
 0x5f4   : > { %v3873_v55 = vpop.f32.mrf.mxu3 }
 0x5fb   : > { %2072 = vadd.xlane.f32.xlu1 %v7040_v13 }
 0x603   : > { %2078 = vadd.xlane.f32.xlu1 %v7043_v41 }
 0x604   : > { %5967 = shalt.err (!%p5964_p8)
}
 0x605   : > { %5591 = dma.vmem_to_hbm [thread:$0]  (%p6278_p2), %s3936_s2, 128, %s3938_s5, %s7054_s21  }
 0x606   : > { %s5518_s18 = sshll.u32 %s6209_s20, 4  ;;  %s3921_s17 = sshll.u32 %s6344_s1, 4  ;;  %s3922_s17 = int_to_ptr.vmem [resolvable:$true] %s3921_s17 }
 0x607   : > { %s3919_s4 = scalar_lea.hbm %s7153_s7, %s5518_s18  ;;  %s3893_s3 = scalar_lea.sflag [#allocation4], %s6309_s19 }
 0x608   : > { %s3923_s6 = sshll.u32 %s3919_s4, 4  ;;  %s5988_s2 = scalar_lea.hbm %s7153_s7, 48  ;;  %s3924_s6 = int_to_ptr.hbm [resolvable:$true] %s3923_s6 }
 0x609   : > { %s5982_s22 = sshra.s32 %s3924_s6, 4  ;;  %s5983_s22 = int_to_ptr.hbm [resolvable:$true] %s5982_s22 }
 0x60a   : > { %s5984_s27 = scalar_lea.hbm %s5983_s22, 16  ;;  %p5989_p13 = scmp.lt.s32.totalorder %s5983_s22, %s7153_s7 }
 0x60b   : > { %p5985_p9 = scmp.ne.s32.totalorder %s5983_s22, %s5984_s27  ;;  %p5990_p0 = scmp.lt.s32.totalorder %s5988_s2, %s5984_s27 }
 0x60d   : > { %p5986_p10 = pnand %p5985_p9, %p6278_p2  ;;  %p5991_p1 = por %p5990_p0, %p5989_p13 }
 0x60f   : > { %p5987_p12 = pneg %p5986_p10 }
 0x611   : > { %p5992_p3 = pnand %p5991_p1, %p5987_p12 }
 0x613   : > { %5995 = shalt.err (!%p5992_p3)
}
 0x614   : > { %5590 = dma.vmem_to_hbm [thread:$0]  (%p6278_p2), %s3922_s17, 256, %s3924_s6, %s3893_s3   ;;  %v2081_v44 = vpop.xlane.xlu2 %2080 }
 0x615   : > { %s7224_s1 = sshll.u32 %s6209_s20, 3  ;;  %s5520_s0 = sshll.u32 %s6209_s20, 6 }
 0x616   : > { %s3965_s29 = scalar_lea.hbm %s7156_s10, %s7224_s1  ;;  %s485_s4 = scalar_lea.vmem [#allocation17], %s6312_s12 }
 0x617   : > { %s7093_s17 = sshll.u32 %s485_s4, 4  ;;  %s3969_s6 = sshll.u32 %s3965_s29, 4  ;;  %s3968_s17 = int_to_ptr.vmem [resolvable:$true] %s7093_s17  ;;  %s3970_s6 = int_to_ptr.hbm [resolvable:$true] %s3969_s6 }
 0x618   : > { %s7225_s27 = sld [smem:[#allocation46_spill]]  ;;  %s3950_s20 = sshll.u32 %s6991_s28, 4  ;;  %s3951_s20 = int_to_ptr.vmem [resolvable:$true] %s3950_s20 }
 0x619   : > { %s3908_s11 = scalar_lea.sflag [#allocation18], %s6309_s19  ;;  %s6010_s2 = sshra.s32 %s3970_s6, 4  ;;  %s6011_s2 = int_to_ptr.hbm [resolvable:$true] %s6010_s2 }
 0x61a   : > { %s6012_s5 = scalar_lea.hbm %s6011_s2, 8  ;;  %s6016_s18 = scalar_lea.hbm %s7156_s10, 24 }
 0x61b   : > { %p6013_p11 = scmp.ne.s32.totalorder %s6011_s2, %s6012_s5  ;;  %p6017_p7 = scmp.lt.s32.totalorder %s6011_s2, %s7156_s10 }
 0x61c   : > { %p6018_p8 = scmp.lt.s32.totalorder %s6016_s18, %s6012_s5 }
 0x61d   : > { %p6014_p5 = pnand %p6013_p11, %p6278_p2 }
 0x61e   : > { %s3949_s25 = scalar_lea.hbm %s7225_s27, %s5520_s0  ;;  %p6019_p9 = por %p6018_p8, %p6017_p7 }
 0x61f   : > { %s3952_s12 = sshll.u32 %s3949_s25, 4  ;;  %p6015_p6 = pneg %p6014_p5  ;;  %s3953_s12 = int_to_ptr.hbm [resolvable:$true] %s3952_s12 }
 0x621   : > { %p6020_p10 = pnand %p6019_p9, %p6015_p6 }
 0x666   : > { %v3878_v23 = vpop.xlane.xlu1 %3877 }
 0x667   : > { %v3879_v28 = vmax.f32 %v3878_v23, 1e-24 }
 0x669   : > { %5749 = vrsqrt.f32 %v3879_v28  ;;  %vm3886_vm10 = vweird.f32 %v3879_v28 }
 0x66a   : > { %5751 = vrcp.f32 %v7016_v57 }
 0x66e   : > { %v2073_v59 = vpop.xlane.xlu1 %2072 }
 0x66f   : > { %v5750_v34 = vpop.eup %5749  ;;  %5753 = vrcp.f32 %v2073_v59 }
 0x670   : > { %v3881_v39 = vmul.f32 %v5750_v34, %v3879_v28  ;;  %v5752_v48 = vpop.eup %5751  ;;  %5755 = vrcp.f32 %v2081_v44  ;;  %vm3887_vm6 = vweird.f32 %v5750_v34 }
 0x671   : > { %v2108_v57 = vmul.f32 %v5752_v48, %v6839_v53  ;;  %vm3888_vm11 = vmor %vm3886_vm10, %vm3887_vm6 }
 0x672   : > { %v3882_v21 = vmul.f32 %v5750_v34, %v3881_v39 }
 0x674   : > { %v3883_v15 = vmul.f32 0.5, %v3882_v21 }
 0x675   : > { %v5754_v1 = vpop.eup %5753 }
 0x676   : > { %v3884_v17 = vsub.f32 1.5, %v3883_v15  ;;  %v2109_v29 = vmul.f32 %v5754_v1, %v7040_v13  ;;  %v2079_v0 = vpop.xlane.xlu1 %2078  ;;  %v5756_v53 = vpop.eup %5755 }
 0x677   : > { %5757 = vrcp.f32 %v2079_v0  ;;  %v2113_v36 = vmul.f32 %v5756_v53, %v6853_v20 }
 0x678   : > { %v3885_v3 = vmul.f32 %v5750_v34, %v3884_v17  ;;  %v5549_v18 = vpack.c.bf16 %v2109_v29, %v2108_v57 }
 0x67a   : > { %v3889_v63 = vsel %vm3888_vm11, %v5750_v34, %v3885_v3  ;;  %5565 = vst [vmem:[%s6991_s28 + $0x28] sm:$0xff] %v5549_v18  }
 0x67b   : > { %v3890_v5 = vmul.f32 %v3889_v63, %v7034_v61 }
 0x67d   : > { %v5758_v16 = vpop.eup %5757  ;;  %3891 = vst [vmem:[%s485_s4] sm:$0xff] %v3890_v5 }
 0x67e   : > { %v2112_v8 = vmul.f32 %v5758_v16, %v7043_v41 }
 0x67f   : > { %6023 = shalt.err (!%p6020_p10)
}
 0x680   : > { %5593 = dma.vmem_to_hbm [thread:$0]  (%p6278_p2), %s3968_s17, 128, %s3970_s6, %s3908_s11   ;;  %v5559_v20 = vpack.c.bf16 %v2113_v36, %v2112_v8 }
 0x681   : > { %s6038_s19 = sshra.s32 %s3953_s12, 4  ;;  %s6044_s25 = scalar_lea.hbm %s7225_s27, 192  ;;  %s6039_s19 = int_to_ptr.hbm [resolvable:$true] %s6038_s19 }
 0x682   : > { %5567 = vst [vmem:[%s6991_s28 + $0x38] sm:$0xff] %v5559_v20   ;;  %s6040_s4 = scalar_lea.hbm %s6039_s19, 64  ;;  %p6045_p1 = scmp.lt.s32.totalorder %s6039_s19, %s7225_s27 }
 0x683   : > { %p6041_p12 = scmp.ne.s32.totalorder %s6039_s19, %s6040_s4  ;;  %p6046_p3 = scmp.lt.s32.totalorder %s6044_s25, %s6040_s4 }
 0x685   : > { %p6042_p13 = pnand %p6041_p12, %p6278_p2  ;;  %p6047_p11 = por %p6046_p3, %p6045_p1 }
 0x687   : > { %p6043_p0 = pneg %p6042_p13 }
 0x689   : > { %p6048_p5 = pnand %p6047_p11, %p6043_p0 }
 0x68b   : > { %6051 = shalt.err (!%p6048_p5)
}
 0x68c   : > { %s6128_s28 = smov 64   ;;  %s6129_s17 = smov 4  }
 0x68d   : > { %5592 = dma.vmem_to_hbm [thread:$0]  (%p6278_p2), %s3951_s20, 1024, %s3953_s12, %s7054_s21, %s6128_s28, %s6128_s28, %s6129_s17  }
 0x68e PF: > { %p5642_p6 = scmp.ge.s32.totalorder %s6110_s16, 2  ;;  %s3981_s6 = sand.u32 1, %s6098_s13  }
 0x68f   : > { %s3982_s11 = scalar_lea.sflag [#allocation4], %s3981_s6 }
 0x690   : > { %p5619_p7 = pnand %p5642_p6, %p6282_p4 }
 0x692   : > { %p5620_p8 = pneg %p5619_p7 }
 0x694   : > { %6085 = dma.done.wait (%p5620_p8), %s3982_s11, 256  }
 0x695   : > { %6087 = vsyncadd (%p5620_p8), %s3982_s11, 4294967040  ;;  %s7226_s1 = sadd.s32 4294967294, %s6110_s16  }
 0x696   : > { %s3991_s30 = sand.u32 1, %s7226_s1  }
 0x697   : > { %s3992_s18 = scalar_lea.sflag [#allocation15], %s3991_s30 }
 0x698   : > { %6089 = dma.done.wait (%p5620_p8), %s3992_s18, 1152  }
 0x699   : > { %6091 = vsyncadd (%p5620_p8), %s3992_s18, 4294966144  ;;  %s4012_s23 = scalar_lea.sflag [#allocation18], %s3981_s6 }
 0x69a   : > { %6093 = dma.done.wait (%p5620_p8), %s4012_s23, 128  }
 0x69b   : > { %6095 = vsyncadd (%p5620_p8), %s4012_s23, 4294967168  ;;  %p33_p2 = scmp.ge.s32.totalorder %s6250_s24, 5   ;;  %s7227_s13 = smov %s6102_s14 }
 0x69c   : > { %s7228_s14 = smov %s6106_s15  ;;  %s7229_s15 = smov %s6261_s9 }
 0x69d   : > { %s7230_s16 = smov %s6250_s24  ;;  %35 = sbr.rel (!%p33_p2) target bundleno = 21 (0x15), region = 162 }
 0x6a2   :  { %4018 = vsyncpa [#allocation3], 1 }
 0x6a3   :  { %4020 = vsyncpa [#allocation3 + $0x1], 1 }
 0x6a4   :  { %4021 = vsyncpa [#allocation6], 1 }
 0x6a5   :  { %4022 = vsyncpa [#allocation9], 1 }
 0x6a6   :  { %4023 = vsyncpa [#allocation12], 1 }
 0x6a7   :  { %4024 = vsyncpa [#allocation4], 1 }
 0x6a8   :  { %4026 = vsyncpa [#allocation4 + $0x1], 1 }
 0x6a9   :  { %4027 = vsyncpa [#allocation15], 1 }
 0x6aa   :  { %4029 = vsyncpa [#allocation15 + $0x1], 1 }
 0x6ab   :  { %4030 = vsyncpa [#allocation18], 1 }
 0x6ac   :  { %4032 = vsyncpa [#allocation18 + $0x1], 1 }

</bundles_post_ra>
